<compile_context>
chip_gen: v5e
topology: v5e:2x2
jax: 0.10.0
libtpu: 0.0.40
codegen_flags: <defaults>
</compile_context>

<pallas_src>
import functools

import jax
import jax.numpy as jnp
from jax.experimental import pallas as pl
from jax.experimental.pallas import tpu as pltpu


# ----------------------------------------------------------------------------- kernel
def fastnerf_kernel(D, hp, hd, inp_ref, w_in_ref, b_ref, w_sq_ref,
                    w_po_ref, b_po_ref, out_ref):
    """One lane-dense tile of FastNerf forward_nn (channels-first layout).

    inp_ref : (in0 + dir_in, tm) bf16   [pos_enc ; dir_enc] channels-first
    w_in_ref: (2*(hp+hd), in0+dir_in) bf16
              rows: [pos0 L0 | dir L0 | pos1 L0 skip part | zeros]
    b_ref   : (hp+hd, 8) f32            col 0 = fused input-layer bias, cols 1..7 = square layers
    w_sq_ref: (7, hp+hd, hp+hd) bf16    block-diag pos ⊕ dir (dir block = hidden / out / identity)
    w_po_ref: (3D+1, hp) bf16, b_po_ref: (3D+1, 1) f32
    out_ref : (4, tm) f32               rows = [r, g, b, density]
    """
    f32, bf16 = jnp.float32, jnp.bfloat16
    hph = hp + hd

    def mm(w, x):  # bf16 MXU operands, f32 accumulation
        return jnp.dot(w, x, preferred_element_type=f32)

    inp = inp_ref[...]                                       # (din, tm) bf16
    t = mm(w_in_ref[...], inp)                               # (2*hph, tm) f32
    xh = jnp.maximum(t[:hph, :] + b_ref[:, 0:1], 0.0).astype(bf16)
    skip = t[hph:, :]                                        # (hph, tm); bottom hd rows == 0

    for l in range(7):
        pre = mm(w_sq_ref[l], xh) + b_ref[:, l + 1:l + 2]
        if l == 3:                                           # layers_pos1[0]: + skip(pos_enc)
            pre = pre + skip
        xh = jnp.maximum(pre, 0.0).astype(bf16)

    betas = xh[hp:hp + D, :].astype(f32)                     # (D, tm) dir-branch output (f32 reduce)
    x_out = mm(w_po_ref[...], xh[:hp, :]) + b_po_ref[...]    # (3D+1, tm) f32

    for c in range(3):                                       # rgb = sigmoid(sum_D(uvw * betas))
        s = jnp.sum(x_out[c * D:(c + 1) * D, :] * betas, axis=0, keepdims=True)
        out_ref[c:c + 1, :] = jax.nn.sigmoid(s).astype(out_ref.dtype)
    out_ref[3:4, :] = jnp.maximum(x_out[3 * D:3 * D + 1, :], 0.0).astype(out_ref.dtype)


# ----------------------------------------------------------------------------- params
def init_params(key, pos_in, conf_in, dir_in, hp, hd, layers_dir, D):
    """PyTorch-Linear-style init. Returns list of (W, b) per layer, W (fan_in, fan_out)."""
    in0 = pos_in + conf_in
    dims = [(in0, hp, None), (hp, hp, None), (hp, hp, None), (hp, hp, None),      # pos0
            (in0 + hp, hp, None), (hp, hp, None), (hp, hp, None), (hp, hp, None),
            (hp, 3 * D + 1, None),                                                # pos1
            (dir_in, hd, None)] + [(hd, hd, None)] * layers_dir + [(hd, D, 0.1)]  # dir
    keys = jax.random.split(key, len(dims))
    params = []
    for k, (fi, fo, bias_const) in zip(keys, dims):
        k1, k2 = jax.random.split(k)
        bound = 1.0 / (fi ** 0.5)
        w = jax.random.uniform(k1, (fi, fo), jnp.float32, -bound, bound)
        if bias_const is None:
            b = jax.random.uniform(k2, (fo,), jnp.float32, -bound, bound)
        else:
            b = jnp.full((fo,), bias_const, jnp.float32)
        params.append((w, b))
    return params


def pack_params(layer_params, *, in0, dir_in, hp, hd, D, layers_dir):
    """Block-diagonal pos ⊕ dir packing, weights pre-cast to bf16 (biases stay f32)."""
    assert layers_dir <= 6, "block-diag fusion implemented for layers_dir <= 6"
    f32, bf16 = jnp.float32, jnp.bfloat16
    pos0 = layer_params[:4]
    pos1 = layer_params[4:9]
    dirl = layer_params[9:]
    assert len(dirl) == 2 + layers_dir

    wT = lambda w: jnp.asarray(w, f32).T        # (fan_out, fan_in)
    vec = lambda b: jnp.asarray(b, f32)

    hph = hp + hd
    din = in0 + dir_in

    # ---- fused input dot: rows [pos hidden | dir hidden | pos1-L0 skip | zero pad]
    w_in = jnp.zeros((2 * hph, din), f32)
    w_in = w_in.at[:hp, :in0].set(wT(pos0[0][0]))
    w_in = w_in.at[hp:hph, in0:].set(wT(dirl[0][0]))
    w_pos1_full = jnp.asarray(pos1[0][0], f32)               # (in0 + hp, hp)
    w_in = w_in.at[hph:hph + hp, :in0].set(w_pos1_full[:in0].T)
    w_pos1_x = w_pos1_full[in0:].T                           # (hp, hp)

    # ---- 7 fused square layers: pos part
    pos_sq = [wT(pos0[i][0]) for i in (1, 2, 3)] + [w_pos1_x] \
        + [wT(pos1[i][0]) for i in (1, 2, 3)]
    pos_sq_b = [vec(pos0[i][1]) for i in (1, 2, 3)] + [vec(pos1[0][1])] \
        + [vec(pos1[i][1]) for i in (1, 2, 3)]

    # ---- 7 fused square layers: dir part (hidden layers, then dir-out, then identity)
    dir_sq, dir_sq_b = [], []
    for l in range(7):
        if l < layers_dir:
            dir_sq.append(wT(dirl[1 + l][0]))
            dir_sq_b.append(vec(dirl[1 + l][1]))
        elif l == layers_dir:
            w = jnp.zeros((hd, hd), f32).at[:D, :].set(wT(dirl[-1][0]))
            b = jnp.zeros((hd,), f32).at[:D].set(vec(dirl[-1][1]))
            dir_sq.append(w)
            dir_sq_b.append(b)
        else:  # exact pass-through (ReLU idempotent on the already-nonnegative betas)
            dir_sq.append(jnp.eye(hd, dtype=f32))
            dir_sq_b.append(jnp.zeros((hd,), f32))

    w_sq = jnp.zeros((7, hph, hph), f32)
    b_blk = jnp.zeros((hph, 8), f32)
    b_blk = b_blk.at[:hp, 0].set(vec(pos0[0][1]))
    b_blk = b_blk.at[hp:, 0].set(vec(dirl[0][1]))
    for l in range(7):
        w_sq = w_sq.at[l, :hp, :hp].set(pos_sq[l])
        w_sq = w_sq.at[l, hp:, hp:].set(dir_sq[l])
        b_blk = b_blk.at[:hp, l + 1].set(pos_sq_b[l])
        b_blk = b_blk.at[hp:, l + 1].set(dir_sq_b[l])

    w_pos_out = wT(pos1[4][0])                               # (3D+1, hp)
    b_pos_out = vec(pos1[4][1]).reshape(-1, 1)               # (3D+1, 1)

    return [w_in.astype(bf16), b_blk, w_sq.astype(bf16),
            w_pos_out.astype(bf16), b_pos_out]


# ----------------------------------------------------------------------------- wrapper
def config_fast_nerf_forward(pos_enc, dir_enc, layer_params, *, D, layers_dir, tm=2048):
    H, W, N, in0 = pos_enc.shape
    dir_in = dir_enc.shape[-1]
    hp = int(layer_params[0][0].shape[1])                    # hidden_units_pos
    hd = int(layer_params[9][0].shape[1])                    # hidden_units_dir
    M = H * W * N
    din = in0 + dir_in
    assert tm % 128 == 0, "tm must be a multiple of 128 for lane-dense tiles"

    def rup(x, m):
        return ((x + m - 1) // m) * m

    # Tile size: as large as possible (amortize per-step overhead) but keep >= 2
    # grid steps when M allows it so both v7x TensorCores get work.
    tm_eff = min(tm, rup(M, 128))
    if M > 128 and pl.cdiv(M, tm_eff) < 2:
        tm_eff = rup(pl.cdiv(M, 2), 128)
    grid_m = pl.cdiv(M, tm_eff)
    M_pad = grid_m * tm_eff

    # Single channels-first bf16 input slab (one transpose; bf16 halves the traffic).
    # TODO(synk): have the encoder emit this layout directly to drop the transpose pass.
    inp = jnp.concatenate(
        [pos_enc.reshape(M, in0), dir_enc.reshape(M, dir_in)], axis=-1
    ).astype(jnp.bfloat16).T                                  # (din, M)
    if M_pad != M:
        inp = jnp.pad(inp, ((0, 0), (0, M_pad - M)))

    packed = pack_params(layer_params, in0=in0, dir_in=dir_in,
                         hp=hp, hd=hd, D=D, layers_dir=layers_dir)

    def row_map(i):
        return (0, i)

    def const_map(rank):
        return lambda i: (0,) * rank

    in_specs = [pl.BlockSpec((din, tm_eff), row_map)]
    for a in packed:
        in_specs.append(pl.BlockSpec(a.shape, const_map(a.ndim)))

    # Advisory cost estimate so XLA schedules surrounding ops around the call.
    flops = 0
    param_bytes = 0
    for (w, b) in layer_params:
        flops += 2 * M * int(w.shape[0]) * int(w.shape[1]) + M * int(b.shape[0])
        param_bytes += 2 * int(w.size) + 4 * int(b.size)
    flops += 2 * M * 3 * D + 4 * M
    cost = pl.CostEstimate(
        flops=int(flops),
        transcendentals=int(3 * M),
        bytes_accessed=int(2 * M * din + 4 * M * 4 + param_bytes),
    )

    out = pl.pallas_call(
        functools.partial(fastnerf_kernel, D, hp, hd),
        out_shape=jax.ShapeDtypeStruct((4, M_pad), jnp.float32),
        grid=(grid_m,),
        in_specs=in_specs,
        out_specs=pl.BlockSpec((4, tm_eff), row_map),
        compiler_params=pltpu.CompilerParams(
            dimension_semantics=("parallel",),
            vmem_limit_bytes=32 * 1024 * 1024),
        cost_estimate=cost,
    )(inp, *packed)

    return out[:, :M].T.reshape(H, W, N, 4)


# ----------------------------------------------------------------------------- reference
def reference_forward(pos_enc, dir_enc, params, *, D, layers_dir):
    it = iter(params)

    def lin(x, wb, relu=True):
        w, b = wb
        y = x @ w + b
        return jnp.maximum(y, 0.0) if relu else y

    x = pos_enc
    for _ in range(4):
        x = lin(x, next(it))
    x = jnp.concatenate([pos_enc, x], axis=-1)
    for _ in range(4):
        x = lin(x, next(it))
    x = lin(x, next(it), relu=False)

    h = dir_enc
    for _ in range(1 + layers_dir):
        h = lin(h, next(it))
    betas = lin(h, next(it))

    uvw = x[..., :-1]
    density = x[..., -1:]
    sh = uvw.shape
    uvw = uvw.reshape(sh[0], sh[1], sh[2], 3, D)
    betas = betas.reshape(sh[0], sh[1], sh[2], 1, D)
    rgb = jax.nn.sigmoid((uvw * betas).sum(-1))
    return jnp.concatenate([rgb, jnp.maximum(density, 0.0)], axis=-1)


# ----------------------------------------------------------------------------- main
if __name__ == "__main__":
    # Config consistent with the module:
    #   pos_enc_levels=2, dir_enc_levels=2, conf_enc_levels=2, configDegOfFreedom=1,
    #   includeOrig* = False -> pos_in=12, dir_in=12, conf_in=4
    #   hidden_units_pos=32, hidden_units_dir=32, layers_dir=1, D=8
    pos_in, dir_in, conf_in = 12, 12, 4
    hp, hd, layers_dir, D = 32, 32, 1, 8
    H, W, N = 8, 8, 16          # M = 1024 rows -> 2 grid steps (tm capped to 512)

    key = jax.random.PRNGKey(0)
    k_pos, k_dir, k_par = jax.random.split(key, 3)
    pos_enc = jax.random.normal(k_pos, (H, W, N, pos_in + conf_in), jnp.float32)
    dir_enc = jax.random.normal(k_dir, (H, W, N, dir_in), jnp.float32)
    params = init_params(k_par, pos_in, conf_in, dir_in, hp, hd, layers_dir, D)

    out = config_fast_nerf_forward(pos_enc, dir_enc, params, D=D,
                                   layers_dir=layers_dir, tm=2048)
    out = jax.block_until_ready(out)

    ref = reference_forward(pos_enc, dir_enc, params, D=D, layers_dir=layers_dir)
    assert out.shape == (H, W, N, 4)
    assert bool(jnp.all(jnp.isfinite(out)))
    max_err = float(jnp.max(jnp.abs(out - ref)))
    # bf16 weights/inputs/activations (f32 accumulation) -> loosened tolerance vs f32 ref.
    assert jnp.allclose(out, ref, rtol=4e-2, atol=4e-2), f"max abs err {max_err}"

    print("KERNEL_OK")
</pallas_src>

<mosaic_0001>
module attributes {stable_mosaic.version = 11 : i64} {
  func.func @fastnerf_kernel(%arg0: i32, %arg1: memref<28x512xbf16, #tpu.memory_space<vmem>>, %arg2: memref<128x28xbf16, #tpu.memory_space<vmem>>, %arg3: memref<64x8xf32, #tpu.memory_space<vmem>>, %arg4: memref<7x64x64xbf16, #tpu.memory_space<vmem>>, %arg5: memref<25x32xbf16, #tpu.memory_space<vmem>>, %arg6: memref<25x1xf32, #tpu.memory_space<vmem>>, %arg7: memref<4x512xf32, #tpu.memory_space<vmem>>) attributes {dimension_semantics = [#tpu.dimension_semantics<parallel>], iteration_bounds = array<i64: 2>, scalar_prefetch = 0 : i64, scratch_operands = 0 : i64, tpu.core_type = #tpu.core_type<tc>, window_params = [{transform_indices = @transform_0, window_bounds = array<i64: 28, 512>}, {pipeline_mode = #tpu.pipeline_mode<synchronous>, transform_indices = @transform_1, window_bounds = array<i64: 128, 28>}, {pipeline_mode = #tpu.pipeline_mode<synchronous>, transform_indices = @transform_2, window_bounds = array<i64: 64, 8>}, {pipeline_mode = #tpu.pipeline_mode<synchronous>, transform_indices = @transform_3, window_bounds = array<i64: 7, 64, 64>}, {pipeline_mode = #tpu.pipeline_mode<synchronous>, transform_indices = @transform_4, window_bounds = array<i64: 25, 32>}, {pipeline_mode = #tpu.pipeline_mode<synchronous>, transform_indices = @transform_5, window_bounds = array<i64: 25, 1>}, {transform_indices = @transform_6, window_bounds = array<i64: 4, 512>}]} {
    %c0 = arith.constant 0 : index
    %c0_0 = arith.constant 0 : index
    %0 = vector.load %arg1[%c0, %c0_0] : memref<28x512xbf16, #tpu.memory_space<vmem>>, vector<28x512xbf16>
    %c0_1 = arith.constant 0 : index
    %c0_2 = arith.constant 0 : index
    %1 = vector.load %arg2[%c0_1, %c0_2] : memref<128x28xbf16, #tpu.memory_space<vmem>>, vector<128x28xbf16>
    %cst = arith.constant dense<0.000000e+00> : vector<128x512xf32>
    %2 = tpu.matmul %1, %0, %cst {dimension_numbers = #tpu.dot_dimension_numbers<[1], [0], [0], [1], [0, 0, 1, 1], [], []>} : vector<128x28xbf16>, vector<28x512xbf16>, vector<128x512xf32> -> vector<128x512xf32>
    %3 = vector.extract_strided_slice %2 {offsets = [0, 0], sizes = [64, 512], strides = [1, 1]} : vector<128x512xf32> to vector<64x512xf32>
    %c0_3 = arith.constant 0 : index
    %c0_4 = arith.constant 0 : index
    %4 = vector.load %arg3[%c0_3, %c0_4] : memref<64x8xf32, #tpu.memory_space<vmem>>, vector<64x1xf32>
    %5 = vector.broadcast %4 : vector<64x1xf32> to vector<64x512xf32>
    %6 = arith.addf %3, %5 : vector<64x512xf32>
    %cst_5 = arith.constant 0.000000e+00 : f32
    %7 = vector.broadcast %cst_5 : f32 to vector<64x512xf32>
    %8 = arith.maximumf %6, %7 : vector<64x512xf32>
    %9 = arith.truncf %8 : vector<64x512xf32> to vector<64x512xbf16>
    %10 = vector.extract_strided_slice %2 {offsets = [64, 0], sizes = [64, 512], strides = [1, 1]} : vector<128x512xf32> to vector<64x512xf32>
    %c0_6 = arith.constant 0 : index
    %c0_7 = arith.constant 0 : index
    %c0_8 = arith.constant 0 : index
    %11 = vector.load %arg4[%c0_6, %c0_7, %c0_8] : memref<7x64x64xbf16, #tpu.memory_space<vmem>>, vector<1x64x64xbf16>
    %12 = vector.shape_cast %11 : vector<1x64x64xbf16> to vector<64x64xbf16>
    %cst_9 = arith.constant dense<0.000000e+00> : vector<64x512xf32>
    %13 = tpu.matmul %12, %9, %cst_9 {dimension_numbers = #tpu.dot_dimension_numbers<[1], [0], [0], [1], [0, 0, 1, 1], [], []>} : vector<64x64xbf16>, vector<64x512xbf16>, vector<64x512xf32> -> vector<64x512xf32>
    %c0_10 = arith.constant 0 : index
    %c1 = arith.constant 1 : index
    %14 = vector.load %arg3[%c0_10, %c1] : memref<64x8xf32, #tpu.memory_space<vmem>>, vector<64x1xf32>
    %15 = vector.broadcast %14 : vector<64x1xf32> to vector<64x512xf32>
    %16 = arith.addf %13, %15 : vector<64x512xf32>
    %cst_11 = arith.constant 0.000000e+00 : f32
    %17 = vector.broadcast %cst_11 : f32 to vector<64x512xf32>
    %18 = arith.maximumf %16, %17 : vector<64x512xf32>
    %19 = arith.truncf %18 : vector<64x512xf32> to vector<64x512xbf16>
    %c1_12 = arith.constant 1 : index
    %c0_13 = arith.constant 0 : index
    %c0_14 = arith.constant 0 : index
    %20 = vector.load %arg4[%c1_12, %c0_13, %c0_14] : memref<7x64x64xbf16, #tpu.memory_space<vmem>>, vector<1x64x64xbf16>
    %21 = vector.shape_cast %20 : vector<1x64x64xbf16> to vector<64x64xbf16>
    %cst_15 = arith.constant dense<0.000000e+00> : vector<64x512xf32>
    %22 = tpu.matmul %21, %19, %cst_15 {dimension_numbers = #tpu.dot_dimension_numbers<[1], [0], [0], [1], [0, 0, 1, 1], [], []>} : vector<64x64xbf16>, vector<64x512xbf16>, vector<64x512xf32> -> vector<64x512xf32>
    %c0_16 = arith.constant 0 : index
    %c2 = arith.constant 2 : index
    %23 = vector.load %arg3[%c0_16, %c2] : memref<64x8xf32, #tpu.memory_space<vmem>>, vector<64x1xf32>
    %24 = vector.broadcast %23 : vector<64x1xf32> to vector<64x512xf32>
    %25 = arith.addf %22, %24 : vector<64x512xf32>
    %cst_17 = arith.constant 0.000000e+00 : f32
    %26 = vector.broadcast %cst_17 : f32 to vector<64x512xf32>
    %27 = arith.maximumf %25, %26 : vector<64x512xf32>
    %28 = arith.truncf %27 : vector<64x512xf32> to vector<64x512xbf16>
    %c2_18 = arith.constant 2 : index
    %c0_19 = arith.constant 0 : index
    %c0_20 = arith.constant 0 : index
    %29 = vector.load %arg4[%c2_18, %c0_19, %c0_20] : memref<7x64x64xbf16, #tpu.memory_space<vmem>>, vector<1x64x64xbf16>
    %30 = vector.shape_cast %29 : vector<1x64x64xbf16> to vector<64x64xbf16>
    %cst_21 = arith.constant dense<0.000000e+00> : vector<64x512xf32>
    %31 = tpu.matmul %30, %28, %cst_21 {dimension_numbers = #tpu.dot_dimension_numbers<[1], [0], [0], [1], [0, 0, 1, 1], [], []>} : vector<64x64xbf16>, vector<64x512xbf16>, vector<64x512xf32> -> vector<64x512xf32>
    %c0_22 = arith.constant 0 : index
    %c3 = arith.constant 3 : index
    %32 = vector.load %arg3[%c0_22, %c3] : memref<64x8xf32, #tpu.memory_space<vmem>>, vector<64x1xf32>
    %33 = vector.broadcast %32 : vector<64x1xf32> to vector<64x512xf32>
    %34 = arith.addf %31, %33 : vector<64x512xf32>
    %cst_23 = arith.constant 0.000000e+00 : f32
    %35 = vector.broadcast %cst_23 : f32 to vector<64x512xf32>
    %36 = arith.maximumf %34, %35 : vector<64x512xf32>
    %37 = arith.truncf %36 : vector<64x512xf32> to vector<64x512xbf16>
    %c3_24 = arith.constant 3 : index
    %c0_25 = arith.constant 0 : index
    %c0_26 = arith.constant 0 : index
    %38 = vector.load %arg4[%c3_24, %c0_25, %c0_26] : memref<7x64x64xbf16, #tpu.memory_space<vmem>>, vector<1x64x64xbf16>
    %39 = vector.shape_cast %38 : vector<1x64x64xbf16> to vector<64x64xbf16>
    %cst_27 = arith.constant dense<0.000000e+00> : vector<64x512xf32>
    %40 = tpu.matmul %39, %37, %cst_27 {dimension_numbers = #tpu.dot_dimension_numbers<[1], [0], [0], [1], [0, 0, 1, 1], [], []>} : vector<64x64xbf16>, vector<64x512xbf16>, vector<64x512xf32> -> vector<64x512xf32>
    %c0_28 = arith.constant 0 : index
    %c4 = arith.constant 4 : index
    %41 = vector.load %arg3[%c0_28, %c4] : memref<64x8xf32, #tpu.memory_space<vmem>>, vector<64x1xf32>
    %42 = vector.broadcast %41 : vector<64x1xf32> to vector<64x512xf32>
    %43 = arith.addf %40, %42 : vector<64x512xf32>
    %44 = arith.addf %43, %10 : vector<64x512xf32>
    %cst_29 = arith.constant 0.000000e+00 : f32
    %45 = vector.broadcast %cst_29 : f32 to vector<64x512xf32>
    %46 = arith.maximumf %44, %45 : vector<64x512xf32>
    %47 = arith.truncf %46 : vector<64x512xf32> to vector<64x512xbf16>
    %c4_30 = arith.constant 4 : index
    %c0_31 = arith.constant 0 : index
    %c0_32 = arith.constant 0 : index
    %48 = vector.load %arg4[%c4_30, %c0_31, %c0_32] : memref<7x64x64xbf16, #tpu.memory_space<vmem>>, vector<1x64x64xbf16>
    %49 = vector.shape_cast %48 : vector<1x64x64xbf16> to vector<64x64xbf16>
    %cst_33 = arith.constant dense<0.000000e+00> : vector<64x512xf32>
    %50 = tpu.matmul %49, %47, %cst_33 {dimension_numbers = #tpu.dot_dimension_numbers<[1], [0], [0], [1], [0, 0, 1, 1], [], []>} : vector<64x64xbf16>, vector<64x512xbf16>, vector<64x512xf32> -> vector<64x512xf32>
    %c0_34 = arith.constant 0 : index
    %c5 = arith.constant 5 : index
    %51 = vector.load %arg3[%c0_34, %c5] : memref<64x8xf32, #tpu.memory_space<vmem>>, vector<64x1xf32>
    %52 = vector.broadcast %51 : vector<64x1xf32> to vector<64x512xf32>
    %53 = arith.addf %50, %52 : vector<64x512xf32>
    %cst_35 = arith.constant 0.000000e+00 : f32
    %54 = vector.broadcast %cst_35 : f32 to vector<64x512xf32>
    %55 = arith.maximumf %53, %54 : vector<64x512xf32>
    %56 = arith.truncf %55 : vector<64x512xf32> to vector<64x512xbf16>
    %c5_36 = arith.constant 5 : index
    %c0_37 = arith.constant 0 : index
    %c0_38 = arith.constant 0 : index
    %57 = vector.load %arg4[%c5_36, %c0_37, %c0_38] : memref<7x64x64xbf16, #tpu.memory_space<vmem>>, vector<1x64x64xbf16>
    %58 = vector.shape_cast %57 : vector<1x64x64xbf16> to vector<64x64xbf16>
    %cst_39 = arith.constant dense<0.000000e+00> : vector<64x512xf32>
    %59 = tpu.matmul %58, %56, %cst_39 {dimension_numbers = #tpu.dot_dimension_numbers<[1], [0], [0], [1], [0, 0, 1, 1], [], []>} : vector<64x64xbf16>, vector<64x512xbf16>, vector<64x512xf32> -> vector<64x512xf32>
    %c0_40 = arith.constant 0 : index
    %c6 = arith.constant 6 : index
    %60 = vector.load %arg3[%c0_40, %c6] : memref<64x8xf32, #tpu.memory_space<vmem>>, vector<64x1xf32>
    %61 = vector.broadcast %60 : vector<64x1xf32> to vector<64x512xf32>
    %62 = arith.addf %59, %61 : vector<64x512xf32>
    %cst_41 = arith.constant 0.000000e+00 : f32
    %63 = vector.broadcast %cst_41 : f32 to vector<64x512xf32>
    %64 = arith.maximumf %62, %63 : vector<64x512xf32>
    %65 = arith.truncf %64 : vector<64x512xf32> to vector<64x512xbf16>
    %c6_42 = arith.constant 6 : index
    %c0_43 = arith.constant 0 : index
    %c0_44 = arith.constant 0 : index
    %66 = vector.load %arg4[%c6_42, %c0_43, %c0_44] : memref<7x64x64xbf16, #tpu.memory_space<vmem>>, vector<1x64x64xbf16>
    %67 = vector.shape_cast %66 : vector<1x64x64xbf16> to vector<64x64xbf16>
    %cst_45 = arith.constant dense<0.000000e+00> : vector<64x512xf32>
    %68 = tpu.matmul %67, %65, %cst_45 {dimension_numbers = #tpu.dot_dimension_numbers<[1], [0], [0], [1], [0, 0, 1, 1], [], []>} : vector<64x64xbf16>, vector<64x512xbf16>, vector<64x512xf32> -> vector<64x512xf32>
    %c0_46 = arith.constant 0 : index
    %c7 = arith.constant 7 : index
    %69 = vector.load %arg3[%c0_46, %c7] : memref<64x8xf32, #tpu.memory_space<vmem>>, vector<64x1xf32>
    %70 = vector.broadcast %69 : vector<64x1xf32> to vector<64x512xf32>
    %71 = arith.addf %68, %70 : vector<64x512xf32>
    %cst_47 = arith.constant 0.000000e+00 : f32
    %72 = vector.broadcast %cst_47 : f32 to vector<64x512xf32>
    %73 = arith.maximumf %71, %72 : vector<64x512xf32>
    %74 = arith.truncf %73 : vector<64x512xf32> to vector<64x512xbf16>
    %75 = vector.extract_strided_slice %74 {offsets = [32, 0], sizes = [8, 512], strides = [1, 1]} : vector<64x512xbf16> to vector<8x512xbf16>
    %76 = arith.extf %75 : vector<8x512xbf16> to vector<8x512xf32>
    %c0_48 = arith.constant 0 : index
    %c0_49 = arith.constant 0 : index
    %77 = vector.load %arg5[%c0_48, %c0_49] : memref<25x32xbf16, #tpu.memory_space<vmem>>, vector<25x32xbf16>
    %78 = vector.extract_strided_slice %74 {offsets = [0, 0], sizes = [32, 512], strides = [1, 1]} : vector<64x512xbf16> to vector<32x512xbf16>
    %cst_50 = arith.constant dense<0.000000e+00> : vector<25x512xf32>
    %79 = tpu.matmul %77, %78, %cst_50 {dimension_numbers = #tpu.dot_dimension_numbers<[1], [0], [0], [1], [0, 0, 1, 1], [], []>} : vector<25x32xbf16>, vector<32x512xbf16>, vector<25x512xf32> -> vector<25x512xf32>
    %c0_51 = arith.constant 0 : index
    %c0_52 = arith.constant 0 : index
    %80 = vector.load %arg6[%c0_51, %c0_52] : memref<25x1xf32, #tpu.memory_space<vmem>>, vector<25x1xf32>
    %81 = vector.broadcast %80 : vector<25x1xf32> to vector<25x512xf32>
    %82 = arith.addf %79, %81 : vector<25x512xf32>
    %83 = vector.extract_strided_slice %82 {offsets = [0, 0], sizes = [8, 512], strides = [1, 1]} : vector<25x512xf32> to vector<8x512xf32>
    %84 = arith.mulf %83, %76 : vector<8x512xf32>
    %cst_53 = arith.constant dense<0.000000e+00> : vector<512xf32>
    %85 = vector.multi_reduction <add>, %84, %cst_53 [0] : vector<8x512xf32> to vector<512xf32>
    %86 = vector.shape_cast %85 : vector<512xf32> to vector<1x512xf32>
    %87 = arith.negf %86 : vector<1x512xf32>
    %88 = math.exp %87 : vector<1x512xf32>
    %cst_54 = arith.constant 1.000000e+00 : f32
    %89 = vector.broadcast %cst_54 : f32 to vector<1x512xf32>
    %90 = arith.addf %89, %88 : vector<1x512xf32>
    %91 = arith.divf %89, %90 : vector<1x512xf32>
    %c0_55 = arith.constant 0 : index
    %c0_56 = arith.constant 0 : index
    %92 = vector.load %arg7[%c0_55, %c0_56] : memref<4x512xf32, #tpu.memory_space<vmem>>, vector<1x512xf32>
    tpu.vector_store %arg7[%c0_55, %c0_56], %91 {strides = array<i32>} : memref<4x512xf32, #tpu.memory_space<vmem>>, vector<1x512xf32>,
    %93 = vector.extract_strided_slice %82 {offsets = [8, 0], sizes = [8, 512], strides = [1, 1]} : vector<25x512xf32> to vector<8x512xf32>
    %94 = arith.mulf %93, %76 : vector<8x512xf32>
    %cst_57 = arith.constant dense<0.000000e+00> : vector<512xf32>
    %95 = vector.multi_reduction <add>, %94, %cst_57 [0] : vector<8x512xf32> to vector<512xf32>
    %96 = vector.shape_cast %95 : vector<512xf32> to vector<1x512xf32>
    %97 = arith.negf %96 : vector<1x512xf32>
    %98 = math.exp %97 : vector<1x512xf32>
    %cst_58 = arith.constant 1.000000e+00 : f32
    %99 = vector.broadcast %cst_58 : f32 to vector<1x512xf32>
    %100 = arith.addf %99, %98 : vector<1x512xf32>
    %101 = arith.divf %99, %100 : vector<1x512xf32>
    %c1_59 = arith.constant 1 : index
    %c0_60 = arith.constant 0 : index
    %102 = vector.load %arg7[%c1_59, %c0_60] : memref<4x512xf32, #tpu.memory_space<vmem>>, vector<1x512xf32>
    tpu.vector_store %arg7[%c1_59, %c0_60], %101 {strides = array<i32>} : memref<4x512xf32, #tpu.memory_space<vmem>>, vector<1x512xf32>,
    %103 = vector.extract_strided_slice %82 {offsets = [16, 0], sizes = [8, 512], strides = [1, 1]} : vector<25x512xf32> to vector<8x512xf32>
    %104 = arith.mulf %103, %76 : vector<8x512xf32>
    %cst_61 = arith.constant dense<0.000000e+00> : vector<512xf32>
    %105 = vector.multi_reduction <add>, %104, %cst_61 [0] : vector<8x512xf32> to vector<512xf32>
    %106 = vector.shape_cast %105 : vector<512xf32> to vector<1x512xf32>
    %107 = arith.negf %106 : vector<1x512xf32>
    %108 = math.exp %107 : vector<1x512xf32>
    %cst_62 = arith.constant 1.000000e+00 : f32
    %109 = vector.broadcast %cst_62 : f32 to vector<1x512xf32>
    %110 = arith.addf %109, %108 : vector<1x512xf32>
    %111 = arith.divf %109, %110 : vector<1x512xf32>
    %c2_63 = arith.constant 2 : index
    %c0_64 = arith.constant 0 : index
    %112 = vector.load %arg7[%c2_63, %c0_64] : memref<4x512xf32, #tpu.memory_space<vmem>>, vector<1x512xf32>
    tpu.vector_store %arg7[%c2_63, %c0_64], %111 {strides = array<i32>} : memref<4x512xf32, #tpu.memory_space<vmem>>, vector<1x512xf32>,
    %113 = vector.extract_strided_slice %82 {offsets = [24, 0], sizes = [1, 512], strides = [1, 1]} : vector<25x512xf32> to vector<1x512xf32>
    %cst_65 = arith.constant 0.000000e+00 : f32
    %114 = vector.broadcast %cst_65 : f32 to vector<1x512xf32>
    %115 = arith.maximumf %113, %114 : vector<1x512xf32>
    %c3_66 = arith.constant 3 : index
    %c0_67 = arith.constant 0 : index
    %116 = vector.load %arg7[%c3_66, %c0_67] : memref<4x512xf32, #tpu.memory_space<vmem>>, vector<1x512xf32>
    tpu.vector_store %arg7[%c3_66, %c0_67], %115 {strides = array<i32>} : memref<4x512xf32, #tpu.memory_space<vmem>>, vector<1x512xf32>,
    return
  }
  func.func @transform_0(%arg0: i32) -> (i32, i32) {
    %c0_i32 = arith.constant 0 : i32
    %c0_i32_0 = arith.constant 0 : i32
    return %c0_i32, %arg0 : i32, i32
  }
  func.func @transform_1(%arg0: i32) -> (i32, i32) {
    %c0_i32 = arith.constant 0 : i32
    %c0_i32_0 = arith.constant 0 : i32
    %c0_i32_1 = arith.constant 0 : i32
    return %c0_i32, %c0_i32_0 : i32, i32
  }
  func.func @transform_2(%arg0: i32) -> (i32, i32) {
    %c0_i32 = arith.constant 0 : i32
    %c0_i32_0 = arith.constant 0 : i32
    %c0_i32_1 = arith.constant 0 : i32
    return %c0_i32, %c0_i32_0 : i32, i32
  }
  func.func @transform_3(%arg0: i32) -> (i32, i32, i32) {
    %c0_i32 = arith.constant 0 : i32
    %c0_i32_0 = arith.constant 0 : i32
    %c0_i32_1 = arith.constant 0 : i32
    %c0_i32_2 = arith.constant 0 : i32
    return %c0_i32, %c0_i32_0, %c0_i32_1 : i32, i32, i32
  }
  func.func @transform_4(%arg0: i32) -> (i32, i32) {
    %c0_i32 = arith.constant 0 : i32
    %c0_i32_0 = arith.constant 0 : i32
    %c0_i32_1 = arith.constant 0 : i32
    return %c0_i32, %c0_i32_0 : i32, i32
  }
  func.func @transform_5(%arg0: i32) -> (i32, i32) {
    %c0_i32 = arith.constant 0 : i32
    %c0_i32_0 = arith.constant 0 : i32
    %c0_i32_1 = arith.constant 0 : i32
    return %c0_i32, %c0_i32_0 : i32, i32
  }
  func.func @transform_6(%arg0: i32) -> (i32, i32) {
    %c0_i32 = arith.constant 0 : i32
    %c0_i32_0 = arith.constant 0 : i32
    return %c0_i32, %arg0 : i32, i32
  }
}

</mosaic_0001>

<bundles_post_ra>
// kernel: tpu_custom_call.1
= control target key start
LH: loop header
LB: loop body
LE: loop exit
PB: predicated region body
PF: predicated region fallthrough
CT: control target
= control target key end

     0   :  { %11 = vsyncpa [#allocation4], 0  ;;  %s5311_s0 = inlined_call_operand.vmem [shape: bf16[28,1024], index: 0, kind: input, shape index: {}]   ;;  %s5312_s1 = inlined_call_operand.vmem [shape: bf16[128,28], index: 1, kind: input, shape index: {}]   ;;  %s5313_s2 = inlined_call_operand.vmem [shape: f32[64,8], index: 2, kind: input, shape index: {}]   ;;  %s5314_s3 = inlined_call_operand.hbm [shape: bf16[7,64,64], index: 3, kind: input, shape index: {}]   ;;  %s5315_s4 = inlined_call_operand.vmem [shape: bf16[25,32], index: 4, kind: input, shape index: {}]   ;;  %s5316_s5 = inlined_call_operand.vmem [shape: f32[25,1], index: 5, kind: input, shape index: {}]   ;;  %s5317_s6 = inlined_call_operand.hbm [shape: f32[4,1024], index: 6, kind: output, shape index: {}]  }
   0x1   :  { %12 = vsyncpa [#allocation5], 0 }
   0x2   :  { %14 = vsyncpa [#allocation5 + $0x1], 0  ;;  %s3767_s21 = smov 0   ;;  %s3769_s22 = smov 0  }
   0x3   :  { %s3771_s23 = smov 0   ;;  %s3773_s24 = smov 0  }
   0x4 LB: > { %s3788_s25 = sadd.s32 4294967295, %s3719_s24   ;;  %s3057_s26 = sadd.s32 4294967294, %s3719_s24   ;;  %s3719_s24 = sphi %s3773_s24, %s5404_s24   ;;  %s3715_s23 = sphi %s3771_s23, %s5403_s23   ;;  %s3711_s22 = sphi %s3769_s22, %s5402_s22   ;;  %s3707_s21 = sphi %s3767_s21, %s5401_s21  }
   0x5   : > { %s3792_s27 = sadd.s32 1, %s3719_s24   ;;  %s27_s28 = sadd.s32 1, %s3715_s23 }
   0x6   : > { %s24_s29 = ssub.s32 %s3719_s24, %s3792_s27  ;;  %p34_p0 = scmp.ne.s32.totalorder %s3715_s23, %s3711_s22 }
   0x7   : > { %p25_p1 = scmp.eq.s32.totalorder %s24_s29, 0  ;;  %p35_p2 = scmp.eq.s32.totalorder %s3719_s24, 0 }
   0x8   : > { %p169_p3 = scmp.eq.s32.totalorder %s3788_s25, 1  ;;  %p174_p4 = scmp.ne.s32.totalorder %s3711_s22, %s3707_s21 }
   0x9   : > { %s3804_s30 = scalar_select %p25_p1, %s3715_s23, %s27_s28  }
   0xa   : > { %p3806_p5 = por %p35_p2, %p34_p0  ;;  %p3810_p6 = por %p169_p3, %p34_p0 }
   0xb   : > { %p175_p7 = scmp.eq.s32.totalorder %s3057_s26, 1  ;;  %p3058_p8 = scmp.ge.s32.totalorder %s3719_s24, 1 }
   0xc   : > { %p182_p9 = scmp.lt.s32.totalorder %s3719_s24, 3  ;;  %p3486_p11 = scmp.eq.s32.totalorder %s3788_s25, 0 }
   0xd   : > { %p3816_p10 = por %p175_p7, %p174_p4  ;;  %s199_s13 = sshll.u32 %s5314_s3, 4  ;;  %s200_s13 = int_to_ptr.hbm [resolvable:$true] %s199_s13 }
   0xe   : > { %p3821_p12 = pnand %p3058_p8, %p182_p9  ;;  %s3721_s14 = smov [#allocation3]  }
   0xf   : > { %s201_s15 = sshll.u32 %s3721_s14, 4  ;;  %s3722_s16 = smov 64   ;;  %s202_s15 = int_to_ptr.vmem [resolvable:$true] %s201_s15 }
  0x10   : > { %p3478_p13 = pneg %p3821_p12  ;;  %s3723_s17 = smov 4  }
  0x11   : > { %p3060_p1 = scmp.ge.s32.totalorder %s3719_s24, 2 }
  0x12   : > { %p3479_p0 = pnand %p3486_p11, %p3478_p13 }
  0x13   : > { %217 = sbr.rel (%p3060_p1) target bundleno = 36 (0x24), region = 36 }
  0x14   : > { %3481 = dma.hbm_to_vmem [thread:$0]  (!%p3479_p0), %s200_s13, 3584, %s202_s15, [#allocation4], %s3722_s16, %s3722_s16, %s3723_s17  }
  0x18   : > { %220 = sbr.rel (!%p3806_p5) target bundleno = 36 (0x24), region = 40  ;;  %s222_s18 = sand.u32 (%p3806_p5), 1, %s3715_s23  }
  0x19   : > { %s3424_s19 = sshll.u32 (%p3806_p5), %s3719_s24, 4  ;;  %s3061_s20 = sshll.u32 (%p3806_p5), %s222_s18, 6 }
  0x1a   : > { %s227_s29 = scalar_lea.vmem (%p3806_p5), %s5311_s0, %s3424_s19  ;;  %s224_s11 = scalar_lea.vmem (%p3806_p5), [#allocation2], %s3061_s20 }
  0x1b   : > { %v240_v0 = vld [vmem:[%s227_s29] sm:$0xff] (%p3806_p5)  ;;  %v242_v1 = vld [vmem:[%s227_s29 + $0x8] sm:$0xff] (%p3806_p5) }
  0x1c   : > { %v244_v2 = vld [vmem:[%s227_s29 + $0x20] sm:$0xff] (%p3806_p5)  ;;  %241 = vst [vmem:[%s224_s11] sm:$0xff] (%p3806_p5), %v240_v0  ;;  %v246_v3 = vld [vmem:[%s227_s29 + $0x28] sm:$0xff] (%p3806_p5) }
  0x1d   : > { %243 = vst [vmem:[%s224_s11 + $0x8] sm:$0xff] %v242_v1  ;;  %v248_v4 = vld [vmem:[%s227_s29 + $0x40] sm:$0xff]  ;;  %v250_v5 = vld [vmem:[%s227_s29 + $0x48] sm:$0xff] }
  0x1e   : > { %245 = vst [vmem:[%s224_s11 + $0x10] sm:$0xff] %v244_v2  ;;  %v252_v6 = vld [vmem:[%s227_s29 + $0x60] sm:$0xff]  ;;  %v254_v7 = vld [vmem:[%s227_s29 + $0x68] sm:$0xff] }
  0x1f   : > { %247 = vst [vmem:[%s224_s11 + $0x18] sm:$0xff] %v246_v3 }
  0x20   : > { %249 = vst [vmem:[%s224_s11 + $0x20] sm:$0xff] %v248_v4 }
  0x21   : > { %251 = vst [vmem:[%s224_s11 + $0x28] sm:$0xff] %v250_v5 }
  0x22   : > { %253 = vst [vmem:[%s224_s11 + $0x30] sm:$0xff] %v252_v6 }
  0x23   : > { %255 = vst [vmem:[%s224_s11 + $0x38] sm:$0xff] %v254_v7 }
  0x24 PF: > { %264 = sbr.rel (%p3821_p12) target bundleno = 1899 (0x76b), region = 63 }
  0x29   : > { %s3845_s7 = sand.u32 1, %s3711_s22  }
  0x2a   : > { %s3065_s12 = sshll.u32 %s3845_s7, 6 }
  0x2b   : > { %s3848_s13 = scalar_lea.vmem [#allocation2], %s3065_s12 }
  0x2c   : > { %3698 = dma.done.wait (%p3486_p11), [#allocation4], 3584  }
  0x2d   : > { %3700 = vsyncadd (%p3486_p11), [#allocation4], 4294963712  ;;  %v5318_v8 = vmov 0   ;;  %vm429_vm0 = vcmask 1045504   ;;  %v3118_v9 = vld [vmem:[%s3848_s13 + $0x20] sm:$0xf] }
  0x2e   : > { %3532 = vset.pattern.permute.xlu0 %v5318_v8  ;;  %3533 = vset.pattern.permute.xlu1 %v5318_v8  ;;  %v3431_v10 = vld [vmem:[%s3848_s13 + $0x2c] sm:$0x30]  ;;  %v3429_v11 = vld [vmem:[%s3848_s13 + $0x24] sm:$0xf]  ;;  %v3120_v13 = vld [vmem:[%s3848_s13 + $0x30] sm:$0x30] }
  0x2f   : > { %3534 = vset.pattern.permute.xlu2 %v5318_v8  ;;  %v3119_v12 = vor.u32 %v3431_v10, %v3118_v9  ;;  %v3126_v14 = vld [vmem:[%s3848_s13 + $0x28] sm:$0xf]  ;;  %v3432_v15 = vld [vmem:[%s3848_s13 + $0x34] sm:$0x30]  ;;  %v3123_v16 = vor.u32 %v3429_v11, %v3120_v13  ;;  %v3430_v18 = vld [vmem:[%s3848_s13 + $0x2c] sm:$0xf] }
  0x30   : > { %v3127_v17 = vor.u32 %v3432_v15, %v3126_v14  ;;  %v3128_v19 = vld [vmem:[%s3848_s13 + $0x38] sm:$0x30]  ;;  %v3102_v20 = vld [vmem:[%s3848_s13] sm:$0xf]  ;;  %v3427_v23 = vld [vmem:[%s3848_s13 + $0xc] sm:$0xf0] }
  0x31   : > { %v431_v21 = vsel %vm429_vm0, %v3119_v12, 0  ;;  %v3131_v22 = vor.u32 %v3430_v18, %v3128_v19  ;;  %v3425_v24 = vld [vmem:[%s3848_s13 + $0x4] sm:$0xf]  ;;  %v434_v25 = vsel %vm429_vm0, %v3123_v16, 0  ;;  %v3103_v27 = vor.u32 %v3427_v23, %v3102_v20  ;;  %v3104_v28 = vld [vmem:[%s3848_s13 + $0x10] sm:$0xf0] }
  0x32   : > { %448 = vmatpush.bf16.msra.mxu0 %v431_v21  ;;  %v437_v26 = vsel %vm429_vm0, %v3127_v17, 0  ;;  %v3110_v29 = vld [vmem:[%s3848_s13 + $0x8] sm:$0xf]  ;;  %497 = vmatpush.bf16.msra.mxu1 %v434_v25  ;;  %v3107_v31 = vor.u32 %v3425_v24, %v3104_v28  ;;  %v3428_v32 = vld [vmem:[%s3848_s13 + $0x14] sm:$0xf0]  ;;  %v3879_v34 = vld [vmem:[%s5313_s2 + $0x30] sm:$0xff] }
  0x33   : > { %546 = vmatpush.bf16.msra.mxu2 %v437_v26  ;;  %v440_v30 = vsel %vm429_vm0, %v3131_v22, 0  ;;  %v3426_v33 = vld [vmem:[%s3848_s13 + $0xc] sm:$0xf]  ;;  %v3111_v35 = vor.u32 %v3428_v32, %v3110_v29  ;;  %v3112_v36 = vld [vmem:[%s3848_s13 + $0x18] sm:$0xf0]  ;;  %678 = vperm.xlu0 %3532, %v3879_v34   ;;  %v3886_v37 = vld [vmem:[%s5313_s2 + $0x20] sm:$0xff] }
  0x34   : > { %595 = vmatpush.bf16.msra.mxu3 %v440_v30  ;;  %v3115_v38 = vor.u32 %v3426_v33, %v3112_v36  ;;  %v3433_v39 = vld [vmem:[%s5312_s1] sm:$0xff]  ;;  %668 = vperm.xlu1 %3533, %v3886_v37   ;;  %vm404_vm1 = vcmask 228352   ;;  %v3896_v40 = vld [vmem:[%s5313_s2 + $0x38] sm:$0xff]  ;;  %v3903_v41 = vld [vmem:[%s5313_s2 + $0x28] sm:$0xff]  ;;  %vm826_vm2 = vcmask 523264   ;;  %vm2506_vm3 = vcmask 261120  }
  0x35   : > { %v3911_v42 = vld [vmem:[%s5313_s2] sm:$0xff]  ;;  %v3916_v43 = vld [vmem:[%s5313_s2 + $0x8] sm:$0xff]  ;;  %v3930_v45 = vld [vmem:[%s5313_s2 + $0x10] sm:$0xff]  ;;  %vm2700_vm12 = vcmask 1040384   ;;  %s3067_s26 = sshll.u32 %s3845_s7, 4  ;;  %vm2702_vm15 = vcmask 1042434  }
  0x36   : > { %449 = vmatpush.bf16.msra.mxu0 %v3103_v27  ;;  %498 = vmatpush.bf16.msra.mxu1 %v3107_v31  ;;  %v3434_v44 = vld [vmem:[%s5312_s1 + $0x8] sm:$0xff]  ;;  %v3936_v46 = vld [vmem:[%s5313_s2 + $0x18] sm:$0xff]  ;;  %v3435_v47 = vld [vmem:[%s5312_s1 + $0x10] sm:$0xff]  ;;  %vm2704_vm0 = vcmask 1041408   ;;  %s5131_s28 = scalar_lea.vmem [#allocation6], %s3067_s26  ;;  %s3471_s29 = sshll.u32 %s3788_s25, 4 }
  0x37   : > { %547 = vmatpush.bf16.msra.mxu2 %v3111_v35  ;;  %658 = vperm.xlu2 %3534, %v3930_v45   ;;  %v3436_v48 = vld [vmem:[%s5312_s1 + $0x18] sm:$0xff]  ;;  %v3437_v49 = vld [vmem:[%s5312_s1 + $0x20] sm:$0xff]  ;;  %v3438_v50 = vld [vmem:[%s5312_s1 + $0x28] sm:$0xff]  ;;  %s2975_s12 = scalar_lea.hbm %s5317_s6, %s3471_s29  ;;  %s2977_s13 = sshll.u32 %s5131_s28, 4  ;;  %s2978_s13 = int_to_ptr.vmem [resolvable:$true] %s2977_s13 }
  0x38   : > { %596 = vmatpush.bf16.msra.mxu3 %v3115_v38  ;;  %v3439_v57 = vld [vmem:[%s5312_s1 + $0x30] sm:$0xff]  ;;  %v3440_v2 = vld [vmem:[%s5312_s1 + $0x38] sm:$0xff]  ;;  %s2979_s10 = sshll.u32 %s2975_s12, 4  ;;  %s2964_s14 = scalar_lea.sflag [#allocation5], %s3845_s7  ;;  %s2980_s10 = int_to_ptr.hbm [resolvable:$true] %s2979_s10 }
  0x39   : > { %3132 = vmatmul.msk.bf16.vlgmr.msra.gmra.mxu0 %vm404_vm1, %v3433_v39  ;;  %3140 = vmatmul.msk.bf16.vlgmr.msra.gmra.mxu1 %vm404_vm1, %v3433_v39  ;;  %s3667_s15 = sshra.s32 %s2980_s10, 4  ;;  %s3673_s19 = scalar_lea.hbm %s5317_s6, 32  ;;  %s3668_s15 = int_to_ptr.hbm [resolvable:$true] %s3667_s15 }
  0x3a   : > { %3148 = vmatmul.msk.bf16.vlgmr.msra.gmra.mxu2 %vm404_vm1, %v3433_v39  ;;  %s3669_s16 = scalar_lea.hbm %s3668_s15, 16  ;;  %p3674_p5 = scmp.lt.s32.totalorder %s3668_s15, %s5317_s6 }
  0x3b   : > { %3156 = vmatmul.msk.bf16.vlgmr.msra.gmra.mxu3 %vm404_vm1, %v3433_v39  ;;  %683 = vperm.xlu0 %3532, %v3896_v40   ;;  %p3670_p2 = scmp.ne.s32.totalorder %s3668_s15, %s3669_s16  ;;  %p3675_p7 = scmp.lt.s32.totalorder %s3673_s19, %s3669_s16 }
  0x3c   : > { %673 = vperm.xlu1 %3533, %v3903_v41  }
  0x3d   : > { %p3671_p3 = pnand %p3670_p2, %p3810_p6  ;;  %p3676_p8 = por %p3675_p7, %p3674_p5 }
  0x3f   : > { %663 = vperm.xlu2 %3534, %v3936_v46   ;;  %p3672_p4 = pneg %p3671_p3 }
  0x41   : > { %p3677_p9 = pnand %p3676_p8, %p3672_p4 }
  0x43   : > { %648 = vperm.xlu0 %3532, %v3911_v42  }
  0x44   : > { %653 = vperm.xlu1 %3533, %v3916_v43  }
  0x49   : > { %3133 = vmatmul.msk.bf16.gmra.mxu0 %vm404_vm1, %v3434_v44  ;;  %3141 = vmatmul.msk.bf16.gmra.mxu1 %vm404_vm1, %v3434_v44 }
  0x4a   : > { %3149 = vmatmul.msk.bf16.gmra.mxu2 %vm404_vm1, %v3434_v44 }
  0x4b   : > { %3157 = vmatmul.msk.bf16.gmra.mxu3 %vm404_vm1, %v3434_v44 }
  0x59   : > { %3134 = vmatmul.msk.bf16.gmra.mxu0 %vm404_vm1, %v3435_v47  ;;  %3142 = vmatmul.msk.bf16.gmra.mxu1 %vm404_vm1, %v3435_v47 }
  0x5a   : > { %3150 = vmatmul.msk.bf16.gmra.mxu2 %vm404_vm1, %v3435_v47 }
  0x5b   : > { %3158 = vmatmul.msk.bf16.gmra.mxu3 %vm404_vm1, %v3435_v47 }
  0x69   : > { %3135 = vmatmul.msk.bf16.gmra.mxu0 %vm404_vm1, %v3436_v48  ;;  %3143 = vmatmul.msk.bf16.gmra.mxu1 %vm404_vm1, %v3436_v48 }
  0x6a   : > { %3151 = vmatmul.msk.bf16.gmra.mxu2 %vm404_vm1, %v3436_v48 }
  0x6b   : > { %3159 = vmatmul.msk.bf16.gmra.mxu3 %vm404_vm1, %v3436_v48 }
  0x79   : > { %3136 = vmatmul.msk.bf16.gmra.mxu0 %vm404_vm1, %v3437_v49  ;;  %3144 = vmatmul.msk.bf16.gmra.mxu1 %vm404_vm1, %v3437_v49 }
  0x7a   : > { %3152 = vmatmul.msk.bf16.gmra.mxu2 %vm404_vm1, %v3437_v49 }
  0x7b   : > { %3160 = vmatmul.msk.bf16.gmra.mxu3 %vm404_vm1, %v3437_v49 }
  0x89   : > { %3137 = vmatmul.msk.bf16.gmra.mxu0 %vm404_vm1, %v3438_v50  ;;  %3145 = vmatmul.msk.bf16.gmra.mxu1 %vm404_vm1, %v3438_v50 }
  0x8a   : > { %3153 = vmatmul.msk.bf16.gmra.mxu2 %vm404_vm1, %v3438_v50 }
  0x8b   : > { %3161 = vmatmul.msk.bf16.gmra.mxu3 %vm404_vm1, %v3438_v50 }
  0x91   : > { %v4005_v15 = vpop.permute.xlu2 %658 }
  0x99   : > { %3138 = vmatmul.msk.bf16.gmra.mxu0 %vm404_vm1, %v3439_v57  ;;  %3146 = vmatmul.msk.bf16.gmra.mxu1 %vm404_vm1, %v3439_v57  ;;  %v664_v35 = vpop.permute.xlu2 %663 }
  0x9a   : > { %3154 = vmatmul.msk.bf16.gmra.mxu2 %vm404_vm1, %v3439_v57 }
  0x9b   : > { %3162 = vmatmul.msk.bf16.gmra.mxu3 %vm404_vm1, %v3439_v57 }
  0xa5   : > { %v679_v7 = vpop.permute.xlu0 %678 }
  0xa6   : > { %v3999_v9 = vpop.permute.xlu1 %668 }
  0xa9   : > { %3139 = vmatmul.msk.bf16.gmra.mxu0 %vm404_vm1, %v3440_v2  ;;  %3147 = vmatmul.msk.bf16.gmra.mxu1 %vm404_vm1, %v3440_v2 }
  0xaa   : > { %3155 = vmatmul.msk.bf16.gmra.mxu2 %vm404_vm1, %v3440_v2 }
  0xab   : > { %3163 = vmatmul.msk.bf16.gmra.mxu3 %vm404_vm1, %v3440_v2 }
  0xad   : > { %v684_v14 = vpop.permute.xlu0 %683 }
  0xae   : > { %v674_v16 = vpop.permute.xlu1 %673 }
  0xb5   : > { %v4007_v21 = vpop.permute.xlu0 %648 }
  0xb6   : > { %v451_v51 = vpop.f32.mrf.mxu0  ;;  %v3967_v52 = vpop.f32.mrf.mxu1 }
  0xb7   : > { %v4012_v28 = vpop.permute.xlu1 %653  ;;  %v4016_v33 = vadd.f32 %v4007_v21, %v451_v51 }
  0xbd   : > { %v3969_v53 = vpop.f32.mrf.mxu2 }
  0xbe   : > { %v3971_v54 = vpop.f32.mrf.mxu3  ;;  %v453_v55 = vpop.f32.mrf.mxu0 }
  0xbf   : > { %v3973_v56 = vpop.f32.mrf.mxu1  ;;  %v4020_v44 = vadd.f32 %v4012_v28, %v453_v55 }
  0xc5   : > { %v3980_v58 = vpop.f32.mrf.mxu2 }
  0xc6   : > { %v3984_v59 = vpop.f32.mrf.mxu3  ;;  %v456_v60 = vpop.f32.mrf.mxu0 }
  0xc7   : > { %v505_v61 = vpop.f32.mrf.mxu1  ;;  %v694_v49 = vadd.f32 %v4005_v15, %v456_v60 }
  0xc8   : > { %v695_v2 = vadd.f32 %v4005_v15, %v505_v61  ;;  %v691_v61 = vadd.f32 %v4012_v28, %v3973_v56 }
  0xc9   : > { %v726_v60 = vmax.f32 %v694_v49, 0.0 }
  0xcd   : > { %v554_v62 = vpop.f32.mrf.mxu2 }
  0xce   : > { %v3986_v63 = vpop.f32.mrf.mxu3  ;;  %v458_v0 = vpop.f32.mrf.mxu0  ;;  %v4010_v24 = vadd.f32 %v4005_v15, %v554_v62 }
  0xcf   : > { %v507_v1 = vpop.f32.mrf.mxu1  ;;  %v698_v50 = vadd.f32 %v664_v35, %v458_v0  ;;  %v687_v0 = vadd.f32 %v4007_v21, %v3967_v52 }
  0xd5   : > { %v3993_v3 = vpop.f32.mrf.mxu2 }
  0xd6   : > { %v3997_v4 = vpop.f32.mrf.mxu3  ;;  %v461_v5 = vpop.f32.mrf.mxu0 }
  0xd7   : > { %v510_v6 = vpop.f32.mrf.mxu1  ;;  %v702_v29 = vadd.f32 %v3999_v9, %v461_v5  ;;  %v699_v5 = vadd.f32 %v664_v35, %v507_v1 }
  0xd8   : > { %v703_v36 = vadd.f32 %v3999_v9, %v510_v6 }
  0xd9   : > { %v734_v51 = vmax.f32 %v702_v29, 0.0 }
  0xdd   : > { %v4001_v10 = vpop.f32.mrf.mxu2 }
  0xde   : > { %v4003_v11 = vpop.f32.mrf.mxu3  ;;  %v463_v12 = vpop.f32.mrf.mxu0  ;;  %v704_v52 = vadd.f32 %v3999_v9, %v4001_v10  ;;  %v722_v10 = vmax.f32 %v4020_v44, 0.0 }
  0xdf   : > { %v512_v13 = vpop.f32.mrf.mxu1  ;;  %v706_v30 = vadd.f32 %v674_v16, %v463_v12 }
  0xe0   : > { %v707_v38 = vadd.f32 %v674_v16, %v512_v13 }
  0xe1   : > { %v738_v12 = vmax.f32 %v706_v30, 0.0  ;;  %v727_v30 = vmax.f32 %v695_v2, 0.0 }
  0xe2   : > { %v739_v6 = vmax.f32 %v707_v38, 0.0 }
  0xe5   : > { %v561_v17 = vpop.f32.mrf.mxu2 }
  0xe6   : > { %v610_v18 = vpop.f32.mrf.mxu3  ;;  %v466_v19 = vpop.f32.mrf.mxu0  ;;  %v708_v1 = vadd.f32 %v674_v16, %v561_v17  ;;  %v705_v17 = vadd.f32 %v3999_v9, %v4003_v11  ;;  %v719_v11 = vmax.f32 %v687_v0, 0.0  ;;  %v3443_v0 = vld [vmem:[#allocation3 + $0x10] sm:$0xff] }
  0xe7   : > { %v515_v20 = vpop.f32.mrf.mxu1  ;;  %v710_v22 = vadd.f32 %v679_v7, %v466_v19 }
  0xe8   : > { %v711_v25 = vadd.f32 %v679_v7, %v515_v20  ;;  %v735_v20 = vmax.f32 %v703_v36, 0.0  ;;  %v731_v36 = vmax.f32 %v699_v5, 0.0  ;;  %v736_v5 = vmax.f32 %v704_v52, 0.0 }
  0xe9   : > { %v742_v47 = vmax.f32 %v710_v22, 0.0 }
  0xea   : > { %v743_v57 = vmax.f32 %v711_v25, 0.0  ;;  %v755_v9 = vpack.c.bf16 %v731_v36, %v727_v30 }
  0xed   : > { %v564_v23 = vpop.f32.mrf.mxu2 }
  0xee   : > { %v613_v26 = vpop.f32.mrf.mxu3  ;;  %v468_v27 = vpop.f32.mrf.mxu0  ;;  %v712_v13 = vadd.f32 %v679_v7, %v564_v23  ;;  %v730_v23 = vmax.f32 %v698_v50, 0.0  ;;  %v701_v50 = vadd.f32 %v664_v35, %v3997_v4 }
  0xef   : > { %v714_v31 = vadd.f32 %v684_v14, %v468_v27  ;;  %v517_v32 = vpop.f32.mrf.mxu1  ;;  %v713_v55 = vadd.f32 %v679_v7, %v613_v26  ;;  %v709_v7 = vadd.f32 %v674_v16, %v610_v18  ;;  %v718_v16 = vmax.f32 %v4016_v33, 0.0 }
  0xf0   : > { %v715_v39 = vadd.f32 %v684_v14, %v517_v32  ;;  %v3725_v32 = vmov 1   ;;  %v744_v38 = vmax.f32 %v712_v13, 0.0  ;;  %v740_v18 = vmax.f32 %v708_v1, 0.0  ;;  %v3441_v13 = vld [vmem:[#allocation3] sm:$0xff] }
  0xf1   : > { %v746_v48 = vmax.f32 %v714_v31, 0.0  ;;  %3537 = vset.pattern.permute.xlu1 %v3725_v32  ;;  %3536 = vset.pattern.permute.xlu0 %v3725_v32  ;;  %v758_v31 = vpack.c.bf16 %v738_v12, %v734_v51  ;;  %v754_v2 = vpack.c.bf16 %v730_v23, %v726_v60  ;;  %v723_v51 = vmax.f32 %v691_v61, 0.0  ;;  %v3444_v61 = vld [vmem:[#allocation3 + $0x18] sm:$0xff] }
  0xf2   : > { %v747_v62 = vmax.f32 %v715_v39, 0.0  ;;  %791 = vperm.xlu1 %3537, %v3886_v37   ;;  %803 = vperm.xlu0 %3536, %v3896_v40   ;;  %v759_v39 = vpack.c.bf16 %v739_v6, %v735_v20  ;;  %v697_v33 = vadd.f32 %v4005_v15, %v3986_v63  ;;  %v737_v12 = vmax.f32 %v705_v17, 0.0 }
  0xf3   : > { %v762_v19 = vpack.c.bf16 %v746_v48, %v742_v47  ;;  %3535 = vset.pattern.permute.xlu2 %v3725_v32  ;;  %v745_v47 = vmax.f32 %v713_v55, 0.0  ;;  %v760_v4 = vpack.c.bf16 %v740_v18, %v736_v5  ;;  %v750_v6 = vpack.c.bf16 %v722_v10, %v718_v16 }
  0xf4   : > { %v763_v27 = vpack.c.bf16 %v747_v62, %v743_v57  ;;  %799 = vperm.xlu2 %3535, %v3879_v34   ;;  %v741_v57 = vmax.f32 %v709_v7, 0.0  ;;  %v688_v63 = vadd.f32 %v4007_v21, %v3969_v53  ;;  %v728_v15 = vmax.f32 %v4010_v24, 0.0 }
  0xf5   : > { %v566_v22 = vpop.f32.mrf.mxu2  ;;  %843 = vmatpush.bf16.msrb.mxu0 %v762_v19  ;;  %v733_v19 = vmax.f32 %v701_v50, 0.0  ;;  %v729_v32 = vmax.f32 %v697_v33, 0.0 }
  0xf6   : > { %v716_v25 = vadd.f32 %v684_v14, %v566_v22  ;;  %v615_v29 = vpop.f32.mrf.mxu3  ;;  %872 = vmatpush.bf16.msrb.mxu1 %v763_v27  ;;  %v761_v20 = vpack.c.bf16 %v741_v57, %v737_v12  ;;  %v689_v27 = vadd.f32 %v4007_v21, %v3971_v54  ;;  %v720_v53 = vmax.f32 %v688_v63, 0.0  ;;  %v3442_v21 = vld [vmem:[#allocation3 + $0x8] sm:$0xff]  ;;  %v4067_v1 = vpop.f32.mrf.mxu0 }
  0xf7   : > { %v717_v26 = vadd.f32 %v684_v14, %v615_v29  ;;  %v700_v14 = vadd.f32 %v664_v35, %v3993_v3  ;;  %v692_v3 = vadd.f32 %v4012_v28, %v3980_v58  ;;  %v693_v35 = vadd.f32 %v4012_v28, %v3984_v59  ;;  %5324 = vst [vmem:[#allocation9_spill] sm:$0xff] %v4067_v1 }
  0xf8   : > { %v748_v56 = vmax.f32 %v716_v25, 0.0  ;;  %v751_v58 = vpack.c.bf16 %v723_v51, %v719_v11  ;;  %v757_v22 = vpack.c.bf16 %v733_v19, %v729_v32  ;;  %v721_v24 = vmax.f32 %v689_v27, 0.0  ;;  %v4069_v25 = vpop.f32.mrf.mxu1 }
  0xf9   : > { %v749_v48 = vmax.f32 %v717_v26, 0.0  ;;  %844 = vmatpush.bf16.msrb.mxu0 %v758_v31  ;;  %v732_v44 = vmax.f32 %v700_v14, 0.0  ;;  %v724_v59 = vmax.f32 %v692_v3, 0.0  ;;  %v725_v55 = vmax.f32 %v693_v35, 0.0  ;;  %5325 = vst [vmem:[#allocation10_spill] sm:$0xff] %v4069_v25 }
  0xfa   : > { %873 = vmatpush.bf16.msrb.mxu1 %v759_v39  ;;  %v764_v49 = vpack.c.bf16 %v748_v56, %v744_v38  ;;  %783 = vperm.xlu1 %3537, %v3930_v45  }
  0xfb   : > { %v765_v62 = vpack.c.bf16 %v749_v48, %v745_v47  ;;  %775 = vperm.xlu0 %3536, %v3911_v42   ;;  %v756_v28 = vpack.c.bf16 %v732_v44, %v728_v15  ;;  %v752_v60 = vpack.c.bf16 %v724_v59, %v720_v53  ;;  %v753_v54 = vpack.c.bf16 %v725_v55, %v721_v24 }
  0xfc   : > { %901 = vmatpush.bf16.msrb.mxu2 %v764_v49  ;;  %795 = vperm.xlu2 %3535, %v3903_v41  }
  0xfd   : > { %930 = vmatpush.bf16.msrb.mxu3 %v765_v62  ;;  %845 = vmatpush.bf16.msrb.mxu0 %v754_v2  ;;  %v4079_v30 = vpop.f32.mrf.mxu2 }
  0xfe   : > { %874 = vmatpush.bf16.msrb.mxu1 %v755_v9  ;;  %v4074_v29 = vpop.f32.mrf.mxu0  ;;  %5328 = vst [vmem:[#allocation13_spill] sm:$0xff] %v4079_v30  ;;  %v4081_v7 = vpop.f32.mrf.mxu3 }
  0xff   : > { %5326 = vst [vmem:[#allocation11_spill] sm:$0xff] %v4074_v29 }
 0x100   : > { %902 = vmatpush.bf16.msrb.mxu2 %v760_v4  ;;  %v4077_v23 = vpop.f32.mrf.mxu1  ;;  %5329 = vst [vmem:[#allocation14_spill] sm:$0xff] %v4081_v7 }
 0x101   : > { %931 = vmatpush.bf16.msrb.mxu3 %v761_v20  ;;  %846 = vmatpush.bf16.msrb.mxu0 %v750_v6  ;;  %5327 = vst [vmem:[#allocation12_spill] sm:$0xff] %v4077_v23 }
 0x102   : > { %875 = vmatpush.bf16.msrb.mxu1 %v751_v58  ;;  %779 = vperm.xlu1 %3537, %v3916_v43  }
 0x104   : > { %903 = vmatpush.bf16.msrb.mxu2 %v756_v28  ;;  %3180 = vmatmul.msk.bf16.vlgmr.msrb.gmra.mxu0 %vm826_vm2, %v3441_v13 }
 0x105   : > { %932 = vmatpush.bf16.msrb.mxu3 %v757_v22  ;;  %3184 = vmatmul.msk.bf16.vlgmr.msrb.gmra.mxu1 %vm826_vm2, %v3441_v13  ;;  %v4087_v36 = vpop.f32.mrf.mxu2 }
 0x106   : > { %787 = vperm.xlu2 %3535, %v3936_v46   ;;  %v4083_v26 = vpop.f32.mrf.mxu0  ;;  %5332 = vst [vmem:[#allocation17_spill] sm:$0xff] %v4087_v36  ;;  %v4089_v52 = vpop.f32.mrf.mxu3 }
 0x107   : > { %5330 = vst [vmem:[#allocation15_spill] sm:$0xff] %v4083_v26 }
 0x108   : > { %904 = vmatpush.bf16.msrb.mxu2 %v752_v60  ;;  %v4085_v31 = vpop.f32.mrf.mxu1  ;;  %5333 = vst [vmem:[#allocation18_spill] sm:$0xff] %v4089_v52 }
 0x109   : > { %933 = vmatpush.bf16.msrb.mxu3 %v753_v54  ;;  %5331 = vst [vmem:[#allocation16_spill] sm:$0xff] %v4085_v31 }
 0x10b   : > { %3188 = vmatmul.msk.bf16.vlgmr.msrb.gmra.mxu2 %vm826_vm2, %v3441_v13 }
 0x10c   : > { %3192 = vmatmul.msk.bf16.vlgmr.msrb.gmra.mxu3 %vm826_vm2, %v3441_v13 }
 0x10d   : > { %v4095_v39 = vpop.f32.mrf.mxu2 }
 0x10e   : > { %v4091_v38 = vpop.f32.mrf.mxu0  ;;  %5336 = vst [vmem:[#allocation21_spill] sm:$0xff] %v4095_v39  ;;  %v4097_v17 = vpop.f32.mrf.mxu3 }
 0x10f   : > { %5334 = vst [vmem:[#allocation19_spill] sm:$0xff] %v4091_v38 }
 0x110   : > { %v4093_v56 = vpop.f32.mrf.mxu1  ;;  %5337 = vst [vmem:[#allocation22_spill] sm:$0xff] %v4097_v17 }
 0x111   : > { %5335 = vst [vmem:[#allocation20_spill] sm:$0xff] %v4093_v56 }
 0x114   : > { %3181 = vmatmul.msk.bf16.gmra.mxu0 %vm826_vm2, %v3442_v21 }
 0x115   : > { %3185 = vmatmul.msk.bf16.gmra.mxu1 %vm826_vm2, %v3442_v21  ;;  %v4103_v16 = vpop.f32.mrf.mxu2 }
 0x116   : > { %v4099_v47 = vpop.f32.mrf.mxu0  ;;  %5340 = vst [vmem:[#allocation25_spill] sm:$0xff] %v4103_v16  ;;  %v4105_v14 = vpop.f32.mrf.mxu3 }
 0x117   : > { %5338 = vst [vmem:[#allocation23_spill] sm:$0xff] %v4099_v47 }
 0x118   : > { %v4101_v48 = vpop.f32.mrf.mxu1  ;;  %5341 = vst [vmem:[#allocation26_spill] sm:$0xff] %v4105_v14 }
 0x119   : > { %5339 = vst [vmem:[#allocation24_spill] sm:$0xff] %v4101_v48 }
 0x11b   : > { %3189 = vmatmul.msk.bf16.gmra.mxu2 %vm826_vm2, %v3442_v21 }
 0x11c   : > { %3193 = vmatmul.msk.bf16.gmra.mxu3 %vm826_vm2, %v3442_v21 }
 0x11d   : > { %v4111_v10 = vpop.f32.mrf.mxu2 }
 0x11e   : > { %v4107_v18 = vpop.f32.mrf.mxu0  ;;  %5342 = vst [vmem:[#allocation27_spill] sm:$0xff] %v4111_v10  ;;  %v4113_v50 = vpop.f32.mrf.mxu3 }
 0x11f   : > { %5343 = vst [vmem:[#allocation28_spill] sm:$0xff] %v4113_v50 }
 0x120   : > { %v4109_v49 = vpop.f32.mrf.mxu1 }
 0x124   : > { %3182 = vmatmul.msk.bf16.gmra.mxu0 %vm826_vm2, %v3443_v0 }
 0x125   : > { %3186 = vmatmul.msk.bf16.gmra.mxu1 %vm826_vm2, %v3443_v0  ;;  %v4119_v2 = vpop.f32.mrf.mxu2 }
 0x126   : > { %v4115_v57 = vpop.f32.mrf.mxu0  ;;  %5344 = vst [vmem:[#allocation29_spill] sm:$0xff] %v4119_v2  ;;  %v4121_v5 = vpop.f32.mrf.mxu3 }
 0x127   : > { %5345 = vst [vmem:[#allocation30_spill] sm:$0xff] %v4121_v5 }
 0x128   : > { %v4117_v62 = vpop.f32.mrf.mxu1 }
 0x12b   : > { %3190 = vmatmul.msk.bf16.gmra.mxu2 %vm826_vm2, %v3443_v0 }
 0x12c   : > { %3194 = vmatmul.msk.bf16.gmra.mxu3 %vm826_vm2, %v3443_v0 }
 0x12d   : > { %v4127_v51 = vpop.f32.mrf.mxu2 }
 0x12e   : > { %v4123_v9 = vpop.f32.mrf.mxu0  ;;  %5346 = vst [vmem:[#allocation31_spill] sm:$0xff] %v4127_v51  ;;  %v4129_v33 = vpop.f32.mrf.mxu3 }
 0x12f   : > { %5347 = vst [vmem:[#allocation32_spill] sm:$0xff] %v4129_v33 }
 0x130   : > { %v4125_v11 = vpop.f32.mrf.mxu1 }
 0x134   : > { %3183 = vmatmul.msk.bf16.gmra.mxu0 %vm826_vm2, %v3444_v61 }
 0x135   : > { %3187 = vmatmul.msk.bf16.gmra.mxu1 %vm826_vm2, %v3444_v61  ;;  %v4135_v44 = vpop.f32.mrf.mxu2 }
 0x136   : > { %5348 = vst [vmem:[#allocation33_spill] sm:$0xff] %v4135_v44  ;;  %v4137_v4 = vpop.f32.mrf.mxu3 }
 0x137   : > { %5349 = vst [vmem:[#allocation34_spill] sm:$0xff] %v4137_v4 }
 0x13b   : > { %3191 = vmatmul.msk.bf16.gmra.mxu2 %vm826_vm2, %v3444_v61 }
 0x13c   : > { %3195 = vmatmul.msk.bf16.gmra.mxu3 %vm826_vm2, %v3444_v61 }
 0x14e   : > { %v800_v54 = vpop.permute.xlu2 %799 }
 0x156   : > { %v4165_v52 = vpop.permute.xlu2 %795 }
 0x160   : > { %v788_v26 = vpop.permute.xlu2 %787 }
 0x164   : > { %v4159_v0 = vpop.permute.xlu1 %791  ;;  %v4167_v39 = vpop.permute.xlu0 %803 }
 0x16c   : > { %v4169_v50 = vpop.permute.xlu1 %783 }
 0x181   : > { %v4131_v12 = vpop.f32.mrf.mxu0 }
 0x182   : > { %v4133_v3 = vpop.f32.mrf.mxu1 }
 0x189   : > { %v4139_v35 = vpop.f32.mrf.mxu0 }
 0x18a   : > { %v4141_v19 = vpop.f32.mrf.mxu1 }
 0x18e   : > { %v4143_v20 = vpop.f32.mrf.mxu2 }
 0x18f   : > { %v4145_v6 = vpop.f32.mrf.mxu3 }
 0x191   : > { %v853_v63 = vpop.f32.mrf.mxu0 }
 0x192   : > { %v882_v15 = vpop.f32.mrf.mxu1 }
 0x196   : > { %v4147_v58 = vpop.f32.mrf.mxu2 }
 0x197   : > { %v4149_v13 = vpop.f32.mrf.mxu3 }
 0x199   : > { %v855_v27 = vpop.f32.mrf.mxu0 }
 0x19a   : > { %v884_v32 = vpop.f32.mrf.mxu1 }
 0x19b   : > { %v885_v47 = vadd.f32 %v884_v32, %v788_v26  ;;  %v3726_v32 = vmov 2  }
 0x19c   : > { %3540 = vset.pattern.permute.xlu1 %v3726_v32  ;;  %3539 = vset.pattern.permute.xlu0 %v3726_v32 }
 0x19d   : > { %1029 = vperm.xlu1 %3540, %v3886_v37   ;;  %1041 = vperm.xlu0 %3539, %v3896_v40  }
 0x19e   : > { %v4151_v59 = vpop.f32.mrf.mxu2  ;;  %3538 = vset.pattern.permute.xlu2 %v3726_v32 }
 0x19f   : > { %v4153_v28 = vpop.f32.mrf.mxu3  ;;  %1037 = vperm.xlu2 %3538, %v3879_v34   ;;  %v912_v34 = vadd.f32 %v4151_v59, %v4169_v50 }
 0x1a1   : > { %v858_v55 = vpop.f32.mrf.mxu0 }
 0x1a2   : > { %v887_v22 = vpop.f32.mrf.mxu1  ;;  %v859_v10 = vadd.f32 %v858_v55, %v4159_v0 }
 0x1a3   : > { %v888_v5 = vadd.f32 %v887_v22, %v4159_v0  ;;  %v854_v22 = vadd.f32 %v853_v63, %v4169_v50  ;;  %v968_v63 = vmax.f32 %v885_v47, 0.0 }
 0x1a4   : > { %v971_v23 = vmax.f32 %v859_v10, 0.0 }
 0x1a5   : > { %v972_v55 = vmax.f32 %v888_v5, 0.0  ;;  %1021 = vperm.xlu1 %3540, %v3930_v45   ;;  %1013 = vperm.xlu0 %3539, %v3911_v42  }
 0x1a6   : > { %v4155_v53 = vpop.f32.mrf.mxu2 }
 0x1a7   : > { %v4157_v24 = vpop.f32.mrf.mxu3  ;;  %1033 = vperm.xlu2 %3538, %v3903_v41   ;;  %v3446_v41 = vld [vmem:[#allocation3 + $0x28] sm:$0xff] }
 0x1a9   : > { %v860_v60 = vpop.f32.mrf.mxu0 }
 0x1aa   : > { %v889_v21 = vpop.f32.mrf.mxu1  ;;  %v861_v4 = vadd.f32 %v860_v60, %v4165_v52 }
 0x1ab   : > { %v890_v44 = vadd.f32 %v889_v21, %v4165_v52  ;;  %v856_v21 = vadd.f32 %v855_v27, %v788_v26 }
 0x1ac   : > { %v975_v29 = vmax.f32 %v861_v4, 0.0 }
 0x1ad   : > { %v976_v56 = vmax.f32 %v890_v44, 0.0  ;;  %1017 = vperm.xlu1 %3540, %v3916_v43   ;;  %v3448_v43 = vld [vmem:[#allocation3 + $0x38] sm:$0xff] }
 0x1ae   : > { %v4161_v61 = vpop.f32.mrf.mxu2 }
 0x1af   : > { %v4163_v8 = vpop.f32.mrf.mxu3  ;;  %v996_v10 = vpack.c.bf16 %v976_v56, %v972_v55  ;;  %1025 = vperm.xlu2 %3538, %v3936_v46  }
 0x1b1   : > { %v863_v7 = vpop.f32.mrf.mxu0 }
 0x1b2   : > { %v892_v30 = vpop.f32.mrf.mxu1  ;;  %v864_v36 = vadd.f32 %v863_v7, %v800_v54 }
 0x1b3   : > { %v893_v14 = vadd.f32 %v892_v30, %v800_v54 }
 0x1b4   : > { %v979_v33 = vmax.f32 %v864_v36, 0.0  ;;  %v883_v36 = vadd.f32 %v882_v15, %v4169_v50 }
 0x1b5   : > { %v980_v25 = vmax.f32 %v893_v14, 0.0  ;;  %v995_v14 = vpack.c.bf16 %v975_v29, %v971_v23 }
 0x1b6   : > { %v918_v17 = vpop.f32.mrf.mxu2  ;;  %v964_v4 = vmax.f32 %v883_v36, 0.0  ;;  %v3445_v36 = vld [vmem:[#allocation3 + $0x20] sm:$0xff] }
 0x1b7   : > { %v947_v16 = vpop.f32.mrf.mxu3 }
 0x1b9   : > { %v865_v2 = vpop.f32.mrf.mxu0 }
 0x1ba   : > { %v866_v51 = vadd.f32 %v865_v2, %v4167_v39  ;;  %v894_v7 = vpop.f32.mrf.mxu1 }
 0x1bb   : > { %v895_v1 = vadd.f32 %v894_v7, %v4167_v39  ;;  %v4179_v7 = vpop.permute.xlu0 %775 }
 0x1bc   : > { %v983_v30 = vmax.f32 %v866_v51, 0.0  ;;  %v849_v5 = vadd.f32 %v4131_v12, %v4179_v7 }
 0x1bd   : > { %v984_v31 = vmax.f32 %v895_v1, 0.0  ;;  %v780_v1 = vpop.permute.xlu1 %779 }
 0x1be   : > { %v999_v60 = vpack.c.bf16 %v983_v30, %v979_v33  ;;  %v921_v38 = vpop.f32.mrf.mxu2  ;;  %v851_v51 = vadd.f32 %v4139_v35, %v780_v1  ;;  %v878_v33 = vadd.f32 %v4133_v3, %v4179_v7  ;;  %v880_v44 = vadd.f32 %v4141_v19, %v780_v1 }
 0x1bf   : > { %v1000_v48 = vpack.c.bf16 %v984_v31, %v980_v25  ;;  %v950_v2 = vpop.f32.mrf.mxu3  ;;  %v963_v25 = vmax.f32 %v854_v22, 0.0  ;;  %v967_v31 = vmax.f32 %v856_v21, 0.0  ;;  %v922_v29 = vadd.f32 %v921_v38, %v800_v54 }
 0x1c0   : > { %1080 = vmatpush.bf16.msra.mxu0 %v999_v60  ;;  %v955_v23 = vmax.f32 %v849_v5, 0.0  ;;  %v951_v56 = vadd.f32 %v950_v2, %v800_v54  ;;  %v959_v27 = vmax.f32 %v851_v51, 0.0  ;;  %v956_v12 = vmax.f32 %v878_v33, 0.0 }
 0x1c1   : > { %1109 = vmatpush.bf16.msra.mxu1 %v1000_v48  ;;  %v991_v15 = vpack.c.bf16 %v967_v31, %v963_v25  ;;  %v919_v3 = vadd.f32 %v918_v17, %v4165_v52  ;;  %v992_v19 = vpack.c.bf16 %v968_v63, %v964_v4  ;;  %v960_v55 = vmax.f32 %v880_v44, 0.0 }
 0x1c2   : > { %v948_v38 = vadd.f32 %v947_v16, %v4165_v52  ;;  %v917_v54 = vadd.f32 %v4161_v61, %v4159_v0  ;;  %v981_v60 = vmax.f32 %v922_v29, 0.0  ;;  %v946_v22 = vadd.f32 %v4163_v8, %v4159_v0 }
 0x1c3   : > { %v982_v37 = vmax.f32 %v951_v56, 0.0  ;;  %v987_v40 = vpack.c.bf16 %v959_v27, %v955_v23  ;;  %v914_v52 = vadd.f32 %v4155_v53, %v788_v26  ;;  %v977_v2 = vmax.f32 %v919_v3, 0.0 }
 0x1c4   : > { %1081 = vmatpush.bf16.msra.mxu0 %v995_v14  ;;  %v943_v14 = vadd.f32 %v4157_v24, %v788_v26  ;;  %v973_v8 = vmax.f32 %v917_v54, 0.0  ;;  %v941_v0 = vadd.f32 %v4153_v28, %v4169_v50  ;;  %v974_v53 = vmax.f32 %v946_v22, 0.0 }
 0x1c5   : > { %1110 = vmatpush.bf16.msra.mxu1 %v996_v10  ;;  %v978_v10 = vmax.f32 %v948_v38, 0.0  ;;  %v909_v5 = vadd.f32 %v4147_v58, %v780_v1  ;;  %v969_v26 = vmax.f32 %v914_v52, 0.0  ;;  %v938_v24 = vadd.f32 %v4149_v13, %v780_v1 }
 0x1c6   : > { %v923_v48 = vpop.f32.mrf.mxu2  ;;  %v997_v51 = vpack.c.bf16 %v977_v2, %v973_v8  ;;  %v970_v33 = vmax.f32 %v943_v14, 0.0  ;;  %v907_v50 = vadd.f32 %v4143_v20, %v4179_v7  ;;  %v965_v28 = vmax.f32 %v912_v34, 0.0 }
 0x1c7   : > { %v924_v35 = vadd.f32 %v923_v48, %v4167_v39  ;;  %v952_v30 = vpop.f32.mrf.mxu3  ;;  %v998_v59 = vpack.c.bf16 %v978_v10, %v974_v53  ;;  %v936_v58 = vadd.f32 %v4145_v6, %v4179_v7  ;;  %v966_v45 = vmax.f32 %v941_v0, 0.0  ;;  %v3447_v6 = vld [vmem:[#allocation3 + $0x30] sm:$0xff] }
 0x1c8   : > { %v953_v47 = vadd.f32 %v952_v30, %v4167_v39  ;;  %1082 = vmatpush.bf16.msra.mxu0 %v991_v15  ;;  %v988_v39 = vpack.c.bf16 %v960_v55, %v956_v12  ;;  %v993_v25 = vpack.c.bf16 %v969_v26, %v965_v28  ;;  %v961_v13 = vmax.f32 %v909_v5, 0.0 }
 0x1c9   : > { %v985_v17 = vmax.f32 %v924_v35, 0.0  ;;  %1111 = vmatpush.bf16.msra.mxu1 %v992_v19  ;;  %v994_v1 = vpack.c.bf16 %v970_v33, %v966_v45  ;;  %v962_v31 = vmax.f32 %v938_v24, 0.0  ;;  %v957_v44 = vmax.f32 %v907_v50, 0.0 }
 0x1ca   : > { %v986_v21 = vmax.f32 %v953_v47, 0.0  ;;  %v958_v42 = vmax.f32 %v936_v58, 0.0 }
 0x1cb   : > { %v1001_v16 = vpack.c.bf16 %v985_v17, %v981_v60  ;;  %v989_v4 = vpack.c.bf16 %v961_v13, %v957_v44 }
 0x1cc   : > { %v1002_v61 = vpack.c.bf16 %v986_v21, %v982_v37  ;;  %1083 = vmatpush.bf16.msra.mxu0 %v987_v40  ;;  %v990_v20 = vpack.c.bf16 %v962_v31, %v958_v42 }
 0x1cd   : > { %1112 = vmatpush.bf16.msra.mxu1 %v988_v39  ;;  %1138 = vmatpush.bf16.msra.mxu2 %v1001_v16 }
 0x1ce   : > { %1167 = vmatpush.bf16.msra.mxu3 %v1002_v61 }
 0x1cf   : > { %3212 = vmatmul.msk.bf16.vlgmr.msra.gmra.mxu0 %vm826_vm2, %v3445_v36 }
 0x1d0   : > { %3216 = vmatmul.msk.bf16.vlgmr.msra.gmra.mxu1 %vm826_vm2, %v3445_v36 }
 0x1d1   : > { %1139 = vmatpush.bf16.msra.mxu2 %v997_v51 }
 0x1d2   : > { %1168 = vmatpush.bf16.msra.mxu3 %v998_v59 }
 0x1d5   : > { %1140 = vmatpush.bf16.msra.mxu2 %v993_v25 }
 0x1d6   : > { %1169 = vmatpush.bf16.msra.mxu3 %v994_v1 }
 0x1d9   : > { %1141 = vmatpush.bf16.msra.mxu2 %v989_v4 }
 0x1da   : > { %1170 = vmatpush.bf16.msra.mxu3 %v990_v20 }
 0x1dc   : > { %3220 = vmatmul.msk.bf16.vlgmr.msra.gmra.mxu2 %vm826_vm2, %v3445_v36 }
 0x1dd   : > { %3224 = vmatmul.msk.bf16.vlgmr.msra.gmra.mxu3 %vm826_vm2, %v3445_v36 }
 0x1df   : > { %3213 = vmatmul.msk.bf16.gmra.mxu0 %vm826_vm2, %v3446_v41 }
 0x1e0   : > { %3217 = vmatmul.msk.bf16.gmra.mxu1 %vm826_vm2, %v3446_v41 }
 0x1ec   : > { %3221 = vmatmul.msk.bf16.gmra.mxu2 %vm826_vm2, %v3446_v41 }
 0x1ed   : > { %3225 = vmatmul.msk.bf16.gmra.mxu3 %vm826_vm2, %v3446_v41 }
 0x1ef   : > { %3214 = vmatmul.msk.bf16.gmra.mxu0 %vm826_vm2, %v3447_v6 }
 0x1f0   : > { %3218 = vmatmul.msk.bf16.gmra.mxu1 %vm826_vm2, %v3447_v6 }
 0x1f9   : > { %v4251_v38 = vpop.permute.xlu2 %1037 }
 0x1fc   : > { %3222 = vmatmul.msk.bf16.gmra.mxu2 %vm826_vm2, %v3447_v6 }
 0x1fd   : > { %3226 = vmatmul.msk.bf16.gmra.mxu3 %vm826_vm2, %v3447_v6 }
 0x1ff   : > { %3215 = vmatmul.msk.bf16.gmra.mxu0 %vm826_vm2, %v3448_v43 }
 0x200   : > { %3219 = vmatmul.msk.bf16.gmra.mxu1 %vm826_vm2, %v3448_v43 }
 0x201   : > { %v4259_v21 = vpop.permute.xlu2 %1033 }
 0x209   : > { %v4279_v50 = vpop.permute.xlu2 %1025 }
 0x20c   : > { %3223 = vmatmul.msk.bf16.gmra.mxu2 %vm826_vm2, %v3448_v43 }
 0x20d   : > { %3227 = vmatmul.msk.bf16.gmra.mxu3 %vm826_vm2, %v3448_v43 }
 0x20f   : > { %v4257_v22 = vpop.permute.xlu1 %1029  ;;  %v4267_v2 = vpop.permute.xlu0 %1041 }
 0x217   : > { %v4269_v14 = vpop.permute.xlu1 %1021 }
 0x24c   : > { %v4231_v46 = vpop.f32.mrf.mxu0 }
 0x24d   : > { %v4233_v7 = vpop.f32.mrf.mxu1 }
 0x254   : > { %v4235_v63 = vpop.f32.mrf.mxu0 }
 0x255   : > { %v4237_v29 = vpop.f32.mrf.mxu1 }
 0x25c   : > { %v1090_v23 = vpop.f32.mrf.mxu0 }
 0x25d   : > { %v1119_v56 = vpop.f32.mrf.mxu1  ;;  %v1091_v59 = vadd.f32 %v1090_v23, %v4269_v14 }
 0x25e   : > { %v1120_v33 = vadd.f32 %v1119_v56, %v4269_v14 }
 0x25f   : > { %v4239_v48 = vpop.f32.mrf.mxu2  ;;  %v1200_v43 = vmax.f32 %v1091_v59, 0.0 }
 0x260   : > { %v4241_v15 = vpop.f32.mrf.mxu3 }
 0x264   : > { %v1092_v27 = vpop.f32.mrf.mxu0 }
 0x265   : > { %v1121_v12 = vpop.f32.mrf.mxu1  ;;  %v1093_v45 = vadd.f32 %v1092_v27, %v4279_v50  ;;  %v1201_v27 = vmax.f32 %v1120_v33, 0.0 }
 0x266   : > { %v1122_v44 = vadd.f32 %v1121_v12, %v4279_v50 }
 0x267   : > { %v4243_v32 = vpop.f32.mrf.mxu2  ;;  %v1204_v23 = vmax.f32 %v1093_v45, 0.0 }
 0x268   : > { %v4245_v3 = vpop.f32.mrf.mxu3 }
 0x26c   : > { %v1095_v35 = vpop.f32.mrf.mxu0 }
 0x26d   : > { %v1124_v30 = vpop.f32.mrf.mxu1  ;;  %v1096_v61 = vadd.f32 %v1095_v35, %v4257_v22  ;;  %v4283_v35 = vpop.permute.xlu1 %1017 }
 0x26e   : > { %v1125_v34 = vadd.f32 %v1124_v30, %v4257_v22  ;;  %v4285_v30 = vpop.permute.xlu0 %1013 }
 0x26f   : > { %v4247_v19 = vpop.f32.mrf.mxu2  ;;  %v1208_v25 = vmax.f32 %v1096_v61, 0.0  ;;  %v1086_v12 = vadd.f32 %v4231_v46, %v4285_v30 }
 0x270   : > { %v4249_v55 = vpop.f32.mrf.mxu3  ;;  %v1209_v42 = vmax.f32 %v1125_v34, 0.0 }
 0x271   : > { %v1192_v34 = vmax.f32 %v1086_v12, 0.0 }
 0x274   : > { %v1097_v47 = vpop.f32.mrf.mxu0 }
 0x275   : > { %v1126_v54 = vpop.f32.mrf.mxu1  ;;  %v1098_v10 = vadd.f32 %v1097_v47, %v4259_v21  ;;  %v1205_v47 = vmax.f32 %v1122_v44, 0.0 }
 0x276   : > { %v1127_v8 = vadd.f32 %v1126_v54, %v4259_v21  ;;  %v1088_v54 = vadd.f32 %v4235_v63, %v4283_v35 }
 0x277   : > { %v4253_v60 = vpop.f32.mrf.mxu2  ;;  %v1212_v13 = vmax.f32 %v1098_v10, 0.0  ;;  %v1229_v10 = vpack.c.bf16 %v1205_v47, %v1201_v27 }
 0x278   : > { %v4255_v17 = vpop.f32.mrf.mxu3  ;;  %v1213_v4 = vmax.f32 %v1127_v8, 0.0  ;;  %v1196_v8 = vmax.f32 %v1088_v54, 0.0  ;;  %v1173_v54 = vadd.f32 %v4241_v15, %v4285_v30  ;;  %v4366_v15 = vld [vmem:[%s5313_s2 + $0x8] sm:$0xff] }
 0x279   : > { %v1232_v6 = vpack.c.bf16 %v1212_v13, %v1208_v25 }
 0x27a   : > { %v1233_v56 = vpack.c.bf16 %v1213_v4, %v1209_v42  ;;  %v1224_v63 = vpack.c.bf16 %v1196_v8, %v1192_v34  ;;  %v1151_v42 = vadd.f32 %v4253_v60, %v4279_v50  ;;  %v4374_v34 = vld [vmem:[%s5313_s2 + $0x18] sm:$0xff]  ;;  %v3451_v8 = vld [vmem:[#allocation3 + $0x50] sm:$0xff] }
 0x27c   : > { %v1100_v37 = vpop.f32.mrf.mxu0  ;;  %v1206_v27 = vmax.f32 %v1151_v42, 0.0 }
 0x27d   : > { %v1129_v40 = vpop.f32.mrf.mxu1  ;;  %v1101_v39 = vadd.f32 %v1100_v37, %v4251_v38  ;;  %v1117_v37 = vadd.f32 %v4237_v29, %v4283_v35  ;;  %v4296_v29 = vld [vmem:[#allocation3 + $0x40] sm:$0xff] }
 0x27e   : > { %v1130_v36 = vadd.f32 %v1129_v40, %v4251_v38  ;;  %v1115_v40 = vadd.f32 %v4233_v7, %v4285_v30 }
 0x27f   : > { %v4261_v52 = vpop.f32.mrf.mxu2  ;;  %v1216_v53 = vmax.f32 %v1101_v39, 0.0 }
 0x280   : > { %v4263_v16 = vpop.f32.mrf.mxu3  ;;  %v1217_v26 = vmax.f32 %v1130_v36, 0.0  ;;  %v1228_v36 = vpack.c.bf16 %v1204_v23, %v1200_v43  ;;  %v1178_v43 = vadd.f32 %v4249_v55, %v4269_v14  ;;  %v1144_v55 = vadd.f32 %v4239_v48, %v4285_v30 }
 0x282   : > { %v1203_v12 = vmax.f32 %v1178_v43, 0.0 }
 0x284   : > { %v1102_v0 = vpop.f32.mrf.mxu0 }
 0x285   : > { %v1103_v5 = vadd.f32 %v1102_v0, %v4267_v2  ;;  %v1131_v51 = vpop.f32.mrf.mxu1  ;;  %v1193_v0 = vmax.f32 %v1115_v40, 0.0 }
 0x286   : > { %v1132_v24 = vadd.f32 %v1131_v51, %v4267_v2 }
 0x287   : > { %v1220_v28 = vmax.f32 %v1103_v5, 0.0  ;;  %v1155_v58 = vpop.f32.mrf.mxu2 }
 0x288   : > { %v1221_v1 = vmax.f32 %v1132_v24, 0.0  ;;  %v1184_v31 = vpop.f32.mrf.mxu3  ;;  %v1156_v24 = vadd.f32 %v1155_v58, %v4259_v21  ;;  %v1154_v58 = vadd.f32 %v4261_v52, %v4257_v22  ;;  %v4326_v52 = vld [vmem:[%s5313_s2 + $0x30] sm:$0xff] }
 0x289   : > { %v1236_v20 = vpack.c.bf16 %v1220_v28, %v1216_v53  ;;  %v1197_v53 = vmax.f32 %v1117_v37, 0.0  ;;  %v4304_v28 = vld [vmem:[%s5313_s2 + $0x20] sm:$0xff]  ;;  %v1185_v45 = vadd.f32 %v1184_v31, %v4259_v21  ;;  %v1183_v21 = vadd.f32 %v4263_v16, %v4257_v22 }
 0x28a   : > { %v1237_v41 = vpack.c.bf16 %v1221_v1, %v1217_v26  ;;  %v3727_v26 = vmov 3   ;;  %v4316_v1 = vld [vmem:[%s5313_s2 + $0x38] sm:$0xff]  ;;  %v1214_v44 = vmax.f32 %v1156_v24, 0.0  ;;  %v1180_v22 = vadd.f32 %v4255_v17, %v4279_v50  ;;  %v4342_v17 = vld [vmem:[%s5313_s2 + $0x10] sm:$0xff] }
 0x28b   : > { %1317 = vmatpush.bf16.msrb.mxu0 %v1236_v20  ;;  %v1225_v5 = vpack.c.bf16 %v1197_v53, %v1193_v0  ;;  %3543 = vset.pattern.permute.xlu1 %v3727_v26  ;;  %v1215_v20 = vmax.f32 %v1185_v45, 0.0  ;;  %v1211_v23 = vmax.f32 %v1183_v21, 0.0  ;;  %v3452_v0 = vld [vmem:[#allocation3 + $0x58] sm:$0xff] }
 0x28c   : > { %1346 = vmatpush.bf16.msrb.mxu1 %v1237_v41  ;;  %1266 = vperm.xlu1 %3543, %v4304_v28   ;;  %v1149_v41 = vadd.f32 %v4247_v19, %v4269_v14  ;;  %v1175_v19 = vadd.f32 %v4245_v3, %v4283_v35  ;;  %v1207_v47 = vmax.f32 %v1180_v22, 0.0  ;;  %v4360_v3 = vld [vmem:[%s5313_s2 + $0x28] sm:$0xff] }
 0x28d   : > { %3542 = vset.pattern.permute.xlu0 %v3727_v26  ;;  %3541 = vset.pattern.permute.xlu2 %v3727_v26  ;;  %v1235_v50 = vpack.c.bf16 %v1215_v20, %v1211_v23  ;;  %v3728_v20 = vmov 4  }
 0x28e   : > { %1278 = vperm.xlu0 %3542, %v4316_v1   ;;  %1274 = vperm.xlu2 %3541, %v4326_v52   ;;  %v1202_v14 = vmax.f32 %v1149_v41, 0.0  ;;  %v1231_v37 = vpack.c.bf16 %v1207_v47, %v1203_v12  ;;  %v1199_v40 = vmax.f32 %v1175_v19, 0.0 }
 0x28f   : > { %v1158_v39 = vpop.f32.mrf.mxu2  ;;  %1318 = vmatpush.bf16.msrb.mxu0 %v1232_v6  ;;  %v1210_v6 = vmax.f32 %v1154_v58, 0.0 }
 0x290   : > { %v1187_v61 = vpop.f32.mrf.mxu3  ;;  %1347 = vmatpush.bf16.msrb.mxu1 %v1233_v56  ;;  %v1159_v46 = vadd.f32 %v1158_v39, %v4251_v38  ;;  %v1146_v56 = vadd.f32 %v4243_v32, %v4283_v35  ;;  %v4352_v32 = vld [vmem:[%s5313_s2] sm:$0xff]  ;;  %v1230_v48 = vpack.c.bf16 %v1206_v27, %v1202_v14  ;;  %v1194_v39 = vmax.f32 %v1144_v55, 0.0 }
 0x291   : > { %v1188_v7 = vadd.f32 %v1187_v61, %v4251_v38  ;;  %v1234_v60 = vpack.c.bf16 %v1214_v44, %v1210_v6  ;;  %v1195_v61 = vmax.f32 %v1173_v54, 0.0 }
 0x292   : > { %v1218_v25 = vmax.f32 %v1159_v46, 0.0  ;;  %v1198_v35 = vmax.f32 %v1146_v56, 0.0 }
 0x293   : > { %1319 = vmatpush.bf16.msrb.mxu0 %v1228_v36  ;;  %v3450_v36 = vld [vmem:[#allocation3 + $0x48] sm:$0xff]  ;;  %v1227_v30 = vpack.c.bf16 %v1199_v40, %v1195_v61 }
 0x294   : > { %1348 = vmatpush.bf16.msrb.mxu1 %v1229_v10  ;;  %1258 = vperm.xlu1 %3543, %v4342_v17   ;;  %v1226_v10 = vpack.c.bf16 %v1198_v35, %v1194_v39 }
 0x296   : > { %1250 = vperm.xlu0 %3542, %v4352_v32   ;;  %1270 = vperm.xlu2 %3541, %v4360_v3  }
 0x297   : > { %v1160_v51 = vpop.f32.mrf.mxu2  ;;  %1320 = vmatpush.bf16.msrb.mxu0 %v1224_v63 }
 0x298   : > { %v1161_v59 = vadd.f32 %v1160_v51, %v4267_v2  ;;  %v1189_v33 = vpop.f32.mrf.mxu3  ;;  %1349 = vmatpush.bf16.msrb.mxu1 %v1225_v5 }
 0x299   : > { %v1190_v38 = vadd.f32 %v1189_v33, %v4267_v2  ;;  %v1219_v2 = vmax.f32 %v1188_v7, 0.0 }
 0x29a   : > { %v1222_v13 = vmax.f32 %v1161_v59, 0.0  ;;  %3244 = vmatmul.msk.bf16.vlgmr.msrb.gmra.mxu0 %vm826_vm2, %v4296_v29 }
 0x29b   : > { %v1223_v31 = vmax.f32 %v1190_v38, 0.0  ;;  %3248 = vmatmul.msk.bf16.vlgmr.msrb.gmra.mxu1 %vm826_vm2, %v4296_v29 }
 0x29c   : > { %v1238_v4 = vpack.c.bf16 %v1222_v13, %v1218_v25  ;;  %1254 = vperm.xlu1 %3543, %v4366_v15  }
 0x29d   : > { %v1239_v16 = vpack.c.bf16 %v1223_v31, %v1219_v2 }
 0x29e   : > { %1375 = vmatpush.bf16.msrb.mxu2 %v1238_v4  ;;  %1262 = vperm.xlu2 %3541, %v4374_v34  }
 0x29f   : > { %1404 = vmatpush.bf16.msrb.mxu3 %v1239_v16  ;;  %3545 = vset.pattern.permute.xlu0 %v3728_v20 }
 0x2a0   : > { %1515 = vperm.xlu0 %3545, %v4316_v1  }
 0x2a2   : > { %1376 = vmatpush.bf16.msrb.mxu2 %v1234_v60 }
 0x2a3   : > { %1405 = vmatpush.bf16.msrb.mxu3 %v1235_v50 }
 0x2a4   : > { %3546 = vset.pattern.permute.xlu1 %v3728_v20 }
 0x2a5   : > { %1503 = vperm.xlu1 %3546, %v4304_v28  }
 0x2a6   : > { %1377 = vmatpush.bf16.msrb.mxu2 %v1230_v48  ;;  %3544 = vset.pattern.permute.xlu2 %v3728_v20 }
 0x2a7   : > { %1406 = vmatpush.bf16.msrb.mxu3 %v1231_v37  ;;  %1511 = vperm.xlu2 %3544, %v4326_v52  }
 0x2a8   : > { %1487 = vperm.xlu0 %3545, %v4352_v32  }
 0x2aa   : > { %1378 = vmatpush.bf16.msrb.mxu2 %v1226_v10  ;;  %3245 = vmatmul.msk.bf16.gmra.mxu0 %vm826_vm2, %v3450_v36 }
 0x2ab   : > { %1407 = vmatpush.bf16.msrb.mxu3 %v1227_v30  ;;  %3249 = vmatmul.msk.bf16.gmra.mxu1 %vm826_vm2, %v3450_v36 }
 0x2ad   : > { %3252 = vmatmul.msk.bf16.vlgmr.msrb.gmra.mxu2 %vm826_vm2, %v4296_v29  ;;  %1495 = vperm.xlu1 %3546, %v4342_v17  }
 0x2ae   : > { %3256 = vmatmul.msk.bf16.vlgmr.msrb.gmra.mxu3 %vm826_vm2, %v4296_v29 }
 0x2af   : > { %1507 = vperm.xlu2 %3544, %v4360_v3  }
 0x2b5   : > { %1491 = vperm.xlu1 %3546, %v4366_v15  }
 0x2b7   : > { %1499 = vperm.xlu2 %3544, %v4374_v34  }
 0x2ba   : > { %3246 = vmatmul.msk.bf16.gmra.mxu0 %vm826_vm2, %v3451_v8 }
 0x2bb   : > { %3250 = vmatmul.msk.bf16.gmra.mxu1 %vm826_vm2, %v3451_v8 }
 0x2bd   : > { %3253 = vmatmul.msk.bf16.gmra.mxu2 %vm826_vm2, %v3450_v36 }
 0x2be   : > { %3257 = vmatmul.msk.bf16.gmra.mxu3 %vm826_vm2, %v3450_v36 }
 0x2ca   : > { %3247 = vmatmul.msk.bf16.gmra.mxu0 %vm826_vm2, %v3452_v0 }
 0x2cb   : > { %3251 = vmatmul.msk.bf16.gmra.mxu1 %vm826_vm2, %v3452_v0 }
 0x2cd   : > { %3254 = vmatmul.msk.bf16.gmra.mxu2 %vm826_vm2, %v3451_v8 }
 0x2ce   : > { %3258 = vmatmul.msk.bf16.gmra.mxu3 %vm826_vm2, %v3451_v8 }
 0x2dd   : > { %3255 = vmatmul.msk.bf16.gmra.mxu2 %vm826_vm2, %v3452_v0 }
 0x2de   : > { %3259 = vmatmul.msk.bf16.gmra.mxu3 %vm826_vm2, %v3452_v0 }
 0x2e8   : > { %v4407_v25 = vpop.permute.xlu2 %1274 }
 0x2f0   : > { %v4415_v4 = vpop.permute.xlu2 %1270 }
 0x2f8   : > { %v4444_v36 = vpop.permute.xlu2 %1262 }
 0x2fe   : > { %v4413_v44 = vpop.permute.xlu1 %1266 }
 0x300   : > { %v4426_v23 = vpop.permute.xlu0 %1278 }
 0x306   : > { %v4428_v56 = vpop.permute.xlu1 %1258 }
 0x317   : > { %v4391_v53 = vpop.f32.mrf.mxu0 }
 0x318   : > { %v4393_v63 = vpop.f32.mrf.mxu1 }
 0x31f   : > { %v4395_v46 = vpop.f32.mrf.mxu0 }
 0x320   : > { %v4397_v5 = vpop.f32.mrf.mxu1 }
 0x327   : > { %v1327_v29 = vpop.f32.mrf.mxu0 }
 0x328   : > { %v1356_v7 = vpop.f32.mrf.mxu1  ;;  %v1328_v40 = vadd.f32 %v1327_v29, %v4428_v56 }
 0x329   : > { %v1357_v39 = vadd.f32 %v1356_v7, %v4428_v56 }
 0x32a   : > { %v1437_v20 = vmax.f32 %v1328_v40, 0.0 }
 0x32f   : > { %v1329_v51 = vpop.f32.mrf.mxu0 }
 0x330   : > { %v1358_v26 = vpop.f32.mrf.mxu1  ;;  %v4399_v24 = vpop.f32.mrf.mxu2  ;;  %v1330_v10 = vadd.f32 %v1329_v51, %v4444_v36  ;;  %v1438_v51 = vmax.f32 %v1357_v39, 0.0 }
 0x331   : > { %v4401_v59 = vpop.f32.mrf.mxu3 }
 0x332   : > { %v1441_v7 = vmax.f32 %v1330_v10, 0.0 }
 0x337   : > { %v1332_v33 = vpop.f32.mrf.mxu0 }
 0x338   : > { %v1361_v45 = vpop.f32.mrf.mxu1  ;;  %v4403_v38 = vpop.f32.mrf.mxu2  ;;  %v1333_v60 = vadd.f32 %v1332_v33, %v4413_v44  ;;  %v1359_v33 = vadd.f32 %v1358_v26, %v4444_v36 }
 0x339   : > { %v4405_v58 = vpop.f32.mrf.mxu3  ;;  %v1362_v19 = vadd.f32 %v1361_v45, %v4413_v44 }
 0x33a   : > { %v1445_v30 = vmax.f32 %v1333_v60, 0.0  ;;  %v1442_v60 = vmax.f32 %v1359_v33, 0.0 }
 0x33b   : > { %v1446_v45 = vmax.f32 %v1362_v19, 0.0 }
 0x33f   : > { %v1334_v13 = vpop.f32.mrf.mxu0 }
 0x340   : > { %v1363_v21 = vpop.f32.mrf.mxu1  ;;  %v4409_v2 = vpop.f32.mrf.mxu2  ;;  %v1335_v27 = vadd.f32 %v1334_v13, %v4415_v4 }
 0x341   : > { %v4411_v31 = vpop.f32.mrf.mxu3  ;;  %v1364_v50 = vadd.f32 %v1363_v21, %v4415_v4 }
 0x342   : > { %v1449_v8 = vmax.f32 %v1335_v27, 0.0 }
 0x343   : > { %v1450_v13 = vmax.f32 %v1364_v50, 0.0 }
 0x344   : > { %v1469_v29 = vpack.c.bf16 %v1449_v8, %v1445_v30 }
 0x347   : > { %v1337_v42 = vpop.f32.mrf.mxu0 }
 0x348   : > { %v1366_v22 = vpop.f32.mrf.mxu1  ;;  %v4417_v16 = vpop.f32.mrf.mxu2  ;;  %v1338_v6 = vadd.f32 %v1337_v42, %v4407_v25 }
 0x349   : > { %v4421_v41 = vpop.f32.mrf.mxu3  ;;  %v1367_v43 = vadd.f32 %v1366_v22, %v4407_v25  ;;  %v1470_v22 = vpack.c.bf16 %v1450_v13, %v1446_v45 }
 0x34a   : > { %v1453_v55 = vmax.f32 %v1338_v6, 0.0  ;;  %v1255_v6 = vpop.permute.xlu1 %1254 }
 0x34b   : > { %v1454_v48 = vmax.f32 %v1367_v43, 0.0  ;;  %v4449_v43 = vpop.permute.xlu0 %1250  ;;  %v1354_v50 = vadd.f32 %v4397_v5, %v1255_v6  ;;  %v3453_v5 = vld [vmem:[#allocation3 + $0x60] sm:$0xff] }
 0x34c   : > { %v1323_v26 = vadd.f32 %v4391_v53, %v4449_v43 }
 0x34d   : > { %v1434_v40 = vmax.f32 %v1354_v50, 0.0  ;;  %v3454_v50 = vld [vmem:[#allocation3 + $0x68] sm:$0xff] }
 0x34f   : > { %v1339_v47 = vpop.f32.mrf.mxu0 }
 0x350   : > { %v1340_v14 = vadd.f32 %v1339_v47, %v4426_v23  ;;  %v1368_v54 = vpop.f32.mrf.mxu1  ;;  %v4435_v12 = vpop.f32.mrf.mxu2  ;;  %v1325_v47 = vadd.f32 %v4395_v46, %v1255_v6 }
 0x351   : > { %v1369_v35 = vadd.f32 %v1368_v54, %v4426_v23  ;;  %v4440_v37 = vpop.f32.mrf.mxu3  ;;  %v1466_v54 = vpack.c.bf16 %v1442_v60, %v1438_v51  ;;  %v1388_v51 = vadd.f32 %v4417_v16, %v4444_v36 }
 0x352   : > { %v1457_v61 = vmax.f32 %v1340_v14, 0.0  ;;  %v1465_v14 = vpack.c.bf16 %v1441_v7, %v1437_v20  ;;  %v1420_v7 = vadd.f32 %v4440_v37, %v4413_v44  ;;  %v1383_v37 = vadd.f32 %v4403_v38, %v1255_v6 }
 0x353   : > { %v1458_v0 = vmax.f32 %v1369_v35, 0.0  ;;  %v1433_v35 = vmax.f32 %v1325_v47, 0.0 }
 0x354   : > { %v1473_v21 = vpack.c.bf16 %v1457_v61, %v1453_v55  ;;  %v1352_v55 = vadd.f32 %v4393_v63, %v4449_v43 }
 0x355   : > { %v1474_v42 = vpack.c.bf16 %v1458_v0, %v1454_v48  ;;  %v1429_v48 = vmax.f32 %v1323_v26, 0.0 }
 0x356   : > { %1554 = vmatpush.bf16.msra.mxu0 %v1473_v21  ;;  %v1430_v46 = vmax.f32 %v1352_v55, 0.0  ;;  %v1443_v55 = vmax.f32 %v1388_v51, 0.0 }
 0x357   : > { %1583 = vmatpush.bf16.msra.mxu1 %v1474_v42  ;;  %v1461_v39 = vpack.c.bf16 %v1433_v35, %v1429_v48  ;;  %v1391_v42 = vadd.f32 %v4435_v12, %v4413_v44  ;;  %v1386_v12 = vadd.f32 %v4409_v2, %v4428_v56  ;;  %v1415_v44 = vadd.f32 %v4411_v31, %v4428_v56 }
 0x358   : > { %v1392_v27 = vpop.f32.mrf.mxu2  ;;  %v1462_v10 = vpack.c.bf16 %v1434_v40, %v1430_v46  ;;  %v1410_v48 = vadd.f32 %v4401_v59, %v4449_v43  ;;  %v1435_v56 = vmax.f32 %v1383_v37, 0.0  ;;  %v3455_v59 = vld [vmem:[#allocation3 + $0x70] sm:$0xff] }
 0x359   : > { %v1421_v19 = vpop.f32.mrf.mxu3  ;;  %v1393_v0 = vadd.f32 %v1392_v27, %v4415_v4  ;;  %v1447_v26 = vmax.f32 %v1391_v42, 0.0  ;;  %v1439_v2 = vmax.f32 %v1386_v12, 0.0  ;;  %v1440_v31 = vmax.f32 %v1415_v44, 0.0  ;;  %v4509_v42 = vpop.permute.xlu1 %1503 }
 0x35a   : > { %1555 = vmatpush.bf16.msra.mxu0 %v1469_v29  ;;  %v1422_v13 = vadd.f32 %v1421_v19, %v4415_v4  ;;  %v1417_v4 = vadd.f32 %v4421_v41, %v4444_v36  ;;  %v1448_v19 = vmax.f32 %v1420_v7, 0.0  ;;  %v1432_v46 = vmax.f32 %v1410_v48, 0.0 }
 0x35b   : > { %1584 = vmatpush.bf16.msra.mxu1 %v1470_v22  ;;  %v1451_v60 = vmax.f32 %v1393_v0, 0.0  ;;  %v1467_v38 = vpack.c.bf16 %v1443_v55, %v1439_v2 }
 0x35c   : > { %v1452_v47 = vmax.f32 %v1422_v13, 0.0  ;;  %v1444_v36 = vmax.f32 %v1417_v4, 0.0 }
 0x35d   : > { %v1471_v16 = vpack.c.bf16 %v1451_v60, %v1447_v26 }
 0x35e   : > { %1556 = vmatpush.bf16.msra.mxu0 %v1465_v14  ;;  %v1412_v14 = vadd.f32 %v4405_v58, %v1255_v6  ;;  %v1472_v41 = vpack.c.bf16 %v1452_v47, %v1448_v19  ;;  %v1468_v35 = vpack.c.bf16 %v1444_v36, %v1440_v31 }
 0x35f   : > { %1585 = vmatpush.bf16.msra.mxu1 %v1466_v54  ;;  %v1381_v54 = vadd.f32 %v4399_v24, %v4449_v43  ;;  %v3456_v43 = vld [vmem:[#allocation3 + $0x78] sm:$0xff] }
 0x360   : > { %v1395_v53 = vpop.f32.mrf.mxu2  ;;  %v1436_v58 = vmax.f32 %v1412_v14, 0.0 }
 0x361   : > { %v1424_v61 = vpop.f32.mrf.mxu3  ;;  %v1396_v63 = vadd.f32 %v1395_v53, %v4407_v25  ;;  %v1431_v6 = vmax.f32 %v1381_v54, 0.0  ;;  %v4521_v47 = vpop.permute.xlu1 %1495 }
 0x362   : > { %1557 = vmatpush.bf16.msra.mxu0 %v1461_v39  ;;  %v1425_v30 = vadd.f32 %v1424_v61, %v4407_v25  ;;  %v1464_v40 = vpack.c.bf16 %v1436_v58, %v1432_v46 }
 0x363   : > { %1586 = vmatpush.bf16.msra.mxu1 %v1462_v10  ;;  %v1455_v29 = vmax.f32 %v1396_v63, 0.0  ;;  %v1463_v24 = vpack.c.bf16 %v1435_v56, %v1431_v6 }
 0x364   : > { %v1456_v22 = vmax.f32 %v1425_v30, 0.0 }
 0x365   : > { %3276 = vmatmul.msk.bf16.vlgmr.msra.gmra.mxu0 %vm826_vm2, %v3453_v5 }
 0x366   : > { %3280 = vmatmul.msk.bf16.vlgmr.msra.gmra.mxu1 %vm826_vm2, %v3453_v5 }
 0x368   : > { %v1397_v8 = vpop.f32.mrf.mxu2 }
 0x369   : > { %v1398_v33 = vadd.f32 %v1397_v8, %v4426_v23  ;;  %v1426_v45 = vpop.f32.mrf.mxu3  ;;  %v4544_v58 = vpop.permute.xlu1 %1491 }
 0x36a   : > { %v1427_v21 = vadd.f32 %v1426_v45, %v4426_v23 }
 0x36b   : > { %v1459_v20 = vmax.f32 %v1398_v33, 0.0 }
 0x36c   : > { %v1460_v25 = vmax.f32 %v1427_v21, 0.0  ;;  %v4507_v21 = vpop.permute.xlu2 %1511 }
 0x36d   : > { %v1475_v27 = vpack.c.bf16 %v1459_v20, %v1455_v29 }
 0x36e   : > { %v1476_v23 = vpack.c.bf16 %v1460_v25, %v1456_v22 }
 0x36f   : > { %1612 = vmatpush.bf16.msra.mxu2 %v1475_v27 }
 0x370   : > { %1641 = vmatpush.bf16.msra.mxu3 %v1476_v23  ;;  %v4523_v23 = vpop.permute.xlu0 %1515 }
 0x373   : > { %1613 = vmatpush.bf16.msra.mxu2 %v1471_v16 }
 0x374   : > { %1642 = vmatpush.bf16.msra.mxu3 %v1472_v41  ;;  %v4515_v25 = vpop.permute.xlu2 %1507 }
 0x375   : > { %3277 = vmatmul.msk.bf16.gmra.mxu0 %vm826_vm2, %v3454_v50 }
 0x376   : > { %3281 = vmatmul.msk.bf16.gmra.mxu1 %vm826_vm2, %v3454_v50 }
 0x377   : > { %1614 = vmatpush.bf16.msra.mxu2 %v1467_v38 }
 0x378   : > { %1643 = vmatpush.bf16.msra.mxu3 %v1468_v35 }
 0x37b   : > { %1615 = vmatpush.bf16.msra.mxu2 %v1463_v24 }
 0x37c   : > { %1644 = vmatpush.bf16.msra.mxu3 %v1464_v40  ;;  %v4527_v19 = vpop.permute.xlu2 %1499  ;;  %v5350_v40 = vld [vmem:[#allocation23_spill] sm:$0xff] }
 0x37e   : > { %3284 = vmatmul.msk.bf16.vlgmr.msra.gmra.mxu2 %vm826_vm2, %v3453_v5 }
 0x37f   : > { %3288 = vmatmul.msk.bf16.vlgmr.msra.gmra.mxu3 %vm826_vm2, %v3453_v5 }
 0x385   : > { %3278 = vmatmul.msk.bf16.gmra.mxu0 %vm826_vm2, %v3455_v59 }
 0x386   : > { %3282 = vmatmul.msk.bf16.gmra.mxu1 %vm826_vm2, %v3455_v59 }
 0x38e   : > { %3285 = vmatmul.msk.bf16.gmra.mxu2 %vm826_vm2, %v3454_v50 }
 0x38f   : > { %3289 = vmatmul.msk.bf16.gmra.mxu3 %vm826_vm2, %v3454_v50 }
 0x395   : > { %3279 = vmatmul.msk.bf16.gmra.mxu0 %vm826_vm2, %v3456_v43 }
 0x396   : > { %3283 = vmatmul.msk.bf16.gmra.mxu1 %vm826_vm2, %v3456_v43 }
 0x39e   : > { %3286 = vmatmul.msk.bf16.gmra.mxu2 %vm826_vm2, %v3455_v59 }
 0x39f   : > { %3290 = vmatmul.msk.bf16.gmra.mxu3 %vm826_vm2, %v3455_v59 }
 0x3ae   : > { %3287 = vmatmul.msk.bf16.gmra.mxu2 %vm826_vm2, %v3456_v43 }
 0x3af   : > { %3291 = vmatmul.msk.bf16.gmra.mxu3 %vm826_vm2, %v3456_v43 }
 0x3e2   : > { %v4499_v53 = vpop.f32.mrf.mxu0 }
 0x3e3   : > { %v4501_v39 = vpop.f32.mrf.mxu1 }
 0x3ea   : > { %v1561_v61 = vpop.f32.mrf.mxu0 }
 0x3eb   : > { %v1590_v10 = vpop.f32.mrf.mxu1 }
 0x3f2   : > { %v1564_v5 = vpop.f32.mrf.mxu0 }
 0x3f3   : > { %v1593_v63 = vpop.f32.mrf.mxu1  ;;  %v1565_v24 = vadd.f32 %v1564_v5, %v4521_v47  ;;  %v1591_v5 = vadd.f32 %v1590_v10, %v4544_v58  ;;  %v5356_v10 = vld [vmem:[#allocation11_spill] sm:$0xff] }
 0x3fa   : > { %v1566_v30 = vpop.f32.mrf.mxu0 }
 0x3fb   : > { %v1595_v8 = vpop.f32.mrf.mxu1  ;;  %v1567_v38 = vadd.f32 %v1566_v30, %v4527_v19  ;;  %v5351_v30 = vld [vmem:[#allocation24_spill] sm:$0xff] }
 0x3fc   : > { %v1596_v6 = vadd.f32 %v1595_v8, %v4527_v19  ;;  %v1562_v8 = vadd.f32 %v1561_v61, %v4544_v58 }
 0x401   : > { %v4503_v0 = vpop.f32.mrf.mxu2 }
 0x402   : > { %v4505_v33 = vpop.f32.mrf.mxu3  ;;  %v1569_v45 = vpop.f32.mrf.mxu0 }
 0x403   : > { %v1598_v13 = vpop.f32.mrf.mxu1  ;;  %v1570_v14 = vadd.f32 %v1569_v45, %v4509_v42  ;;  %v4551_v45 = vpop.permute.xlu0 %1487 }
 0x404   : > { %v1599_v2 = vadd.f32 %v1598_v13, %v4509_v42  ;;  %v1589_v61 = vadd.f32 %v4501_v39, %v4551_v45 }
 0x409   : > { %v4511_v29 = vpop.f32.mrf.mxu2 }
 0x40a   : > { %v4513_v20 = vpop.f32.mrf.mxu3  ;;  %v1571_v7 = vpop.f32.mrf.mxu0 }
 0x40b   : > { %v1600_v22 = vpop.f32.mrf.mxu1  ;;  %v1572_v44 = vadd.f32 %v1571_v7, %v4515_v25 }
 0x40c   : > { %v1601_v16 = vadd.f32 %v1600_v22, %v4515_v25  ;;  %v5352_v22 = vld [vmem:[#allocation19_spill] sm:$0xff] }
 0x40d   : > { %v1686_v56 = vadd.f32 %v1572_v44, %v4107_v18  ;;  %v1594_v18 = vadd.f32 %v1593_v63, %v4521_v47  ;;  %v1560_v63 = vadd.f32 %v4499_v53, %v4551_v45  ;;  %v5358_v53 = vld [vmem:[#allocation9_spill] sm:$0xff] }
 0x411   : > { %v4517_v51 = vpop.f32.mrf.mxu2 }
 0x412   : > { %v4519_v60 = vpop.f32.mrf.mxu3  ;;  %v1574_v27 = vpop.f32.mrf.mxu0 }
 0x413   : > { %v1603_v4 = vpop.f32.mrf.mxu1  ;;  %v1575_v26 = vadd.f32 %v1574_v27, %v4507_v21  ;;  %v1718_v27 = vmax.f32 %v1686_v56, 0.0 }
 0x414   : > { %v1604_v12 = vadd.f32 %v1603_v4, %v4507_v21 }
 0x415   : > { %v1690_v41 = vadd.f32 %v1575_v26, %v4115_v57  ;;  %v1687_v57 = vadd.f32 %v1601_v16, %v4109_v49  ;;  %v1678_v49 = vadd.f32 %v1567_v38, %v5352_v22  ;;  %v5353_v26 = vld [vmem:[#allocation20_spill] sm:$0xff] }
 0x416   : > { %v1691_v48 = vadd.f32 %v1604_v12, %v4117_v62  ;;  %v1682_v62 = vadd.f32 %v1570_v14, %v5350_v40  ;;  %v1679_v12 = vadd.f32 %v1596_v6, %v5353_v26  ;;  %v5354_v14 = vld [vmem:[#allocation15_spill] sm:$0xff]  ;;  %v1666_v40 = vadd.f32 %v1560_v63, %v5358_v53 }
 0x417   : > { %v1722_v59 = vmax.f32 %v1690_v41, 0.0  ;;  %v1719_v44 = vmax.f32 %v1687_v57, 0.0  ;;  %v1674_v41 = vadd.f32 %v1565_v24, %v5354_v14  ;;  %v1710_v38 = vmax.f32 %v1678_v49, 0.0 }
 0x418   : > { %v1723_v13 = vmax.f32 %v1691_v48, 0.0  ;;  %v1711_v57 = vmax.f32 %v1679_v12, 0.0  ;;  %v1623_v53 = vadd.f32 %v4517_v51, %v4521_v47 }
 0x419   : > { %v4530_v37 = vpop.f32.mrf.mxu2  ;;  %v1706_v24 = vmax.f32 %v1674_v41, 0.0 }
 0x41a   : > { %v4533_v50 = vpop.f32.mrf.mxu3  ;;  %v1576_v55 = vpop.f32.mrf.mxu0 }
 0x41b   : > { %v1577_v36 = vadd.f32 %v1576_v55, %v4523_v23  ;;  %v1605_v54 = vpop.f32.mrf.mxu1 }
 0x41c   : > { %v1606_v31 = vadd.f32 %v1605_v54, %v4523_v23  ;;  %v5355_v54 = vld [vmem:[#allocation16_spill] sm:$0xff] }
 0x41d   : > { %v1694_v35 = vadd.f32 %v1577_v36, %v4123_v9  ;;  %v1683_v9 = vadd.f32 %v1599_v2, %v5351_v30  ;;  %v1714_v36 = vmax.f32 %v1682_v62, 0.0  ;;  %v1675_v2 = vadd.f32 %v1594_v18, %v5355_v54  ;;  %v5359_v62 = vld [vmem:[#allocation10_spill] sm:$0xff] }
 0x41e   : > { %v1695_v46 = vadd.f32 %v1606_v31, %v4125_v11  ;;  %v1670_v31 = vadd.f32 %v1562_v8, %v5356_v10  ;;  %v1734_v30 = vpack.c.bf16 %v1710_v38, %v1706_v24  ;;  %v1698_v8 = vmax.f32 %v1666_v40, 0.0  ;;  %v5361_v10 = vld [vmem:[#allocation32_spill] sm:$0xff] }
 0x41f   : > { %v1726_v43 = vmax.f32 %v1694_v35, 0.0  ;;  %v1715_v48 = vmax.f32 %v1683_v9, 0.0  ;;  %v1738_v56 = vpack.c.bf16 %v1718_v27, %v1714_v36  ;;  %v5357_v35 = vld [vmem:[#allocation12_spill] sm:$0xff]  ;;  %v5360_v36 = vld [vmem:[#allocation31_spill] sm:$0xff] }
 0x420   : > { %v1727_v7 = vmax.f32 %v1695_v46, 0.0  ;;  %v1671_v6 = vadd.f32 %v1591_v5, %v5357_v35  ;;  %v1702_v39 = vmax.f32 %v1670_v31, 0.0 }
 0x421   : > { %v1742_v11 = vpack.c.bf16 %v1726_v43, %v1722_v59  ;;  %v1627_v4 = vpop.f32.mrf.mxu2  ;;  %v1739_v46 = vpack.c.bf16 %v1719_v44, %v1715_v48  ;;  %v1667_v59 = vadd.f32 %v1589_v61, %v5359_v62  ;;  %v1707_v43 = vmax.f32 %v1675_v2, 0.0 }
 0x422   : > { %v1743_v16 = vpack.c.bf16 %v1727_v7, %v1723_v13  ;;  %v1656_v55 = vpop.f32.mrf.mxu3  ;;  %v1703_v9 = vmax.f32 %v1671_v6, 0.0  ;;  %v1730_v49 = vpack.c.bf16 %v1702_v39, %v1698_v8  ;;  %v1628_v41 = vadd.f32 %v1627_v4, %v4509_v42  ;;  %v5363_v4 = vld [vmem:[#allocation33_spill] sm:$0xff] }
 0x423   : > { %1823 = vmatpush.bf16.msrb.mxu0 %v1742_v11  ;;  %v1735_v7 = vpack.c.bf16 %v1711_v57, %v1707_v43  ;;  %v1699_v22 = vmax.f32 %v1667_v59, 0.0  ;;  %v4569_v11 = vld [vmem:[#allocation3 + $0x80] sm:$0xff]  ;;  %v1657_v48 = vadd.f32 %v1656_v55, %v4509_v42  ;;  %v1654_v42 = vadd.f32 %v4533_v50, %v4527_v19  ;;  %v5364_v55 = vld [vmem:[#allocation30_spill] sm:$0xff] }
 0x424   : > { %1852 = vmatpush.bf16.msrb.mxu1 %v1743_v16  ;;  %v3458_v59 = vld [vmem:[#allocation3 + $0x88] sm:$0xff]  ;;  %v1620_v39 = vadd.f32 %v4511_v29, %v4544_v58  ;;  %v1647_v29 = vadd.f32 %v4505_v33, %v4551_v45 }
 0x425   : > { %v1731_v27 = vpack.c.bf16 %v1703_v9, %v1699_v22 }
 0x427   : > { %1824 = vmatpush.bf16.msrb.mxu0 %v1738_v56  ;;  %v3729_v56 = vmov 5  }
 0x428   : > { %1853 = vmatpush.bf16.msrb.mxu1 %v1739_v46  ;;  %3549 = vset.pattern.permute.xlu1 %v3729_v56 }
 0x429   : > { %v1629_v18 = vpop.f32.mrf.mxu2  ;;  %3548 = vset.pattern.permute.xlu0 %v3729_v56  ;;  %1772 = vperm.xlu1 %3549, %v4304_v28   ;;  %v1652_v28 = vadd.f32 %v4519_v60, %v4521_v47  ;;  %v1618_v60 = vadd.f32 %v4503_v0, %v4551_v45  ;;  %v5370_v47 = vld [vmem:[#allocation21_spill] sm:$0xff]  ;;  %v5373_v0 = vld [vmem:[#allocation18_spill] sm:$0xff] }
 0x42a   : > { %v1658_v13 = vpop.f32.mrf.mxu3  ;;  %v1630_v16 = vadd.f32 %v1629_v18, %v4515_v25  ;;  %1784 = vperm.xlu0 %3548, %v4316_v1   ;;  %3547 = vset.pattern.permute.xlu2 %v3729_v56  ;;  %v5367_v1 = vld [vmem:[#allocation28_spill] sm:$0xff]  ;;  %v5368_v18 = vld [vmem:[#allocation25_spill] sm:$0xff] }
 0x42b   : > { %1825 = vmatpush.bf16.msrb.mxu0 %v1734_v30  ;;  %v1659_v63 = vadd.f32 %v1658_v13, %v4515_v25  ;;  %v5362_v25 = vld [vmem:[#allocation29_spill] sm:$0xff]  ;;  %1780 = vperm.xlu2 %3547, %v4326_v52   ;;  %v1649_v13 = vadd.f32 %v4513_v20, %v4544_v58 }
 0x42c   : > { %1854 = vmatpush.bf16.msrb.mxu1 %v1735_v7  ;;  %v1688_v35 = vadd.f32 %v1630_v16, %v5362_v25  ;;  %v5369_v7 = vld [vmem:[#allocation26_spill] sm:$0xff]  ;;  %v5372_v20 = vld [vmem:[#allocation17_spill] sm:$0xff]  ;;  %v3459_v25 = vld [vmem:[#allocation3 + $0x90] sm:$0xff] }
 0x42d   : > { %v1689_v57 = vadd.f32 %v1659_v63, %v5364_v55  ;;  %v1681_v8 = vadd.f32 %v1654_v42, %v5369_v7  ;;  %v1672_v58 = vadd.f32 %v1620_v39, %v5372_v20  ;;  %v1673_v63 = vadd.f32 %v1649_v13, %v5373_v0 }
 0x42e   : > { %v1720_v51 = vmax.f32 %v1688_v35, 0.0 }
 0x42f   : > { %1826 = vmatpush.bf16.msrb.mxu0 %v1730_v49  ;;  %v1721_v52 = vmax.f32 %v1689_v57, 0.0  ;;  %v1676_v49 = vadd.f32 %v1623_v53, %v5370_v47 }
 0x430   : > { %1855 = vmatpush.bf16.msrb.mxu1 %v1731_v27 }
 0x431   : > { %v1632_v5 = vpop.f32.mrf.mxu2  ;;  %1764 = vperm.xlu1 %3549, %v4342_v17   ;;  %v1708_v45 = vmax.f32 %v1676_v49, 0.0 }
 0x432   : > { %v1661_v26 = vpop.f32.mrf.mxu3  ;;  %3308 = vmatmul.msk.bf16.vlgmr.msrb.gmra.mxu0 %vm826_vm2, %v4569_v11  ;;  %v1633_v12 = vadd.f32 %v1632_v5, %v4507_v21  ;;  %v5371_v5 = vld [vmem:[#allocation22_spill] sm:$0xff]  ;;  %1756 = vperm.xlu0 %3548, %v4352_v32  }
 0x433   : > { %3312 = vmatmul.msk.bf16.vlgmr.msrb.gmra.mxu1 %vm826_vm2, %v4569_v11  ;;  %v1662_v44 = vadd.f32 %v1661_v26, %v4507_v21  ;;  %v1625_v21 = vadd.f32 %v4530_v37, %v4527_v19  ;;  %v5366_v37 = vld [vmem:[#allocation27_spill] sm:$0xff]  ;;  %v1685_v19 = vadd.f32 %v1657_v48, %v5367_v1  ;;  %v1677_v26 = vadd.f32 %v1652_v28, %v5371_v5 }
 0x434   : > { %v1692_v61 = vadd.f32 %v1633_v12, %v5360_v36  ;;  %v1684_v40 = vadd.f32 %v1628_v41, %v5366_v37  ;;  %v5374_v36 = vld [vmem:[#allocation13_spill] sm:$0xff]  ;;  %1776 = vperm.xlu2 %3547, %v4360_v3   ;;  %v1704_v48 = vmax.f32 %v1672_v58, 0.0  ;;  %v3460_v3 = vld [vmem:[#allocation3 + $0x98] sm:$0xff] }
 0x435   : > { %v1693_v31 = vadd.f32 %v1662_v44, %v5361_v10  ;;  %v1680_v30 = vadd.f32 %v1625_v21, %v5368_v18  ;;  %v1717_v12 = vmax.f32 %v1685_v19, 0.0  ;;  %v1668_v33 = vadd.f32 %v1618_v60, %v5374_v36 }
 0x436   : > { %v1724_v24 = vmax.f32 %v1692_v61, 0.0  ;;  %v1716_v27 = vmax.f32 %v1684_v40, 0.0  ;;  %v5375_v61 = vld [vmem:[#allocation14_spill] sm:$0xff] }
 0x437   : > { %v1725_v50 = vmax.f32 %v1693_v31, 0.0  ;;  %v1712_v44 = vmax.f32 %v1680_v30, 0.0  ;;  %v1741_v41 = vpack.c.bf16 %v1721_v52, %v1717_v12  ;;  %v1705_v31 = vmax.f32 %v1673_v63, 0.0 }
 0x438   : > { %v1740_v16 = vpack.c.bf16 %v1720_v51, %v1716_v27 }
 0x439   : > { %v1634_v14 = vpop.f32.mrf.mxu2  ;;  %v1736_v10 = vpack.c.bf16 %v1712_v44, %v1708_v45  ;;  %1760 = vperm.xlu1 %3549, %v4366_v15  }
 0x43a   : > { %v1635_v54 = vadd.f32 %v1634_v14, %v4523_v23  ;;  %v1663_v2 = vpop.f32.mrf.mxu3  ;;  %v1713_v14 = vmax.f32 %v1681_v8, 0.0 }
 0x43b   : > { %v1664_v38 = vadd.f32 %v1663_v2, %v4523_v23  ;;  %v5365_v23 = vld [vmem:[#allocation34_spill] sm:$0xff]  ;;  %v1709_v2 = vmax.f32 %v1677_v26, 0.0 }
 0x43c   : > { %v1696_v6 = vadd.f32 %v1635_v54, %v5363_v4  ;;  %v1669_v54 = vadd.f32 %v1647_v29, %v5375_v61  ;;  %1768 = vperm.xlu2 %3547, %v4374_v34  }
 0x43d   : > { %v1697_v46 = vadd.f32 %v1664_v38, %v5365_v23  ;;  %v1737_v17 = vpack.c.bf16 %v1713_v14, %v1709_v2  ;;  %v1700_v38 = vmax.f32 %v1668_v33, 0.0 }
 0x43e   : > { %v1728_v62 = vmax.f32 %v1696_v6, 0.0  ;;  %v1701_v32 = vmax.f32 %v1669_v54, 0.0 }
 0x43f   : > { %v1729_v43 = vmax.f32 %v1697_v46, 0.0  ;;  %v1732_v56 = vpack.c.bf16 %v1704_v48, %v1700_v38 }
 0x440   : > { %v1744_v9 = vpack.c.bf16 %v1728_v62, %v1724_v24  ;;  %v1733_v21 = vpack.c.bf16 %v1705_v31, %v1701_v32 }
 0x441   : > { %v1745_v22 = vpack.c.bf16 %v1729_v43, %v1725_v50 }
 0x442   : > { %1881 = vmatpush.bf16.msrb.mxu2 %v1744_v9  ;;  %3309 = vmatmul.msk.bf16.gmra.mxu0 %vm826_vm2, %v3458_v59 }
 0x443   : > { %1910 = vmatpush.bf16.msrb.mxu3 %v1745_v22  ;;  %3313 = vmatmul.msk.bf16.gmra.mxu1 %vm826_vm2, %v3458_v59 }
 0x446   : > { %1882 = vmatpush.bf16.msrb.mxu2 %v1740_v16 }
 0x447   : > { %1911 = vmatpush.bf16.msrb.mxu3 %v1741_v41 }
 0x44a   : > { %1883 = vmatpush.bf16.msrb.mxu2 %v1736_v10 }
 0x44b   : > { %1912 = vmatpush.bf16.msrb.mxu3 %v1737_v17 }
 0x44e   : > { %1884 = vmatpush.bf16.msrb.mxu2 %v1732_v56 }
 0x44f   : > { %1913 = vmatpush.bf16.msrb.mxu3 %v1733_v21 }
 0x451   : > { %3316 = vmatmul.msk.bf16.vlgmr.msrb.gmra.mxu2 %vm826_vm2, %v4569_v11 }
 0x452   : > { %3320 = vmatmul.msk.bf16.vlgmr.msrb.gmra.mxu3 %vm826_vm2, %v4569_v11  ;;  %3310 = vmatmul.msk.bf16.gmra.mxu0 %vm826_vm2, %v3459_v25 }
 0x453   : > { %3314 = vmatmul.msk.bf16.gmra.mxu1 %vm826_vm2, %v3459_v25 }
 0x461   : > { %3317 = vmatmul.msk.bf16.gmra.mxu2 %vm826_vm2, %v3458_v59 }
 0x462   : > { %3321 = vmatmul.msk.bf16.gmra.mxu3 %vm826_vm2, %v3458_v59  ;;  %3311 = vmatmul.msk.bf16.gmra.mxu0 %vm826_vm2, %v3460_v3 }
 0x463   : > { %3315 = vmatmul.msk.bf16.gmra.mxu1 %vm826_vm2, %v3460_v3 }
 0x471   : > { %3318 = vmatmul.msk.bf16.gmra.mxu2 %vm826_vm2, %v3459_v25 }
 0x472   : > { %3322 = vmatmul.msk.bf16.gmra.mxu3 %vm826_vm2, %v3459_v25 }
 0x481   : > { %3319 = vmatmul.msk.bf16.gmra.mxu2 %vm826_vm2, %v3460_v3 }
 0x482   : > { %3323 = vmatmul.msk.bf16.gmra.mxu3 %vm826_vm2, %v3460_v3 }
 0x485   : > { %v4647_v37 = vpop.permute.xlu2 %1780 }
 0x48e   : > { %v4655_v19 = vpop.permute.xlu2 %1776 }
 0x496   : > { %v4675_v12 = vpop.permute.xlu2 %1768 }
 0x49b   : > { %v4649_v62 = vpop.permute.xlu1 %1772 }
 0x49c   : > { %v4660_v18 = vpop.permute.xlu0 %1784 }
 0x4a3   : > { %v4665_v9 = vpop.permute.xlu1 %1764 }
 0x4a4   : > { %v4685_v17 = vpop.permute.xlu0 %1756 }
 0x4ab   : > { %v4683_v31 = vpop.permute.xlu1 %1760 }
 0x4af   : > { %v4639_v15 = vpop.f32.mrf.mxu0 }
 0x4b0   : > { %v4641_v34 = vpop.f32.mrf.mxu1  ;;  %v1829_v21 = vadd.f32 %v4639_v15, %v4685_v17  ;;  %v4693_v15 = vld [vmem:[#allocation3 + $0xa0] sm:$0xff] }
 0x4b1   : > { %v1858_v3 = vadd.f32 %v4641_v34, %v4685_v17 }
 0x4b7   : > { %v1830_v11 = vpop.f32.mrf.mxu0 }
 0x4b8   : > { %v1859_v35 = vpop.f32.mrf.mxu1  ;;  %v1831_v56 = vadd.f32 %v1830_v11, %v4683_v31 }
 0x4b9   : > { %v1860_v25 = vadd.f32 %v1859_v35, %v4683_v31 }
 0x4bf   : > { %v1833_v4 = vpop.f32.mrf.mxu0 }
 0x4c0   : > { %v1862_v6 = vpop.f32.mrf.mxu1  ;;  %v1834_v5 = vadd.f32 %v1833_v4, %v4665_v9 }
 0x4c1   : > { %v1863_v26 = vadd.f32 %v1862_v6, %v4665_v9 }
 0x4c2   : > { %v1943_v2 = vmax.f32 %v1834_v5, 0.0 }
 0x4c3   : > { %v1944_v38 = vmax.f32 %v1863_v26, 0.0 }
 0x4c7   : > { %v1835_v42 = vpop.f32.mrf.mxu0 }
 0x4c8   : > { %v1864_v55 = vpop.f32.mrf.mxu1  ;;  %v1836_v58 = vadd.f32 %v1835_v42, %v4675_v12 }
 0x4c9   : > { %v1865_v63 = vadd.f32 %v1864_v55, %v4675_v12  ;;  %v1935_v55 = vmax.f32 %v1829_v21, 0.0  ;;  %v3463_v21 = vld [vmem:[#allocation3 + $0xb0] sm:$0xff] }
 0x4ca   : > { %v1947_v48 = vmax.f32 %v1836_v58, 0.0 }
 0x4cb   : > { %v1948_v32 = vmax.f32 %v1865_v63, 0.0 }
 0x4cc   : > { %v1971_v4 = vpack.c.bf16 %v1947_v48, %v1943_v2 }
 0x4cd   : > { %v1972_v6 = vpack.c.bf16 %v1948_v32, %v1944_v38 }
 0x4cf   : > { %v1838_v57 = vpop.f32.mrf.mxu0 }
 0x4d0   : > { %v1867_v23 = vpop.f32.mrf.mxu1  ;;  %v1839_v13 = vadd.f32 %v1838_v57, %v4649_v62  ;;  %v1939_v57 = vmax.f32 %v1831_v56, 0.0 }
 0x4d1   : > { %v1868_v8 = vadd.f32 %v1867_v23, %v4649_v62 }
 0x4d2   : > { %v1951_v44 = vmax.f32 %v1839_v13, 0.0  ;;  %v1967_v11 = vpack.c.bf16 %v1939_v57, %v1935_v55  ;;  %v4767_v55 = vld [vmem:[%s5313_s2 + $0x18] sm:$0xff] }
 0x4d3   : > { %v1952_v14 = vmax.f32 %v1868_v8, 0.0  ;;  %v3464_v57 = vld [vmem:[#allocation3 + $0xb8] sm:$0xff] }
 0x4d4   : > { %v4643_v46 = vpop.f32.mrf.mxu2 }
 0x4d5   : > { %v4645_v53 = vpop.f32.mrf.mxu3 }
 0x4d6   : > { %v1916_v32 = vadd.f32 %v4645_v53, %v4685_v17  ;;  %v4760_v53 = vld [vmem:[%s5313_s2 + $0x8] sm:$0xff] }
 0x4d7   : > { %v1840_v40 = vpop.f32.mrf.mxu0 }
 0x4d8   : > { %v1869_v24 = vpop.f32.mrf.mxu1  ;;  %v1841_v7 = vadd.f32 %v1840_v40, %v4655_v19  ;;  %v1936_v40 = vmax.f32 %v1858_v3, 0.0 }
 0x4d9   : > { %v1870_v52 = vadd.f32 %v1869_v24, %v4655_v19  ;;  %v1940_v24 = vmax.f32 %v1860_v25, 0.0 }
 0x4da   : > { %v1955_v16 = vmax.f32 %v1841_v7, 0.0 }
 0x4db   : > { %v1956_v41 = vmax.f32 %v1870_v52, 0.0  ;;  %v3730_v52 = vmov 6  }
 0x4dc   : > { %v4651_v59 = vpop.f32.mrf.mxu2  ;;  %v1975_v54 = vpack.c.bf16 %v1955_v16, %v1951_v44  ;;  %3552 = vset.pattern.permute.xlu1 %v3730_v52  ;;  %3551 = vset.pattern.permute.xlu0 %v3730_v52 }
 0x4dd   : > { %v4653_v28 = vpop.f32.mrf.mxu3  ;;  %v1976_v10 = vpack.c.bf16 %v1956_v41, %v1952_v14  ;;  %3550 = vset.pattern.permute.xlu2 %v3730_v52 }
 0x4df   : > { %v1843_v1 = vpop.f32.mrf.mxu0 }
 0x4e0   : > { %v1872_v50 = vpop.f32.mrf.mxu1  ;;  %v1844_v43 = vadd.f32 %v1843_v1, %v4647_v37  ;;  %v1968_v1 = vpack.c.bf16 %v1940_v24, %v1936_v40 }
 0x4e1   : > { %v1873_v30 = vadd.f32 %v1872_v50, %v4647_v37 }
 0x4e2   : > { %v1959_v60 = vmax.f32 %v1844_v43, 0.0 }
 0x4e3   : > { %v1960_v27 = vmax.f32 %v1873_v30, 0.0  ;;  %v4699_v30 = vld [vmem:[#allocation3 + $0xa8] sm:$0xff] }
 0x4e4   : > { %v4658_v39 = vpop.f32.mrf.mxu2 }
 0x4e5   : > { %v4663_v51 = vpop.f32.mrf.mxu3 }
 0x4e7   : > { %v1845_v22 = vpop.f32.mrf.mxu0 }
 0x4e8   : > { %v1846_v47 = vadd.f32 %v1845_v22, %v4660_v18  ;;  %v1874_v49 = vpop.f32.mrf.mxu1 }
 0x4e9   : > { %v1875_v29 = vadd.f32 %v1874_v49, %v4660_v18  ;;  %v4710_v49 = vld [vmem:[%s5313_s2 + $0x20] sm:$0xff] }
 0x4ea   : > { %v1963_v20 = vmax.f32 %v1846_v47, 0.0  ;;  %2009 = vperm.xlu1 %3552, %v4710_v49  }
 0x4eb   : > { %v1964_v0 = vmax.f32 %v1875_v29, 0.0  ;;  %v3616_v29 = vld [vmem:[%s5313_s2 + $0x38] sm:$0xff] }
 0x4ec   : > { %v1979_v36 = vpack.c.bf16 %v1963_v20, %v1959_v60  ;;  %v4679_v33 = vpop.f32.mrf.mxu2  ;;  %2021 = vperm.xlu0 %3551, %v3616_v29  }
 0x4ed   : > { %v1980_v45 = vpack.c.bf16 %v1964_v0, %v1960_v27  ;;  %v4681_v61 = vpop.f32.mrf.mxu3 }
 0x4ee   : > { %2060 = vmatpush.bf16.msra.mxu0 %v1979_v36  ;;  %v1923_v14 = vadd.f32 %v4681_v61, %v4675_v12 }
 0x4ef   : > { %2089 = vmatpush.bf16.msra.mxu1 %v1980_v45 }
 0x4f0   : > { %v1950_v38 = vmax.f32 %v1923_v14, 0.0 }
 0x4f2   : > { %2061 = vmatpush.bf16.msra.mxu0 %v1975_v54  ;;  %v1921_v54 = vadd.f32 %v4663_v51, %v4665_v9  ;;  %v4746_v51 = vld [vmem:[%s5313_s2] sm:$0xff] }
 0x4f3   : > { %2090 = vmatpush.bf16.msra.mxu1 %v1976_v10 }
 0x4f4   : > { %v1896_v42 = vpop.f32.mrf.mxu2  ;;  %1993 = vperm.xlu0 %3551, %v4746_v51   ;;  %v1946_v56 = vmax.f32 %v1921_v54, 0.0 }
 0x4f5   : > { %v1925_v23 = vpop.f32.mrf.mxu3  ;;  %v1897_v5 = vadd.f32 %v1896_v42, %v4649_v62 }
 0x4f6   : > { %2062 = vmatpush.bf16.msra.mxu0 %v1971_v4  ;;  %v1926_v58 = vadd.f32 %v1925_v23, %v4649_v62  ;;  %v1892_v62 = vadd.f32 %v4658_v39, %v4665_v9  ;;  %v1918_v39 = vadd.f32 %v4653_v28, %v4683_v31  ;;  %v3620_v28 = vld [vmem:[%s5313_s2 + $0x28] sm:$0xff]  ;;  %v1974_v3 = vpack.c.bf16 %v1950_v38, %v1946_v56 }
 0x4f7   : > { %2091 = vmatpush.bf16.msra.mxu1 %v1972_v6  ;;  %v1953_v45 = vmax.f32 %v1897_v5, 0.0 }
 0x4f8   : > { %v1954_v2 = vmax.f32 %v1926_v58, 0.0  ;;  %v1945_v9 = vmax.f32 %v1892_v62, 0.0  ;;  %v1942_v4 = vmax.f32 %v1918_v39, 0.0 }
 0x4fa   : > { %2063 = vmatpush.bf16.msra.mxu0 %v1967_v11 }
 0x4fb   : > { %2092 = vmatpush.bf16.msra.mxu1 %v1968_v1 }
 0x4fc   : > { %v1898_v35 = vpop.f32.mrf.mxu2 }
 0x4fd   : > { %v1927_v34 = vpop.f32.mrf.mxu3  ;;  %3340 = vmatmul.msk.bf16.vlgmr.msra.gmra.mxu0 %vm826_vm2, %v4693_v15  ;;  %v1899_v22 = vadd.f32 %v1898_v35, %v4655_v19 }
 0x4fe   : > { %3344 = vmatmul.msk.bf16.vlgmr.msra.gmra.mxu1 %vm826_vm2, %v4693_v15 }
 0x4ff   : > { %v1957_v0 = vmax.f32 %v1899_v22, 0.0 }
 0x501   : > { %v1977_v48 = vpack.c.bf16 %v1957_v0, %v1953_v45 }
 0x504   : > { %v1901_v50 = vpop.f32.mrf.mxu2 }
 0x505   : > { %v1930_v43 = vpop.f32.mrf.mxu3  ;;  %v1902_v13 = vadd.f32 %v1901_v50, %v4647_v37 }
 0x506   : > { %v1931_v7 = vadd.f32 %v1930_v43, %v4647_v37  ;;  %v1928_v37 = vadd.f32 %v1927_v34, %v4655_v19  ;;  %v3617_v19 = vld [vmem:[%s5313_s2 + $0x30] sm:$0xff] }
 0x507   : > { %v1961_v26 = vmax.f32 %v1902_v13, 0.0  ;;  %2017 = vperm.xlu2 %3550, %v3617_v19  }
 0x508   : > { %v1962_v44 = vmax.f32 %v1931_v7, 0.0  ;;  %v1958_v41 = vmax.f32 %v1928_v37, 0.0 }
 0x50a   : > { %v1978_v61 = vpack.c.bf16 %v1958_v41, %v1954_v2 }
 0x50c   : > { %v1903_v8 = vpop.f32.mrf.mxu2 }
 0x50d   : > { %v1904_v60 = vadd.f32 %v1903_v8, %v4660_v18  ;;  %v1932_v47 = vpop.f32.mrf.mxu3  ;;  %3341 = vmatmul.msk.bf16.gmra.mxu0 %vm826_vm2, %v4699_v30 }
 0x50e   : > { %v1933_v27 = vadd.f32 %v1932_v47, %v4660_v18  ;;  %3345 = vmatmul.msk.bf16.gmra.mxu1 %vm826_vm2, %v4699_v30  ;;  %v1894_v18 = vadd.f32 %v4679_v33, %v4675_v12  ;;  %v1889_v33 = vadd.f32 %v4651_v59, %v4683_v31  ;;  %v4738_v12 = vld [vmem:[%s5313_s2 + $0x10] sm:$0xff]  ;;  %v1887_v59 = vadd.f32 %v4643_v46, %v4685_v17 }
 0x50f   : > { %v1965_v20 = vmax.f32 %v1904_v60, 0.0  ;;  %2001 = vperm.xlu1 %3552, %v4738_v12   ;;  %2013 = vperm.xlu2 %3550, %v3620_v28   ;;  %v1938_v46 = vmax.f32 %v1916_v32, 0.0 }
 0x510   : > { %v1966_v16 = vmax.f32 %v1933_v27, 0.0  ;;  %v1949_v10 = vmax.f32 %v1894_v18, 0.0  ;;  %v1941_v25 = vmax.f32 %v1889_v33, 0.0  ;;  %v1937_v6 = vmax.f32 %v1887_v59, 0.0 }
 0x511   : > { %v1981_v63 = vpack.c.bf16 %v1965_v20, %v1961_v26  ;;  %v1970_v17 = vpack.c.bf16 %v1942_v4, %v1938_v46 }
 0x512   : > { %v1982_v36 = vpack.c.bf16 %v1966_v16, %v1962_v44  ;;  %v1973_v31 = vpack.c.bf16 %v1949_v10, %v1945_v9  ;;  %v1969_v42 = vpack.c.bf16 %v1941_v25, %v1937_v6 }
 0x513   : > { %2118 = vmatpush.bf16.msra.mxu2 %v1981_v63 }
 0x514   : > { %2147 = vmatpush.bf16.msra.mxu3 %v1982_v36 }
 0x517   : > { %2119 = vmatpush.bf16.msra.mxu2 %v1977_v48  ;;  %1997 = vperm.xlu1 %3552, %v4760_v53  }
 0x518   : > { %2148 = vmatpush.bf16.msra.mxu3 %v1978_v61  ;;  %2005 = vperm.xlu2 %3550, %v4767_v55  }
 0x51b   : > { %2120 = vmatpush.bf16.msra.mxu2 %v1973_v31 }
 0x51c   : > { %2149 = vmatpush.bf16.msra.mxu3 %v1974_v3 }
 0x51d   : > { %3342 = vmatmul.msk.bf16.gmra.mxu0 %vm826_vm2, %v3463_v21 }
 0x51e   : > { %3346 = vmatmul.msk.bf16.gmra.mxu1 %vm826_vm2, %v3463_v21 }
 0x51f   : > { %2121 = vmatpush.bf16.msra.mxu2 %v1969_v42 }
 0x520   : > { %2150 = vmatpush.bf16.msra.mxu3 %v1970_v17 }
 0x522   : > { %3348 = vmatmul.msk.bf16.vlgmr.msra.gmra.mxu2 %vm826_vm2, %v4693_v15 }
 0x523   : > { %3352 = vmatmul.msk.bf16.vlgmr.msra.gmra.mxu3 %vm826_vm2, %v4693_v15 }
 0x52d   : > { %3343 = vmatmul.msk.bf16.gmra.mxu0 %vm826_vm2, %v3464_v57 }
 0x52e   : > { %3347 = vmatmul.msk.bf16.gmra.mxu1 %vm826_vm2, %v3464_v57 }
 0x532   : > { %3349 = vmatmul.msk.bf16.gmra.mxu2 %vm826_vm2, %v4699_v30 }
 0x533   : > { %3353 = vmatmul.msk.bf16.gmra.mxu3 %vm826_vm2, %v4699_v30 }
 0x542   : > { %3350 = vmatmul.msk.bf16.gmra.mxu2 %vm826_vm2, %v3463_v21 }
 0x543   : > { %3354 = vmatmul.msk.bf16.gmra.mxu3 %vm826_vm2, %v3463_v21 }
 0x552   : > { %3351 = vmatmul.msk.bf16.gmra.mxu2 %vm826_vm2, %v3464_v57 }
 0x553   : > { %3355 = vmatmul.msk.bf16.gmra.mxu3 %vm826_vm2, %v3464_v57 }
 0x55c   : > { %v4790_v22 = vpop.permute.xlu1 %2009 }
 0x55e   : > { %v4800_v20 = vpop.permute.xlu0 %2021 }
 0x561   : > { %v4784_v13 = vpop.permute.xlu2 %2017 }
 0x566   : > { %v4822_v46 = vpop.permute.xlu0 %1993 }
 0x569   : > { %v4792_v60 = vpop.permute.xlu2 %2013 }
 0x572   : > { %v4808_v63 = vpop.permute.xlu2 %2005 }
 0x57a   : > { %v2065_v23 = vpop.f32.mrf.mxu0 }
 0x57b   : > { %v2094_v40 = vpop.f32.mrf.mxu1 }
 0x581   : > { %v4802_v58 = vpop.permute.xlu1 %2001 }
 0x582   : > { %v2067_v24 = vpop.f32.mrf.mxu0 }
 0x583   : > { %v2096_v11 = vpop.f32.mrf.mxu1 }
 0x589   : > { %v4820_v6 = vpop.permute.xlu1 %1997 }
 0x58a   : > { %v2070_v1 = vpop.f32.mrf.mxu0  ;;  %v2068_v57 = vadd.f32 %v2067_v24, %v4820_v6 }
 0x58b   : > { %v2099_v15 = vpop.f32.mrf.mxu1  ;;  %v2071_v54 = vadd.f32 %v2070_v1, %v4802_v58  ;;  %v2066_v1 = vadd.f32 %v2065_v23, %v4822_v46 }
 0x58c   : > { %v2100_v2 = vadd.f32 %v2099_v15, %v4802_v58  ;;  %v2097_v15 = vadd.f32 %v2096_v11, %v4820_v6 }
 0x58d   : > { %v2180_v25 = vmax.f32 %v2071_v54, 0.0 }
 0x58e   : > { %v2181_v42 = vmax.f32 %v2100_v2, 0.0 }
 0x592   : > { %v2072_v35 = vpop.f32.mrf.mxu0 }
 0x593   : > { %v2101_v34 = vpop.f32.mrf.mxu1  ;;  %v2073_v10 = vadd.f32 %v2072_v35, %v4808_v63  ;;  %v2095_v35 = vadd.f32 %v2094_v40, %v4822_v46  ;;  %v3731_v40 = vmov 7  }
 0x594   : > { %v2102_v9 = vadd.f32 %v2101_v34, %v4808_v63  ;;  %3554 = vset.pattern.permute.xlu0 %v3731_v40  ;;  %3555 = vset.pattern.permute.xlu1 %v3731_v40 }
 0x595   : > { %v2184_v3 = vmax.f32 %v2073_v10, 0.0  ;;  %2242 = vperm.xlu0 %3554, %v4767_v55   ;;  %2230 = vperm.xlu1 %3555, %v4746_v51  }
 0x596   : > { %v2185_v17 = vmax.f32 %v2102_v9, 0.0  ;;  %3553 = vset.pattern.permute.xlu2 %v3731_v40 }
 0x597   : > { %2238 = vperm.xlu2 %3553, %v4738_v12  }
 0x59a   : > { %v2075_v50 = vpop.f32.mrf.mxu0 }
 0x59b   : > { %v2104_v43 = vpop.f32.mrf.mxu1  ;;  %v2076_v44 = vadd.f32 %v2075_v50, %v4790_v22  ;;  %v2208_v50 = vpack.c.bf16 %v2184_v3, %v2180_v25 }
 0x59c   : > { %v2105_v19 = vadd.f32 %v2104_v43, %v4790_v22 }
 0x59d   : > { %v2188_v39 = vmax.f32 %v2076_v44, 0.0  ;;  %v4828_v44 = vld [vmem:[#allocation3 + $0xc0] sm:$0xff]  ;;  %2246 = vperm.xlu1 %3555, %v4710_v49  }
 0x59e   : > { %v2189_v32 = vmax.f32 %v2105_v19, 0.0 }
 0x59f   : > { %2234 = vperm.xlu2 %3553, %v4760_v53  }
 0x5a2   : > { %v2077_v30 = vpop.f32.mrf.mxu0 }
 0x5a3   : > { %v2106_v7 = vpop.f32.mrf.mxu1  ;;  %v2078_v16 = vadd.f32 %v2077_v30, %v4792_v60  ;;  %v2209_v30 = vpack.c.bf16 %v2185_v17, %v2181_v42 }
 0x5a4   : > { %v2107_v18 = vadd.f32 %v2106_v7, %v4792_v60  ;;  %v2172_v7 = vmax.f32 %v2066_v1, 0.0 }
 0x5a5   : > { %v4786_v8 = vpop.f32.mrf.mxu2  ;;  %v2192_v61 = vmax.f32 %v2078_v16, 0.0 }
 0x5a6   : > { %v4788_v52 = vpop.f32.mrf.mxu3  ;;  %v2193_v56 = vmax.f32 %v2107_v18, 0.0  ;;  %v5376_v18 = vmov 0  }
 0x5a7   : > { %v2212_v21 = vpack.c.bf16 %v2192_v61, %v2188_v39  ;;  %3557 = vset.pattern.permute.xlu0 %v5376_v18  ;;  %3558 = vset.pattern.permute.xlu1 %v5376_v18 }
 0x5a8   : > { %v2213_v4 = vpack.c.bf16 %v2193_v56, %v2189_v32  ;;  %3556 = vset.pattern.permute.xlu2 %v5376_v18 }
 0x5aa   : > { %v2080_v47 = vpop.f32.mrf.mxu0 }
 0x5ab   : > { %v2109_v37 = vpop.f32.mrf.mxu1  ;;  %v2081_v5 = vadd.f32 %v2080_v47, %v4784_v13  ;;  %v2176_v47 = vmax.f32 %v2068_v57, 0.0 }
 0x5ac   : > { %v2110_v26 = vadd.f32 %v2109_v37, %v4784_v13  ;;  %v2173_v37 = vmax.f32 %v2095_v35, 0.0 }
 0x5ad   : > { %v4794_v27 = vpop.f32.mrf.mxu2  ;;  %v2196_v14 = vmax.f32 %v2081_v5, 0.0  ;;  %v2177_v5 = vmax.f32 %v2097_v15, 0.0 }
 0x5ae   : > { %v4796_v29 = vpop.f32.mrf.mxu3  ;;  %v2197_v62 = vmax.f32 %v2110_v26, 0.0  ;;  %v2204_v26 = vpack.c.bf16 %v2176_v47, %v2172_v7  ;;  %v2126_v25 = vadd.f32 %v4794_v27, %v4820_v6 }
 0x5af   : > { %v2205_v24 = vpack.c.bf16 %v2177_v5, %v2173_v37 }
 0x5b0   : > { %v2178_v1 = vmax.f32 %v2126_v25, 0.0  ;;  %v4908_v25 = vld [vmem:[%s5315_s4] sm:$0xff] }
 0x5b2   : > { %v2082_v0 = vpop.f32.mrf.mxu0 }
 0x5b3   : > { %v2083_v41 = vadd.f32 %v2082_v0, %v4800_v20  ;;  %v2111_v36 = vpop.f32.mrf.mxu1  ;;  %v4839_v0 = vld [vmem:[#allocation3 + $0xc8] sm:$0xff] }
 0x5b4   : > { %v2112_v45 = vadd.f32 %v2111_v36, %v4800_v20 }
 0x5b5   : > { %v2200_v33 = vmax.f32 %v2083_v41, 0.0  ;;  %v4814_v48 = vpop.f32.mrf.mxu2 }
 0x5b6   : > { %v2201_v38 = vmax.f32 %v2112_v45, 0.0  ;;  %v4817_v59 = vpop.f32.mrf.mxu3 }
 0x5b7   : > { %v2216_v28 = vpack.c.bf16 %v2200_v33, %v2196_v14 }
 0x5b8   : > { %v2217_v31 = vpack.c.bf16 %v2201_v38, %v2197_v62 }
 0x5b9   : > { %2294 = vmatpush.bf16.msrb.mxu0 %v2216_v28 }
 0x5ba   : > { %2320 = vmatpush.bf16.msrb.mxu1 %v2217_v31  ;;  %v2158_v31 = vadd.f32 %v4817_v59, %v4802_v58 }
 0x5bc   : > { %v2183_v57 = vmax.f32 %v2158_v31, 0.0 }
 0x5bd   : > { %v2130_v34 = vpop.f32.mrf.mxu2  ;;  %2295 = vmatpush.bf16.msrb.mxu0 %v2212_v21 }
 0x5be   : > { %v2159_v43 = vpop.f32.mrf.mxu3  ;;  %2321 = vmatpush.bf16.msrb.mxu1 %v2213_v4  ;;  %v2131_v61 = vadd.f32 %v2130_v34, %v4808_v63 }
 0x5bf   : > { %v2160_v32 = vadd.f32 %v2159_v43, %v4808_v63  ;;  %v2155_v63 = vadd.f32 %v4796_v29, %v4820_v6 }
 0x5c1   : > { %2296 = vmatpush.bf16.msrb.mxu0 %v2208_v50  ;;  %v2187_v4 = vmax.f32 %v2160_v32, 0.0  ;;  %v2179_v27 = vmax.f32 %v2155_v63, 0.0 }
 0x5c2   : > { %2322 = vmatpush.bf16.msrb.mxu1 %v2209_v30 }
 0x5c3   : > { %v2211_v15 = vpack.c.bf16 %v2187_v4, %v2183_v57  ;;  %v2432_v4 = vld [vmem:[%s5316_s5] sm:$0xff] }
 0x5c4   : > { %2438 = vperm.xlu2 %3556, %v2432_v4   ;;  %v2435_v4 = vld [vmem:[%s5316_s5 + $0x18] sm:$0x1] }
 0x5c5   : > { %v2133_v23 = vpop.f32.mrf.mxu2  ;;  %2297 = vmatpush.bf16.msrb.mxu0 %v2204_v26 }
 0x5c6   : > { %v2162_v11 = vpop.f32.mrf.mxu3  ;;  %2323 = vmatpush.bf16.msrb.mxu1 %v2205_v24  ;;  %v2134_v54 = vadd.f32 %v2133_v23, %v4790_v22 }
 0x5c7   : > { %v2163_v10 = vadd.f32 %v2162_v11, %v4790_v22  ;;  %v2186_v22 = vmax.f32 %v2131_v61, 0.0 }
 0x5c8   : > { %3372 = vmatmul.msk.bf16.vlgmr.msrb.gmra.mxu0 %vm826_vm2, %v4828_v44 }
 0x5c9   : > { %3376 = vmatmul.msk.bf16.vlgmr.msrb.gmra.mxu1 %vm826_vm2, %v4828_v44  ;;  %v2191_v21 = vmax.f32 %v2163_v10, 0.0 }
 0x5cc   : > { %2453 = vperm.xlu2 %3556, %v2435_v4  }
 0x5cd   : > { %v2135_v16 = vpop.f32.mrf.mxu2 }
 0x5ce   : > { %v2164_v19 = vpop.f32.mrf.mxu3  ;;  %v2136_v55 = vadd.f32 %v2135_v16, %v4792_v60 }
 0x5cf   : > { %v2165_v62 = vadd.f32 %v2164_v19, %v4792_v60  ;;  %v2129_v60 = vadd.f32 %v4814_v48, %v4802_v58  ;;  %v2124_v48 = vadd.f32 %v4786_v8, %v4822_v46  ;;  %v2153_v58 = vadd.f32 %v4788_v52, %v4822_v46  ;;  %v3467_v8 = vld [vmem:[#allocation3 + $0xd0] sm:$0xff]  ;;  %v3468_v52 = vld [vmem:[#allocation3 + $0xd8] sm:$0xff] }
 0x5d0   : > { %v2194_v38 = vmax.f32 %v2136_v55, 0.0 }
 0x5d1   : > { %v2195_v56 = vmax.f32 %v2165_v62, 0.0  ;;  %v2182_v17 = vmax.f32 %v2129_v60, 0.0  ;;  %v2174_v35 = vmax.f32 %v2124_v48, 0.0  ;;  %v2175_v34 = vmax.f32 %v2153_v58, 0.0 }
 0x5d3   : > { %v2215_v42 = vpack.c.bf16 %v2195_v56, %v2191_v21  ;;  %v2210_v59 = vpack.c.bf16 %v2186_v22, %v2182_v17  ;;  %v2206_v29 = vpack.c.bf16 %v2178_v1, %v2174_v35  ;;  %v2207_v6 = vpack.c.bf16 %v2179_v27, %v2175_v34  ;;  %v3394_v27 = vld [vmem:[%s5315_s4 + $0x8] sm:$0xf]  ;;  %v3470_v35 = vld [vmem:[%s5315_s4 + $0x8] sm:$0x10] }
 0x5d5   : > { %v2138_v14 = vpop.f32.mrf.mxu2 }
 0x5d6   : > { %v2167_v41 = vpop.f32.mrf.mxu3  ;;  %v2139_v12 = vadd.f32 %v2138_v14, %v4784_v13 }
 0x5d7   : > { %v2168_v49 = vadd.f32 %v2167_v41, %v4784_v13 }
 0x5d8   : > { %3373 = vmatmul.msk.bf16.gmra.mxu0 %vm826_vm2, %v4839_v0  ;;  %v2198_v2 = vmax.f32 %v2139_v12, 0.0 }
 0x5d9   : > { %3377 = vmatmul.msk.bf16.gmra.mxu1 %vm826_vm2, %v4839_v0  ;;  %v2199_v39 = vmax.f32 %v2168_v49, 0.0 }
 0x5dd   : > { %v2140_v51 = vpop.f32.mrf.mxu2 }
 0x5de   : > { %v2141_v53 = vadd.f32 %v2140_v51, %v4800_v20  ;;  %v2169_v36 = vpop.f32.mrf.mxu3 }
 0x5df   : > { %v2170_v45 = vadd.f32 %v2169_v36, %v4800_v20  ;;  %v2190_v20 = vmax.f32 %v2134_v54, 0.0 }
 0x5e0   : > { %v2202_v33 = vmax.f32 %v2141_v53, 0.0 }
 0x5e1   : > { %v2203_v13 = vmax.f32 %v2170_v45, 0.0  ;;  %v2214_v3 = vpack.c.bf16 %v2194_v38, %v2190_v20 }
 0x5e2   : > { %v2218_v9 = vpack.c.bf16 %v2202_v33, %v2198_v2 }
 0x5e3   : > { %v2219_v28 = vpack.c.bf16 %v2203_v13, %v2199_v39 }
 0x5e4   : > { %2346 = vmatpush.bf16.msrb.mxu2 %v2218_v9  ;;  %v2433_v9 = vld [vmem:[%s5316_s5 + $0x8] sm:$0xff] }
 0x5e5   : > { %2372 = vmatpush.bf16.msrb.mxu3 %v2219_v28  ;;  %2443 = vperm.xlu0 %3557, %v2433_v9  }
 0x5e8   : > { %2347 = vmatpush.bf16.msrb.mxu2 %v2214_v3  ;;  %3374 = vmatmul.msk.bf16.gmra.mxu0 %vm826_vm2, %v3467_v8  ;;  %v2434_v3 = vld [vmem:[%s5316_s5 + $0x10] sm:$0xff] }
 0x5e9   : > { %2373 = vmatpush.bf16.msrb.mxu3 %v2215_v42  ;;  %3378 = vmatmul.msk.bf16.gmra.mxu1 %vm826_vm2, %v3467_v8 }
 0x5ea   : > { %2448 = vperm.xlu1 %3558, %v2434_v3  }
 0x5ec   : > { %2348 = vmatpush.bf16.msrb.mxu2 %v2210_v59 }
 0x5ed   : > { %2374 = vmatpush.bf16.msrb.mxu3 %v2211_v15 }
 0x5f0   : > { %2349 = vmatpush.bf16.msrb.mxu2 %v2206_v29  ;;  %v3395_v29 = vor.u32 %v3470_v35, %v3394_v27 }
 0x5f1   : > { %2375 = vmatpush.bf16.msrb.mxu3 %v2207_v6  ;;  %v4886_v43 = vpop.permute.xlu2 %2238 }
 0x5f3   : > { %3380 = vmatmul.msk.bf16.vlgmr.msrb.gmra.mxu2 %vm826_vm2, %v4828_v44 }
 0x5f4   : > { %3384 = vmatmul.msk.bf16.vlgmr.msrb.gmra.mxu3 %vm826_vm2, %v4828_v44 }
 0x5f8   : > { %3375 = vmatmul.msk.bf16.gmra.mxu0 %vm826_vm2, %v3468_v52 }
 0x5f9   : > { %3379 = vmatmul.msk.bf16.gmra.mxu1 %vm826_vm2, %v3468_v52  ;;  %v4890_v26 = vpop.permute.xlu2 %2234 }
 0x603   : > { %3381 = vmatmul.msk.bf16.gmra.mxu2 %vm826_vm2, %v4839_v0 }
 0x604   : > { %3385 = vmatmul.msk.bf16.gmra.mxu3 %vm826_vm2, %v4839_v0 }
 0x607   : > { %v4888_v37 = vpop.permute.xlu1 %2230  ;;  %v4898_v0 = vpop.permute.xlu0 %2242 }
 0x60f   : > { %v2247_v17 = vpop.permute.xlu1 %2246 }
 0x613   : > { %3382 = vmatmul.msk.bf16.gmra.mxu2 %vm826_vm2, %v3467_v8 }
 0x614   : > { %3386 = vmatmul.msk.bf16.gmra.mxu3 %vm826_vm2, %v3467_v8 }
 0x623   : > { %3383 = vmatmul.msk.bf16.gmra.mxu2 %vm826_vm2, %v3468_v52 }
 0x624   : > { %3387 = vmatmul.msk.bf16.gmra.mxu3 %vm826_vm2, %v3468_v52 }
 0x645   : > { %v2299_v46 = vpop.f32.mrf.mxu0 }
 0x646   : > { %v2325_v50 = vpop.f32.mrf.mxu1  ;;  %v2300_v23 = vadd.f32 %v2299_v46, %v4888_v37 }
 0x647   : > { %v2326_v11 = vadd.f32 %v2325_v50, %v4888_v37 }
 0x648   : > { %v2394_v14 = vmax.f32 %v2300_v23, 0.0 }
 0x649   : > { %v2395_v41 = vmax.f32 %v2326_v11, 0.0 }
 0x64b   : > { %v2414_v54 = vpack.c.bf16 %v2395_v41, %v2394_v14 }
 0x64d   : > { %v2301_v30 = vpop.f32.mrf.mxu0  ;;  %v2474_v61 = vunpack.c.l.b16 %v2414_v54  ;;  %v2475_v38 = vunpack.c.h.b16 %v2414_v54 }
 0x64e   : > { %v2327_v7 = vpop.f32.mrf.mxu1  ;;  %v2302_v40 = vadd.f32 %v2301_v30, %v4890_v26 }
 0x64f   : > { %v2328_v16 = vadd.f32 %v2327_v7, %v4890_v26 }
 0x650   : > { %v2398_v49 = vmax.f32 %v2302_v40, 0.0 }
 0x651   : > { %v2399_v51 = vmax.f32 %v2328_v16, 0.0 }
 0x653   : > { %v2416_v33 = vpack.c.bf16 %v2399_v51, %v2398_v49 }
 0x655   : > { %v2304_v47 = vpop.f32.mrf.mxu0  ;;  %v2478_v28 = vunpack.c.l.b16 %v2416_v33  ;;  %v2479_v60 = vunpack.c.h.b16 %v2416_v33 }
 0x656   : > { %v2330_v5 = vpop.f32.mrf.mxu1  ;;  %v2305_v24 = vadd.f32 %v2304_v47, %v4886_v43 }
 0x657   : > { %v2331_v44 = vadd.f32 %v2330_v5, %v4886_v43  ;;  %v2490_v21 = vpack.c.b16 %v2478_v28, %v2474_v61  ;;  %v2491_v22 = vpack.c.b16 %v2479_v60, %v2475_v38 }
 0x658   : > { %v2402_v19 = vmax.f32 %v2305_v24, 0.0 }
 0x659   : > { %v2403_v18 = vmax.f32 %v2331_v44, 0.0 }
 0x65b   : > { %v2418_v36 = vpack.c.bf16 %v2403_v18, %v2402_v19 }
 0x65d   : > { %v2306_v12 = vpop.f32.mrf.mxu0  ;;  %v2482_v39 = vunpack.c.l.b16 %v2418_v36  ;;  %v2483_v13 = vunpack.c.h.b16 %v2418_v36 }
 0x65e   : > { %v2307_v55 = vadd.f32 %v2306_v12, %v4898_v0  ;;  %v2332_v53 = vpop.f32.mrf.mxu1 }
 0x65f   : > { %v2333_v62 = vadd.f32 %v2332_v53, %v4898_v0 }
 0x660   : > { %v2406_v45 = vmax.f32 %v2307_v55, 0.0 }
 0x661   : > { %v2407_v2 = vmax.f32 %v2333_v62, 0.0 }
 0x663   : > { %v2420_v10 = vpack.c.bf16 %v2407_v2, %v2406_v45 }
 0x665   : > { %v2486_v32 = vunpack.c.l.b16 %v2420_v10  ;;  %v2487_v56 = vunpack.c.h.b16 %v2420_v10  ;;  %v2309_v63 = vpop.f32.mrf.mxu0 }
 0x666   : > { %v2335_v42 = vpop.f32.mrf.mxu1  ;;  %v2310_v57 = vadd.f32 %v2309_v63, %v2247_v17 }
 0x667   : > { %v2494_v20 = vpack.c.b16 %v2486_v32, %v2482_v39  ;;  %v2495_v31 = vpack.c.b16 %v2487_v56, %v2483_v13  ;;  %v2336_v58 = vadd.f32 %v2335_v42, %v2247_v17 }
 0x668   : > { %v2410_v1 = vmax.f32 %v2310_v57, 0.0 }
 0x669   : > { %2519 = vmatpush.bf16.msra.mxu0 %v2494_v20  ;;  %2538 = vmatpush.bf16.msra.mxu1 %v2495_v31  ;;  %v2411_v15 = vmax.f32 %v2336_v58, 0.0 }
 0x66b   : > { %v4926_v34 = vpack.c.bf16 %v2411_v15, %v2410_v1  ;;  %v4949_v15 = vpop.permute.xlu2 %2438 }
 0x66d   : > { %2520 = vmatpush.bf16.msra.mxu0 %v2490_v21  ;;  %2539 = vmatpush.bf16.msra.mxu1 %v2491_v22  ;;  %v2311_v6 = vpop.f32.mrf.mxu0  ;;  %v2424_v35 = vunpack.c.l.bf16 %v4926_v34 }
 0x66e   : > { %v2337_v8 = vpop.f32.mrf.mxu1  ;;  %v2425_v6 = vunpack.c.h.bf16 %v4926_v34 }
 0x670   : > { %3396 = vmatmul.msk.bf16.vlgmr.msra.gmra.mxu0 %vm2506_vm3, %v4908_v25  ;;  %3398 = vmatmul.msk.bf16.vlgmr.msra.gmra.mxu1 %vm2506_vm3, %v4908_v25 }
 0x675   : > { %v2313_v63 = vpop.f32.mrf.mxu0 }
 0x676   : > { %v2351_v48 = vpop.f32.mrf.mxu2  ;;  %v2339_v42 = vpop.f32.mrf.mxu1 }
 0x677   : > { %v2377_v59 = vpop.f32.mrf.mxu3  ;;  %v2352_v44 = vadd.f32 %v2351_v48, %v4888_v37 }
 0x678   : > { %v2378_v23 = vadd.f32 %v2377_v59, %v4888_v37 }
 0x679   : > { %v2396_v49 = vmax.f32 %v2352_v44, 0.0 }
 0x67d   : > { %v2314_v57 = vpop.f32.mrf.mxu0 }
 0x67e   : > { %v2353_v52 = vpop.f32.mrf.mxu2  ;;  %v2340_v58 = vpop.f32.mrf.mxu1 }
 0x67f   : > { %v2379_v46 = vpop.f32.mrf.mxu3  ;;  %v2354_v5 = vadd.f32 %v2353_v52, %v4890_v26 }
 0x680   : > { %3397 = vmatmul.msk.bf16.gmra.mxu0 %vm2506_vm3, %v3395_v29  ;;  %3399 = vmatmul.msk.bf16.gmra.mxu1 %vm2506_vm3, %v3395_v29  ;;  %v2380_v24 = vadd.f32 %v2379_v46, %v4890_v26 }
 0x681   : > { %v2400_v19 = vmax.f32 %v2354_v5, 0.0 }
 0x682   : > { %v2401_v18 = vmax.f32 %v2380_v24, 0.0 }
 0x684   : > { %v2417_v26 = vpack.c.bf16 %v2401_v18, %v2400_v19 }
 0x686   : > { %v2356_v50 = vpop.f32.mrf.mxu2  ;;  %v2480_v10 = vunpack.c.l.b16 %v2417_v26  ;;  %v2481_v61 = vunpack.c.h.b16 %v2417_v26 }
 0x687   : > { %v2382_v30 = vpop.f32.mrf.mxu3  ;;  %v2357_v7 = vadd.f32 %v2356_v50, %v4886_v43 }
 0x688   : > { %v2383_v47 = vadd.f32 %v2382_v30, %v4886_v43  ;;  %v2397_v43 = vmax.f32 %v2378_v23, 0.0 }
 0x689   : > { %v2404_v11 = vmax.f32 %v2357_v7, 0.0  ;;  %v4955_v7 = vpop.permute.xlu0 %2443 }
 0x68a   : > { %v2405_v40 = vmax.f32 %v2383_v47, 0.0  ;;  %v2415_v62 = vpack.c.bf16 %v2397_v43, %v2396_v49 }
 0x68c   : > { %v2419_v55 = vpack.c.bf16 %v2405_v40, %v2404_v11  ;;  %v2476_v56 = vunpack.c.l.b16 %v2415_v62  ;;  %v2477_v28 = vunpack.c.h.b16 %v2415_v62 }
 0x68e   : > { %v2358_v16 = vpop.f32.mrf.mxu2  ;;  %v2484_v45 = vunpack.c.l.b16 %v2419_v55  ;;  %v2485_v37 = vunpack.c.h.b16 %v2419_v55  ;;  %v2492_v20 = vpack.c.b16 %v2480_v10, %v2476_v56  ;;  %v2493_v31 = vpack.c.b16 %v2481_v61, %v2477_v28 }
 0x68f   : > { %v2359_v14 = vadd.f32 %v2358_v16, %v4898_v0  ;;  %v2384_v41 = vpop.f32.mrf.mxu3 }
 0x690   : > { %v2385_v12 = vadd.f32 %v2384_v41, %v4898_v0 }
 0x691   : > { %v2408_v51 = vmax.f32 %v2359_v14, 0.0 }
 0x692   : > { %v2409_v53 = vmax.f32 %v2385_v12, 0.0 }
 0x694   : > { %v2421_v36 = vpack.c.bf16 %v2409_v53, %v2408_v51  ;;  %v4959_v51 = vpop.permute.xlu1 %2448 }
 0x696   : > { %v2488_v54 = vunpack.c.l.b16 %v2421_v36  ;;  %v2489_v2 = vunpack.c.h.b16 %v2421_v36  ;;  %v2361_v33 = vpop.f32.mrf.mxu2 }
 0x697   : > { %v2362_v39 = vadd.f32 %v2361_v33, %v2247_v17  ;;  %v2387_v13 = vpop.f32.mrf.mxu3 }
 0x698   : > { %v2496_v38 = vpack.c.b16 %v2488_v54, %v2484_v45  ;;  %v2497_v9 = vpack.c.b16 %v2489_v2, %v2485_v37  ;;  %v2388_v0 = vadd.f32 %v2387_v13, %v2247_v17 }
 0x699   : > { %v2412_v32 = vmax.f32 %v2362_v39, 0.0 }
 0x69a   : > { %2557 = vmatpush.bf16.msra.mxu2 %v2496_v38  ;;  %2576 = vmatpush.bf16.msra.mxu3 %v2497_v9  ;;  %v2413_v60 = vmax.f32 %v2388_v0, 0.0 }
 0x69c   : > { %v4938_v21 = vpack.c.bf16 %v2413_v60, %v2412_v32 }
 0x69e   : > { %2558 = vmatpush.bf16.msra.mxu2 %v2492_v20  ;;  %2577 = vmatpush.bf16.msra.mxu3 %v2493_v31  ;;  %v2363_v22 = vpop.f32.mrf.mxu2 }
 0x69f   : > { %v2389_v3 = vpop.f32.mrf.mxu3 }
 0x6a1   : > { %3400 = vmatmul.msk.bf16.vlgmr.msra.gmra.mxu2 %vm2506_vm3, %v4908_v25  ;;  %3402 = vmatmul.msk.bf16.vlgmr.msra.gmra.mxu3 %vm2506_vm3, %v4908_v25 }
 0x6a6   : > { %v2365_v17 = vpop.f32.mrf.mxu2 }
 0x6a7   : > { %v2391_v48 = vpop.f32.mrf.mxu3 }
 0x6ae   : > { %v2366_v59 = vpop.f32.mrf.mxu2 }
 0x6af   : > { %v2392_v1 = vpop.f32.mrf.mxu3 }
 0x6b1   : > { %3401 = vmatmul.msk.bf16.gmra.mxu2 %vm2506_vm3, %v3395_v29  ;;  %3403 = vmatmul.msk.bf16.gmra.mxu3 %vm2506_vm3, %v3395_v29 }
 0x6ed   : > { %v2522_v25 = vpop.f32.mrf.mxu0  ;;  %v2541_v27 = vpop.f32.mrf.mxu1 }
 0x6ee   : > { %v2523_v29 = vadd.f32 %v2522_v25, %v4949_v15  ;;  %v2542_v8 = vadd.f32 %v2541_v27, %v4949_v15 }
 0x6f0   : > { %v2589_v52 = vmul.f32 %v2523_v29, %v2424_v35  ;;  %v2590_v46 = vmul.f32 %v2542_v8, %v2425_v6  ;;  %v4974_v8 = vunpack.c.l.bf16 %v4938_v21 }
 0x6f2   : > { %v2593_v50 = vrot.slane %v2589_v52, 4  ;;  %v2599_v30 = vrot.slane %v2590_v46, 4 }
 0x6f4   : > { %v2594_v5 = vadd.f32 %v2593_v50, %v2589_v52  ;;  %v2600_v24 = vadd.f32 %v2599_v30, %v2590_v46 }
 0x6f5   : > { %v2524_v47 = vpop.f32.mrf.mxu0  ;;  %v2543_v16 = vpop.f32.mrf.mxu1 }
 0x6f6   : > { %v2525_v44 = vadd.f32 %v2524_v47, %v4955_v7  ;;  %v2595_v23 = vrot.slane %v2594_v5, 2  ;;  %v2601_v11 = vrot.slane %v2600_v24, 2  ;;  %v2544_v34 = vadd.f32 %v2543_v16, %v4955_v7 }
 0x6f7   : > { %v4979_v47 = vunpack.c.h.bf16 %v4938_v21 }
 0x6f8   : > { %v2712_v40 = vmul.f32 %v2525_v44, %v2424_v35  ;;  %v2596_v19 = vadd.f32 %v2595_v23, %v2594_v5  ;;  %v2602_v18 = vadd.f32 %v2601_v11, %v2600_v24  ;;  %v2713_v12 = vmul.f32 %v2544_v34, %v2425_v6 }
 0x6fa   : > { %v2716_v14 = vrot.slane %v2712_v40, 4  ;;  %v2597_v41 = vrot.slane %v2596_v19, 1  ;;  %v2603_v49 = vrot.slane %v2602_v18, 1  ;;  %v2722_v26 = vrot.slane %v2713_v12, 4 }
 0x6fc   : > { %v2717_v43 = vadd.f32 %v2716_v14, %v2712_v40  ;;  %v2598_v53 = vadd.f32 %v2597_v41, %v2596_v19  ;;  %v2604_v62 = vadd.f32 %v2603_v49, %v2602_v18  ;;  %v2723_v33 = vadd.f32 %v2722_v26, %v2713_v12 }
 0x6fd   : > { %v2527_v55 = vpop.f32.mrf.mxu0  ;;  %v2546_v36 = vpop.f32.mrf.mxu1 }
 0x6fe   : > { %v2718_v45 = vrot.slane %v2717_v43, 2  ;;  %v2528_v37 = vadd.f32 %v2527_v55, %v4959_v51  ;;  %v3404_v54 = vmul.f32 -1.442695, %v2598_v53  ;;  %v2547_v2 = vadd.f32 %v2546_v36, %v4959_v51 }
 0x6ff   : > { %v3405_v10 = vmul.f32 -1.442695, %v2604_v62  ;;  %v2724_v38 = vrot.slane %v2723_v33, 2 }
 0x700   : > { %v2719_v39 = vadd.f32 %v2718_v45, %v2717_v43  ;;  %v2829_v13 = vmul.f32 %v2528_v37, %v2424_v35  ;;  %3559 = vpow2.f32 %v3404_v54  ;;  %v2830_v61 = vmul.f32 %v2547_v2, %v2425_v6 }
 0x701   : > { %3561 = vpow2.f32 %v3405_v10  ;;  %v2725_v56 = vadd.f32 %v2724_v38, %v2723_v33 }
 0x702   : > { %v2720_v9 = vrot.slane %v2719_v39, 1  ;;  %v2833_v0 = vrot.slane %v2829_v13, 4  ;;  %v2839_v32 = vrot.slane %v2830_v61, 4 }
 0x703   : > { %v2726_v4 = vrot.slane %v2725_v56, 1 }
 0x704   : > { %v2721_v60 = vadd.f32 %v2720_v9, %v2719_v39  ;;  %v2834_v20 = vadd.f32 %v2833_v0, %v2829_v13  ;;  %v2840_v22 = vadd.f32 %v2839_v32, %v2830_v61  ;;  %v5006_v61 = vpop.permute.xlu2 %2453 }
 0x705   : > { %v2727_v57 = vadd.f32 %v2726_v4, %v2725_v56  ;;  %v2548_v38 = vpop.f32.mrf.mxu1 }
 0x706   : > { %v3560_v28 = vpop.eup %3559  ;;  %v3408_v63 = vmul.f32 -1.442695, %v2721_v60  ;;  %v2835_v42 = vrot.slane %v2834_v20, 2  ;;  %v2841_v48 = vrot.slane %v2840_v22, 2 }
 0x707   : > { %v3562_v31 = vpop.eup %3561  ;;  %v4963_v3 = vadd.f32 1.0, %v3560_v28  ;;  %v3409_v1 = vmul.f32 -1.442695, %v2727_v57 }
 0x708   : > { %v4965_v17 = vadd.f32 1.0, %v3562_v31  ;;  %v2836_v58 = vadd.f32 %v2835_v42, %v2834_v20  ;;  %v2842_v59 = vadd.f32 %v2841_v48, %v2840_v22 }
 0x709   : > { %3563 = vrcp.f32 %v4963_v3  ;;  %v2644_v19 = vand.u32 2147483648, %v4963_v3  ;;  %vm2638_vm4 = vweird.f32 %v4963_v3 }
 0x70a   : > { %3565 = vpow2.f32 %v3408_v63  ;;  %v2837_v25 = vrot.slane %v2836_v58, 1  ;;  %v2843_v29 = vrot.slane %v2842_v59, 1  ;;  %v2659_v34 = vand.u32 2147483648, %v4965_v17 }
 0x70b   : > { %3567 = vrcp.f32 %v4965_v17  ;;  %v2657_v55 = vand.u32 2147483647, %v4965_v17  ;;  %v4995_v36 = vor.u32 1.1754944e-38, %v2644_v19  ;;  %vm2653_vm6 = vweird.f32 %v4965_v17 }
 0x70c   : > { %3569 = vpow2.f32 %v3409_v1  ;;  %v2838_v46 = vadd.f32 %v2837_v25, %v2836_v58  ;;  %v2844_v11 = vadd.f32 %v2843_v29, %v2842_v59  ;;  %v4997_v62 = vor.u32 1.1754944e-38, %v2659_v34 }
 0x70d   : > { %vm5026_vm9 = vcmp.eq.f32.partialorder %v2657_v55, 8.507059e+37 }
 0x70e   : > { %v3413_v18 = vmul.f32 -1.442695, %v2838_v46  ;;  %v3414_v43 = vmul.f32 -1.442695, %v2844_v11 }
 0x70f   : > { %v4969_v27 = vpop.eup %3563 }
 0x710   : > { %v3566_v35 = vpop.eup %3565  ;;  %v2634_v52 = vmul.f32 %v4969_v27, %v4963_v3  ;;  %vm2639_vm5 = vweird.f32 %v4969_v27 }
 0x711   : > { %v4971_v6 = vpop.eup %3567  ;;  %v4981_v5 = vadd.f32 1.0, %v3566_v35  ;;  %vm5037_vm10 = vmor %vm2638_vm4, %vm2639_vm5 }
 0x712   : > { %v2649_v23 = vmul.f32 %v4971_v6, %v4965_v17  ;;  %v2635_v21 = vsub.f32 1.0, %v2634_v52  ;;  %v3570_v14 = vpop.eup %3569  ;;  %vm2654_vm7 = vweird.f32 %v4971_v6 }
 0x713   : > { %3571 = vrcp.f32 %v4981_v5  ;;  %v4999_v45 = vadd.f32 1.0, %v3570_v14  ;;  %v2767_v0 = vand.u32 2147483648, %v4981_v5  ;;  %v2765_v35 = vand.u32 2147483647, %v4981_v5  ;;  %vm5051_vm11 = vmor %vm2653_vm6, %vm2654_vm7 }
 0x714   : > { %v2650_v49 = vsub.f32 1.0, %v2649_v23  ;;  %3573 = vpow2.f32 %v3413_v18  ;;  %v2636_v2 = vmul.f32 %v4969_v27, %v2635_v21  ;;  %vm2761_vm14 = vweird.f32 %v4981_v5 }
 0x715   : > { %3575 = vpow2.f32 %v3414_v43  ;;  %v2782_v4 = vand.u32 2147483648, %v4999_v45  ;;  %v5031_v29 = vor.u32 1.1754944e-38, %v2767_v0  ;;  %v2780_v19 = vand.u32 2147483647, %v4999_v45 }
 0x716   : > { %v2651_v9 = vmul.f32 %v4971_v6, %v2650_v49  ;;  %3577 = vrcp.f32 %v4999_v45  ;;  %v2637_v31 = vadd.f32 %v4969_v27, %v2636_v2  ;;  %vm2776_vm1 = vweird.f32 %v4999_v45 }
 0x717   : > { %v5045_v34 = vor.u32 1.1754944e-38, %v2782_v4  ;;  %vm5153_vm6 = vcmp.eq.f32.partialorder %v2780_v19, 8.507059e+37 }
 0x718   : > { %v2652_v1 = vadd.f32 %v4971_v6, %v2651_v9 }
 0x719   : > { %v5011_v32 = vpop.eup %3571 }
 0x71a   : > { %v3574_v58 = vpop.eup %3573  ;;  %v2757_v59 = vmul.f32 %v5011_v32, %v4981_v5  ;;  %v2656_v43 = vsel %vm5051_vm11, %v4971_v6, %v2652_v1  ;;  %vm2762_vm13 = vweird.f32 %v5011_v32 }
 0x71b   : > { %vm5117_vm4 = vmor %vm2761_vm14, %vm2762_vm13 }
 0x71c   : > { %v2758_v55 = vsub.f32 1.0, %v2757_v59 }
 0x724   : > { %v2560_v50 = vpop.f32.mrf.mxu2  ;;  %v2579_v30 = vpop.f32.mrf.mxu3 }
 0x725   : > { %v2561_v24 = vadd.f32 %v2560_v50, %v4949_v15  ;;  %v2580_v44 = vadd.f32 %v2579_v30, %v4949_v15  ;;  %v2642_v15 = vand.u32 2147483647, %v4963_v3 }
 0x727   : > { %v2591_v40 = vmul.f32 %v2561_v24, %v4974_v8  ;;  %v2592_v16 = vmul.f32 %v2580_v44, %v4979_v47  ;;  %vm5018_vm8 = vcmp.eq.f32.partialorder %v2642_v15, 8.507059e+37  ;;  %v3576_v44 = vpop.eup %3575  ;;  %v5057_v15 = vadd.f32 1.0, %v3574_v58 }
 0x729   : > { %v2605_v41 = vrot.slane %v2591_v40, 4  ;;  %v2611_v12 = vrot.slane %v2592_v16, 4 }
 0x72b   : > { %v2606_v53 = vadd.f32 %v2605_v41, %v2591_v40  ;;  %v2612_v26 = vadd.f32 %v2611_v12, %v2592_v16  ;;  %v2641_v16 = vsel %vm5037_vm10, %v4969_v27, %v2637_v31  ;;  %v5055_v12 = vpop.eup %3577 }
 0x72c   : > { %v2562_v37 = vpop.f32.mrf.mxu2  ;;  %v2581_v54 = vpop.f32.mrf.mxu3  ;;  %v2646_v6 = vsel %vm5018_vm8, %v4995_v36, %v2641_v16  ;;  %vm2777_vm2 = vweird.f32 %v5055_v12 }
 0x72d   : > { %v2607_v33 = vrot.slane %v2606_v53, 2  ;;  %v2613_v10 = vrot.slane %v2612_v26, 2  ;;  %v2563_v39 = vadd.f32 %v2562_v37, %v4955_v7  ;;  %v2582_v13 = vadd.f32 %v2581_v54, %v4955_v7  ;;  %vm5162_vm8 = vmor %vm2776_vm1, %vm2777_vm2 }
 0x72e   : > { %v2549_v7 = vadd.f32 %v2548_v38, %v5006_v61  ;;  %v5064_v37 = vadd.f32 1.0, %v3576_v44  ;;  %vm5181_vm2 = vcmp.eq.f32.partialorder %v2765_v35, 8.507059e+37 }
 0x72f   : > { %v2608_v56 = vadd.f32 %v2607_v33, %v2606_v53  ;;  %v2614_v28 = vadd.f32 %v2613_v10, %v2612_v26  ;;  %v2714_v60 = vmul.f32 %v2563_v39, %v4974_v8  ;;  %v2715_v20 = vmul.f32 %v2582_v13, %v4979_v47  ;;  %v2529_v26 = vpop.f32.mrf.mxu0 }
 0x730   : > { %v2947_v40 = vmax.f32 %v2549_v7, 0.0  ;;  %v2772_v33 = vmul.f32 %v5055_v12, %v4999_v45  ;;  %v2530_v9 = vadd.f32 %v2529_v26, %v5006_v61 }
 0x731   : > { %v2609_v63 = vrot.slane %v2608_v56, 1  ;;  %v2615_v42 = vrot.slane %v2614_v28, 1  ;;  %v2728_v48 = vrot.slane %v2714_v60, 4  ;;  %v2734_v57 = vrot.slane %v2715_v20, 4 }
 0x732   : > { %v2954_v38 = vrot.slane %v2947_v40, 7  ;;  %v2773_v31 = vsub.f32 1.0, %v2772_v33  ;;  %v2946_v44 = vmax.f32 %v2530_v9, 0.0 }
 0x733   : > { %v2610_v52 = vadd.f32 %v2609_v63, %v2608_v56  ;;  %v2616_v46 = vadd.f32 %v2615_v42, %v2614_v28  ;;  %v2729_v50 = vadd.f32 %v2728_v48, %v2714_v60  ;;  %v2735_v30 = vadd.f32 %v2734_v57, %v2715_v20 }
 0x734   : > { %v2565_v23 = vpop.f32.mrf.mxu2  ;;  %v2584_v11 = vpop.f32.mrf.mxu3  ;;  %v2759_v20 = vmul.f32 %v5011_v32, %v2758_v55  ;;  %v2884_v55 = vand.u32 2147483648, %v5057_v15 }
 0x735   : > { %v3406_v21 = vmul.f32 -1.442695, %v2610_v52  ;;  %v3407_v18 = vmul.f32 -1.442695, %v2616_v46  ;;  %v2730_v14 = vrot.slane %v2729_v50, 2  ;;  %v2736_v3 = vrot.slane %v2735_v30, 2 }
 0x736   : > { %v2566_v27 = vadd.f32 %v2565_v23, %v4959_v51  ;;  %v2585_v49 = vadd.f32 %v2584_v11, %v4959_v51 }
 0x737   : > { %3579 = vpow2.f32 %v3406_v21  ;;  %v2731_v53 = vadd.f32 %v2730_v14, %v2729_v50  ;;  %v2737_v17 = vadd.f32 %v2736_v3, %v2735_v30  ;;  %v2707_v50 = vlaneseq }
 0x738   : > { %3581 = vpow2.f32 %v3407_v18  ;;  %v2831_v54 = vmul.f32 %v2566_v27, %v4974_v8  ;;  %v2832_v2 = vmul.f32 %v2585_v49, %v4979_v47  ;;  %v2661_v47 = vsel %vm5026_vm9, %v4997_v62, %v2656_v43 }
 0x739   : > { %v2732_v51 = vrot.slane %v2731_v53, 1  ;;  %v2738_v10 = vrot.slane %v2737_v17, 1  ;;  %3583 = vrcp.f32 %v5057_v15  ;;  %v2697_v24 = vrot.slane %v2661_v47, 7 }
 0x73a   : > { %v2845_v39 = vrot.slane %v2831_v54, 4  ;;  %v2851_v13 = vrot.slane %v2832_v2, 4  ;;  %3585 = vrcp.f32 %v5064_v37  ;;  %v5096_v21 = vadd.f32 %v5011_v32, %v2759_v20 }
 0x73b   : > { %v2733_v8 = vadd.f32 %v2732_v51, %v2731_v53  ;;  %v2739_v0 = vadd.f32 %v2738_v10, %v2737_v17  ;;  %v2774_v18 = vmul.f32 %v5055_v12, %v2773_v31  ;;  %vm5101_vm3 = vcmp.lt.s32.totalorder %v2707_v50, 512 }
 0x73c   : > { %v2846_v56 = vadd.f32 %v2845_v39, %v2831_v54  ;;  %v2852_v36 = vadd.f32 %v2851_v13, %v2832_v2  ;;  %v2567_v28 = vpop.f32.mrf.mxu2  ;;  %v2586_v60 = vpop.f32.mrf.mxu3  ;;  %v5107_v43 = vsel %vm2700_vm12, %v2646_v6, %v2697_v24  ;;  %v2957_v53 = vsel %vm2700_vm12, %v2946_v44, %v2954_v38 }
 0x73d   : > { %v3580_v7 = vpop.eup %3579  ;;  %v3410_v22 = vmul.f32 -1.442695, %v2733_v8  ;;  %v2568_v4 = vadd.f32 %v2567_v28, %v5006_v61  ;;  %v2587_v63 = vadd.f32 %v2586_v60, %v5006_v61  ;;  %v3411_v48 = vmul.f32 -1.442695, %v2739_v0 }
 0x73e   : > { %v3582_v62 = vpop.eup %3581  ;;  %v5084_v42 = vadd.f32 1.0, %v3580_v7  ;;  %v2847_v57 = vrot.slane %v2846_v56, 2  ;;  %v2853_v58 = vrot.slane %v2852_v36, 2  ;;  %v2764_v39 = vsel %vm5117_vm4, %v5011_v32, %v5096_v21 }
 0x73f   : > { %v5086_v59 = vadd.f32 1.0, %v3582_v62  ;;  %3587 = vpow2.f32 %v3410_v22  ;;  %v2948_v1 = vmax.f32 %v2568_v4, 0.0  ;;  %v2949_v25 = vmax.f32 %v2587_v63, 0.0  ;;  %v5089_v61 = vpop.eup %3583 }
 0x740   : > { %3589 = vrcp.f32 %v5084_v42  ;;  %v2848_v52 = vadd.f32 %v2847_v57, %v2846_v56  ;;  %v2854_v46 = vadd.f32 %v2853_v58, %v2852_v36  ;;  %v5093_v23 = vpop.eup %3585  ;;  %v2897_v13 = vand.u32 2147483647, %v5064_v37 }
 0x741   : > { %3591 = vrcp.f32 %v5086_v59  ;;  %v2955_v30 = vrot.slane %v2948_v1, 6  ;;  %v2956_v16 = vrot.slane %v2949_v25, 5  ;;  %v2899_v38 = vand.u32 2147483648, %v5064_v37 }
 0x742   : > { %3593 = vpow2.f32 %v3411_v48  ;;  %v2849_v11 = vrot.slane %v2848_v52, 1  ;;  %v2855_v40 = vrot.slane %v2854_v46, 1  ;;  %v5138_v8 = vmul.f32 %v5089_v61, %v5057_v15 }
 0x743   : > { %v2958_v49 = vsel %vm2702_vm15, %v2955_v30, %v2956_v16  ;;  %v2775_v47 = vadd.f32 %v5055_v12, %v2774_v18  ;;  %v2889_v56 = vmul.f32 %v5093_v23, %v5064_v37  ;;  %v2672_v20 = vand.u32 2147483647, %v5084_v42 }
 0x744   : > { %v2850_v14 = vadd.f32 %v2849_v11, %v2848_v52  ;;  %v2856_v3 = vadd.f32 %v2855_v40, %v2854_v46  ;;  %v2959_v51 = vsel %vm2704_vm0, %v2957_v53, %v2958_v49  ;;  %v2674_v7 = vand.u32 2147483648, %v5084_v42 }
 0x745   : > { %v3588_v27 = vpop.eup %3587  ;;  %3418 = vst.msk [vmem:[%s5131_s28 + $0x3] ss:$4 sm:$0xf] %vm5101_vm3, %v2959_v51  ;;  %v2689_v22 = vand.u32 2147483648, %v5086_v59  ;;  %v2687_v62 = vand.u32 2147483647, %v5086_v59  ;;  %vm2668_vm9 = vweird.f32 %v5084_v42  ;;  %v2779_v1 = vsel %vm5162_vm8, %v5055_v12, %v2775_v47 }
 0x746   : > { %v3590_v17 = vpop.eup %3589  ;;  %v5111_v26 = vadd.f32 1.0, %v3588_v27  ;;  %v3415_v54 = vmul.f32 -1.442695, %v2850_v14  ;;  %v3416_v2 = vmul.f32 -1.442695, %v2856_v3  ;;  %v5166_v57 = vor.u32 1.1754944e-38, %v2899_v38 }
 0x747   : > { %v3592_v10 = vpop.eup %3591  ;;  %v2664_v6 = vmul.f32 %v3590_v17, %v5084_v42  ;;  %vm2669_vm5 = vweird.f32 %v3590_v17  ;;  %v2875_v58 = vsub.f32 1.0, %v5138_v8  ;;  %v2890_v52 = vsub.f32 1.0, %v2889_v56 }
 0x748   : > { %v3594_v9 = vpop.eup %3593  ;;  %v2679_v0 = vmul.f32 %v3592_v10, %v5086_v59  ;;  %3595 = vrcp.f32 %v5111_v26  ;;  %vm2684_vm7 = vweird.f32 %v3592_v10  ;;  %vm2683_vm10 = vweird.f32 %v5086_v59  ;;  %vm2670_vm11 = vmor %vm2668_vm9, %vm2669_vm5 }
 0x749   : > { %v2665_v36 = vsub.f32 1.0, %v2664_v6  ;;  %v5145_v28 = vadd.f32 1.0, %v3594_v9  ;;  %3597 = vpow2.f32 %v3415_v54  ;;  %v2675_v45 = vor.u32 1.1754944e-38, %v2674_v7  ;;  %vm2685_vm14 = vmor %vm2683_vm10, %vm2684_vm7 }
 0x74a   : > { %v2680_v60 = vsub.f32 1.0, %v2679_v0  ;;  %3599 = vpow2.f32 %v3416_v2  ;;  %vm2673_vm13 = vcmp.eq.f32.partialorder %v2672_v20, 8.507059e+37  ;;  %v2690_v42 = vor.u32 1.1754944e-38, %v2689_v22 }
 0x74b   : > { %v2666_v31 = vmul.f32 %v3590_v17, %v2665_v36  ;;  %3601 = vrcp.f32 %v5145_v28  ;;  %vm2688_vm1 = vcmp.eq.f32.partialorder %v2687_v62, 8.507059e+37  ;;  %vm2894_vm5 = vweird.f32 %v5093_v23 }
 0x74c   : > { %v2681_v63 = vmul.f32 %v3592_v10, %v2680_v60  ;;  %vm2893_vm7 = vweird.f32 %v5064_v37  ;;  %v2795_v35 = vand.u32 2147483647, %v5111_v26  ;;  %v2891_v54 = vmul.f32 %v5093_v23, %v2890_v52 }
 0x74d   : > { %v2667_v19 = vadd.f32 %v3590_v17, %v2666_v31  ;;  %vm2791_vm9 = vweird.f32 %v5111_v26  ;;  %v2812_v38 = vand.u32 2147483648, %v5145_v28  ;;  %v2810_v47 = vand.u32 2147483647, %v5145_v28  ;;  %vm5235_vm4 = vmor %vm2893_vm7, %vm2894_vm5 }
 0x74e   : > { %v3596_v25 = vpop.eup %3595  ;;  %v2682_v46 = vadd.f32 %v3592_v10, %v2681_v63  ;;  %v2876_v56 = vmul.f32 %v5089_v61, %v2875_v58  ;;  %v2892_v7 = vadd.f32 %v5093_v23, %v2891_v54  ;;  %v2769_v4 = vsel %vm5181_vm2, %v5031_v29, %v2764_v39 }
 0x74f   : > { %v3598_v50 = vpop.eup %3597  ;;  %v2787_v30 = vmul.f32 %v3596_v25, %v5111_v26  ;;  %v2671_v24 = vsel %vm2670_vm11, %v3590_v17, %v2667_v19  ;;  %v2797_v17 = vand.u32 2147483648, %v5111_v26  ;;  %vm2792_vm8 = vweird.f32 %v3596_v25 }
 0x750   : > { %v3600_v44 = vpop.eup %3599  ;;  %v5177_v11 = vadd.f32 1.0, %v3598_v50  ;;  %v2676_v12 = vsel %vm2673_vm13, %v2675_v45, %v2671_v24  ;;  %v2686_v40 = vsel %vm2685_vm14, %v3592_v10, %v2682_v46  ;;  %v2784_v10 = vsel %vm5153_vm6, %v5045_v34, %v2779_v1  ;;  %vm2793_vm10 = vmor %vm2791_vm9, %vm2792_vm8 }
 0x751   : > { %v3602_v16 = vpop.eup %3601  ;;  %v2788_v18 = vsub.f32 1.0, %v2787_v30  ;;  %v5186_v14 = vadd.f32 1.0, %v3600_v44  ;;  %v2691_v3 = vsel %vm2688_vm1, %v2690_v42, %v2686_v40  ;;  %v2698_v27 = vrot.slane %v2676_v12, 6 }
 0x752   : > { %v2802_v49 = vmul.f32 %v3602_v16, %v5145_v28  ;;  %3603 = vrcp.f32 %v5177_v11  ;;  %v2699_v53 = vrot.slane %v2691_v3, 5  ;;  %v2798_v0 = vor.u32 1.1754944e-38, %v2797_v17 }
 0x753   : > { %v2789_v5 = vmul.f32 %v3596_v25, %v2788_v18  ;;  %3605 = vrcp.f32 %v5186_v14  ;;  %vm2807_vm11 = vweird.f32 %v3602_v16  ;;  %vm2878_vm13 = vweird.f32 %v5057_v15 }
 0x754   : > { %v2803_v2 = vsub.f32 1.0, %v2802_v49  ;;  %v2703_v51 = vsel %vm2702_vm15, %v2698_v27, %v2699_v53  ;;  %vm5207_vm14 = vcmp.eq.f32.partialorder %v2897_v13, 8.507059e+37  ;;  %vm2796_vm6 = vcmp.eq.f32.partialorder %v2795_v35, 8.507059e+37 }
 0x755   : > { %v2790_v6 = vadd.f32 %v3596_v25, %v2789_v5  ;;  %v2705_v9 = vsel %vm2704_vm0, %v5107_v43, %v2703_v51  ;;  %v2820_v43 = vrot.slane %v2784_v10, 7  ;;  %vm2806_vm1 = vweird.f32 %v5145_v28 }
 0x756   : > { %v2804_v8 = vmul.f32 %v3602_v16, %v2803_v2  ;;  %2711 = vst.msk [vmem:[%s5131_s28] ss:$4 sm:$0xf] %vm5101_vm3, %v2705_v9  ;;  %vm2808_vm8 = vmor %vm2806_vm1, %vm2807_vm11  ;;  %v2813_v22 = vor.u32 1.1754944e-38, %v2812_v38  ;;  %vm2879_vm9 = vweird.f32 %v5089_v61  ;;  %v2877_v33 = vadd.f32 %v5089_v61, %v2876_v56 }
 0x757   : > { %v2794_v26 = vsel %vm2793_vm10, %v3596_v25, %v2790_v6  ;;  %vm2811_vm10 = vcmp.eq.f32.partialorder %v2810_v47, 8.507059e+37  ;;  %v2823_v19 = vsel %vm2700_vm12, %v2769_v4, %v2820_v43  ;;  %v2914_v39 = vand.u32 2147483648, %v5177_v11  ;;  %vm5254_vm11 = vmor %vm2878_vm13, %vm2879_vm9 }
 0x758   : > { %v3604_v36 = vpop.eup %3603  ;;  %v2799_v60 = vsel %vm2796_vm6, %v2798_v0, %v2794_v26  ;;  %v2805_v20 = vadd.f32 %v3602_v16, %v2804_v8  ;;  %v2896_v1 = vsel %vm5235_vm4, %v5093_v23, %v2892_v7  ;;  %v2912_v52 = vand.u32 2147483647, %v5177_v11 }
 0x759   : > { %v3606_v31 = vpop.eup %3605  ;;  %v2904_v13 = vmul.f32 %v3604_v36, %v5177_v11  ;;  %v2821_v62 = vrot.slane %v2799_v60, 6  ;;  %vm2909_vm2 = vweird.f32 %v3604_v36  ;;  %v2929_v45 = vand.u32 2147483648, %v5186_v14 }
 0x75a   : > { %v2919_v28 = vmul.f32 %v3606_v31, %v5186_v14  ;;  %v2809_v63 = vsel %vm2808_vm8, %v3602_v16, %v2805_v20  ;;  %vm2924_vm5 = vweird.f32 %v3606_v31  ;;  %v2927_v50 = vand.u32 2147483647, %v5186_v14 }
 0x75b   : > { %v2905_v48 = vsub.f32 1.0, %v2904_v13  ;;  %v2814_v58 = vsel %vm2811_vm10, %v2813_v22, %v2809_v63  ;;  %vm2908_vm7 = vweird.f32 %v5177_v11  ;;  %v2901_v42 = vsel %vm5207_vm14, %v5166_v57, %v2896_v1 }
 0x75c   : > { %v2920_v29 = vsub.f32 1.0, %v2919_v28  ;;  %v2822_v21 = vrot.slane %v2814_v58, 5  ;;  %vm2923_vm6 = vweird.f32 %v5186_v14  ;;  %vm2910_vm1 = vmor %vm2908_vm7, %vm2909_vm2  ;;  %v2915_v44 = vor.u32 1.1754944e-38, %v2914_v39 }
 0x75d   : > { %v2906_v25 = vmul.f32 %v3604_v36, %v2905_v48  ;;  %v2882_v12 = vand.u32 2147483647, %v5057_v15  ;;  %vm2913_vm13 = vcmp.eq.f32.partialorder %v2912_v52, 8.507059e+37  ;;  %vm2925_vm8 = vmor %vm2923_vm6, %vm2924_vm5  ;;  %v2930_v57 = vor.u32 1.1754944e-38, %v2929_v45 }
 0x75e   : > { %v2921_v37 = vmul.f32 %v3606_v31, %v2920_v29  ;;  %v2824_v46 = vsel %vm2702_vm15, %v2821_v62, %v2822_v21  ;;  %v2881_v59 = vsel %vm5254_vm11, %v5089_v61, %v2877_v33  ;;  %vm2928_vm14 = vcmp.eq.f32.partialorder %v2927_v50, 8.507059e+37 }
 0x75f   : > { %v2907_v30 = vadd.f32 %v3604_v36, %v2906_v25  ;;  %v2825_v24 = vsel %vm2704_vm0, %v2823_v19, %v2824_v46  ;;  %v2937_v14 = vrot.slane %v2901_v42, 7  ;;  %v2885_v49 = vor.u32 1.1754944e-38, %v2884_v55 }
 0x760   : > { %v2922_v11 = vadd.f32 %v3606_v31, %v2921_v37  ;;  %3412 = vst.msk [vmem:[%s5131_s28 + $0x1] ss:$4 sm:$0xf] %vm5101_vm3, %v2825_v24  ;;  %vm2883_vm9 = vcmp.eq.f32.partialorder %v2882_v12, 8.507059e+37 }
 0x761   : > { %v2911_v40 = vsel %vm2910_vm1, %v3604_v36, %v2907_v30  ;;  %v2886_v17 = vsel %vm2883_vm9, %v2885_v49, %v2881_v59 }
 0x762   : > { %v2916_v16 = vsel %vm2913_vm13, %v2915_v44, %v2911_v40  ;;  %v2926_v18 = vsel %vm2925_vm8, %v3606_v31, %v2922_v11  ;;  %v2940_v61 = vsel %vm2700_vm12, %v2886_v17, %v2937_v14 }
 0x763   : > { %v2931_v3 = vsel %vm2928_vm14, %v2930_v57, %v2926_v18  ;;  %v2938_v27 = vrot.slane %v2916_v16, 6 }
 0x764   : > { %v2939_v53 = vrot.slane %v2931_v3, 5 }
 0x766   : > { %v2941_v5 = vsel %vm2702_vm15, %v2938_v27, %v2939_v53 }
 0x767   : > { %v2942_v35 = vsel %vm2704_vm0, %v2940_v61, %v2941_v5 }
 0x768   : > { %3417 = vst.msk [vmem:[%s5131_s28 + $0x2] ss:$4 sm:$0xf] %vm5101_vm3, %v2942_v35 }
 0x769   : > { %3680 = shalt.err (!%p3677_p9)
}
 0x76a   : > { %3476 = dma.vmem_to_hbm [thread:$0]  (%p3810_p6), %s2978_s13, 256, %s2980_s10, %s2964_s14  }
 0x76b PF: > { %s2991_s7 = sand.u32 1, %s3707_s21   ;;  %p3483_p11 = pnand %p3060_p1, %p3816_p10 }
 0x76c   : > { %s2992_s28 = scalar_lea.sflag [#allocation5], %s2991_s7 }
 0x76d   : > { %p3484_p12 = pneg %p3483_p11 }
 0x76f   : > { %3702 = dma.done.wait (%p3484_p12), %s2992_s28, 256  }
 0x770   : > { %3704 = vsyncadd (%p3484_p12), %s2992_s28, 4294967040  ;;  %p17_p13 = scmp.ge.s32.totalorder %s3792_s27, 4   ;;  %s5401_s21 = smov %s3711_s22 }
 0x771   : > { %s5402_s22 = smov %s3715_s23  ;;  %s5403_s23 = smov %s3804_s30 }
 0x772   : > { %s5404_s24 = smov %s3792_s27  ;;  %19 = sbr.rel (!%p17_p13) target bundleno = 4 (0x4), region = 121 }
 0x777   :  { %2998 = vsyncpa [#allocation4], 1 }
 0x778   :  { %3000 = vsyncpa [#allocation4 + $0x1], 1 }
 0x779   :  { %3001 = vsyncpa [#allocation5], 1 }
 0x77a   :  { %3003 = vsyncpa [#allocation5 + $0x1], 1 }

</bundles_post_ra>
